<compile_context>
chip_gen: v7x
topology: tpu7x:2x2x1
jax: 0.10.0
libtpu: 0.0.40
codegen_flags: <defaults>
</compile_context>

<pallas_src>
import functools
import math

import jax
import jax.numpy as jnp
from jax.experimental import pallas as pl
from jax.experimental.pallas import tpu as pltpu


# ----------------------------- in-kernel math -------------------------------

def _layer_norm(x, gamma, beta, eps=1e-6):
    # PyTorch nn.LayerNorm: biased variance over last dim, f32 math.
    mu = jnp.mean(x, axis=-1, keepdims=True)
    xc = x - mu
    var = jnp.mean(xc * xc, axis=-1, keepdims=True)
    return xc * jax.lax.rsqrt(var + eps) * gamma + beta


def _split_heads_bf16(x, heads):
    """(T, H*dh) f32 -> head-major (H, T, dh) bf16."""
    t, d = x.shape
    dh = d // heads
    xh = pltpu.einshape("thd->htd", x.reshape(t, heads, dh))
    return xh.astype(jnp.bfloat16)


def _merge_heads(x):
    """(H, T, dh) f32 -> (T, H*dh) f32."""
    h, t, dh = x.shape
    return pltpu.einshape("htd->thd", x).reshape(t, h * dh)


def _softmax(scores, mask):
    scores = jnp.where(mask, jnp.float32(-1e18), scores)
    m = jnp.max(scores, axis=-1, keepdims=True)
    e = jnp.exp(scores - m)
    return e * pl.reciprocal(jnp.sum(e, axis=-1, keepdims=True), approx=True)


def _mha_core(q, k, v, mask, wo, bo, heads):
    """Multi-head attention core.

    q: (TQ, D) f32, already scaled by 1/sqrt(dh); k, v: (Tk, D) f32;
    mask: bool, broadcastable to (TQ, Tk), True == masked;
    wo: (D, D) bf16 output projection; bo: (1, D) f32.
    Returns (out (TQ, D) f32, head-0 probs (TQ, Tk) f32).
    """
    tq, d = q.shape
    dh = d // heads
    if dh % 128 == 0:
        # Zero-copy per-head lane slices (128-aligned views): no head relayouts.
        out = jnp.zeros((tq, d), jnp.float32) + bo
        p0 = None
        for h in range(heads):
            lo, hi = h * dh, (h + 1) * dh
            qh = q[:, lo:hi].astype(jnp.bfloat16)
            kh = k[:, lo:hi].astype(jnp.bfloat16)
            vh = v[:, lo:hi].astype(jnp.bfloat16)
            s = jnp.einsum('qd,kd->qk', qh, kh, preferred_element_type=jnp.float32)
            p = _softmax(s, mask)
            if h == 0:
                p0 = p
            ctx = jnp.dot(p.astype(jnp.bfloat16), vh,
                          preferred_element_type=jnp.float32)
            out = out + jnp.dot(ctx.astype(jnp.bfloat16), wo[lo:hi, :],
                                preferred_element_type=jnp.float32)
        return out, p0
    # Head-major batched path (dh < 128): one relayout per Q/K/V tensor.
    qh = _split_heads_bf16(q, heads)
    kh = _split_heads_bf16(k, heads)
    vh = _split_heads_bf16(v, heads)
    s = jnp.einsum('hqd,hkd->hqk', qh, kh, preferred_element_type=jnp.float32)
    p = _softmax(s, mask[None])
    ctx = jnp.einsum('hqk,hkd->hqd', p.astype(jnp.bfloat16), vh,
                     preferred_element_type=jnp.float32)
    out = jnp.dot(_merge_heads(ctx).astype(jnp.bfloat16), wo,
                  preferred_element_type=jnp.float32) + bo
    return out, p[0]


def _decoder_layer_kernel(heads, return_attn,
                          xq_ref, xfull_ref, mem_ref, tgt_mask_ref, src_mask_ref,
                          *refs):
    (ln1_g, ln1_b, ln2_g, ln2_b, ffln_g, ffln_b,
     sa_wq, sa_bq, sa_wkv, sa_bkv, sa_wo, sa_bo,
     ca_wq, ca_bq, ca_wkv, ca_bkv, ca_wo, ca_bo,
     ff_w1, ff_b1, ff_w2, ff_b2) = refs[:22]
    out_ref = refs[22]
    attn_ref = refs[23] if return_attn else None

    x_q = xq_ref[0].astype(jnp.float32)        # (TQ, D)  this query block
    x_full = xfull_ref[0].astype(jnp.float32)  # (T, D)   full target sequence
    mem_bf = mem_ref[0]                        # (Sp, D)  bf16 memory bank
    TQ, D = x_q.shape
    T = x_full.shape[0]
    dh = D // heads
    scale = 1.0 / math.sqrt(dh)
    q_start = pl.program_id(1) * TQ

    # --- masks (built in-kernel; True == masked) ---
    q_pos = q_start + jax.lax.broadcasted_iota(jnp.int32, (TQ, T), 0)
    k_pos = jax.lax.broadcasted_iota(jnp.int32, (TQ, T), 1)
    dec_mask = jnp.logical_or(k_pos > q_pos, tgt_mask_ref[0] > 0.0)   # (TQ, T)
    src_mask = src_mask_ref[0] > 0.0                                  # (1, Sp)

    # --- self-attention block (pre-LN) ---
    ln_q = _layer_norm(x_q, ln1_g[...], ln1_b[...])
    ln_full = _layer_norm(x_full, ln1_g[...], ln1_b[...])
    q_self = (jnp.dot(ln_q.astype(jnp.bfloat16), sa_wq[...],
                      preferred_element_type=jnp.float32) + sa_bq[...]) * scale
    kv_self = jnp.dot(ln_full.astype(jnp.bfloat16), sa_wkv[...],
                      preferred_element_type=jnp.float32) + sa_bkv[...]
    sa_out, _ = _mha_core(q_self, kv_self[:, :D], kv_self[:, D:], dec_mask,
                          sa_wo[...], sa_bo[...], heads)
    query = sa_out + x_q                       # dropout = identity

    # --- context-attention block ---
    query_norm = _layer_norm(query, ln2_g[...], ln2_b[...])
    q_ctx = (jnp.dot(query_norm.astype(jnp.bfloat16), ca_wq[...],
                     preferred_element_type=jnp.float32) + ca_bq[...]) * scale
    kv_ctx = jnp.dot(mem_bf, ca_wkv[...],
                     preferred_element_type=jnp.float32) + ca_bkv[...]
    mid, p_top = _mha_core(q_ctx, kv_ctx[:, :D], kv_ctx[:, D:], src_mask,
                           ca_wo[...], ca_bo[...], heads)

    # --- position-wise feed-forward (internal LayerNorm, residual) ---
    ff_in = mid + query                        # dropout = identity
    ff_norm = _layer_norm(ff_in, ffln_g[...], ffln_b[...])
    inter = jnp.maximum(
        jnp.dot(ff_norm.astype(jnp.bfloat16), ff_w1[...],
                preferred_element_type=jnp.float32) + ff_b1[...], 0.0)
    ff_out = jnp.dot(inter.astype(jnp.bfloat16), ff_w2[...],
                     preferred_element_type=jnp.float32) + ff_b2[...] + ff_in

    out_ref[0] = ff_out.astype(out_ref.dtype)
    if return_attn:
        attn_ref[0] = p_top.astype(attn_ref.dtype)   # top-head ctx-attn probs


# ------------------------------- wrapper -------------------------------------

_WEIGHT_ORDER = (
    "ln1_g", "ln1_b", "ln2_g", "ln2_b", "ffln_g", "ffln_b",
    "sa_wq", "sa_bq", "sa_wkv", "sa_bkv", "sa_wo", "sa_bo",
    "ca_wq", "ca_bq", "ca_wkv", "ca_bkv", "ca_wo", "ca_bo",
    "ff_w1", "ff_b1", "ff_w2", "ff_b2",
)


def prepack_params(params):
    """Hoisted weight packing: fuse K/V projections, cast matmul weights to bf16.
    Call ONCE and reuse; avoids per-call concat/cast HLOs + HBM copies."""
    bf = jnp.bfloat16
    p = params
    return {
        "ln1_g": p["ln1_g"], "ln1_b": p["ln1_b"],
        "ln2_g": p["ln2_g"], "ln2_b": p["ln2_b"],
        "ffln_g": p["ffln_g"], "ffln_b": p["ffln_b"],
        "sa_wq": p["sa_wq"].astype(bf), "sa_bq": p["sa_bq"],
        "sa_wkv": jnp.concatenate([p["sa_wk"], p["sa_wv"]], axis=1).astype(bf),
        "sa_bkv": jnp.concatenate([p["sa_bk"], p["sa_bv"]], axis=1),
        "sa_wo": p["sa_wo"].astype(bf), "sa_bo": p["sa_bo"],
        "ca_wq": p["ca_wq"].astype(bf), "ca_bq": p["ca_bq"],
        "ca_wkv": jnp.concatenate([p["ca_wk"], p["ca_wv"]], axis=1).astype(bf),
        "ca_bkv": jnp.concatenate([p["ca_bk"], p["ca_bv"]], axis=1),
        "ca_wo": p["ca_wo"].astype(bf), "ca_bo": p["ca_bo"],
        "ff_w1": p["ff_w1"].astype(bf), "ff_b1": p["ff_b1"],
        "ff_w2": p["ff_w2"].astype(bf), "ff_b2": p["ff_b2"],
    }


def _round_up(x, m):
    return ((x + m - 1) // m) * m


def _choose_tq(T):
    """Query-block size: bounds f32 score/FFN temporaries, adds a 2nd parallel axis."""
    if T <= 256:
        return T
    for cand in (256, 512, 384, 320, 192, 128, 64, 32, 16):
        if T % cand == 0:
            return cand
    return T


def _vmem_budget(T, S_pad, D, F, heads, TQ):
    """Explicit scoped-VMEM request sized from the shapes, capped at physical VMEM."""
    bf, f4 = 2, 4
    weights = (8 * D * D + 2 * D * F) * bf + (10 * D + 3 * F) * f4
    blocks = 2 * ((TQ * D + T * D + S_pad * D) * bf + (T + S_pad) * f4
                  + TQ * D * f4 + TQ * S_pad * bf)          # double-buffered tiles
    temps = (heads * TQ * (T + S_pad)) * f4 \
        + (T + S_pad) * 2 * D * f4 + TQ * F * f4 + 8 * TQ * D * f4 + T * D * f4
    est = int(1.5 * (weights + blocks + temps))
    try:
        cap = int(0.9 * pltpu.get_tpu_info().vmem_capacity_bytes)
    except Exception:
        cap = 64 * 1024 * 1024
    return max(min(est, cap), 8 * 1024 * 1024)


def multi_transformer_decoder_layer(inputs, memory_bank, src_pad_mask, tgt_pad_mask,
                                    packed, heads, *, tq=None, return_attn=True):
    """inputs: [B,T,D] f32, memory_bank: [B,S,D] f32,
       src_pad_mask: [B,1,S] bool, tgt_pad_mask: [B,1,T] bool (step=None path).
       packed: output of prepack_params().  Returns (output [B,T,D] f32,
       top-head ctx-attn [B,T,S] bf16 or None)."""
    B, T, D = inputs.shape
    S = memory_bank.shape[1]
    F = packed["ff_w1"].shape[1]
    TQ = tq if tq is not None else _choose_tq(T)
    assert T % TQ == 0 and D % heads == 0
    NQ = T // TQ

    # Lane-dense ctx-attn scores / attn writeback: pad the source axis to a multiple
    # of 128 and mark padded keys masked (they never affect the math).
    S_pad = max(_round_up(S, 128), 128)
    inputs_bf = inputs.astype(jnp.bfloat16)
    mem_bf = memory_bank.astype(jnp.bfloat16)
    src_mask = src_pad_mask.astype(jnp.float32)
    if S_pad != S:
        mem_bf = jnp.pad(mem_bf, ((0, 0), (0, S_pad - S), (0, 0)))
        src_mask = jnp.pad(src_mask, ((0, 0), (0, 0), (0, S_pad - S)),
                           constant_values=1.0)
    tgt_mask = tgt_pad_mask.astype(jnp.float32)

    wlist = [packed[k] for k in _WEIGHT_ORDER]

    def _full_spec(arr):
        nd = arr.ndim
        return pl.BlockSpec(arr.shape, lambda b, q, _nd=nd: (0,) * _nd)

    in_specs = [
        pl.BlockSpec((1, TQ, D), lambda b, q: (b, q, 0)),      # query block
        pl.BlockSpec((1, T, D), lambda b, q: (b, 0, 0)),       # full seq (self K/V)
        pl.BlockSpec((1, S_pad, D), lambda b, q: (b, 0, 0)),   # memory bank (ctx K/V)
        pl.BlockSpec((1, 1, T), lambda b, q: (b, 0, 0)),       # tgt pad mask
        pl.BlockSpec((1, 1, S_pad), lambda b, q: (b, 0, 0)),   # src pad mask (padded)
    ] + [_full_spec(w) for w in wlist]

    if return_attn:
        out_specs = (pl.BlockSpec((1, TQ, D), lambda b, q: (b, q, 0)),
                     pl.BlockSpec((1, TQ, S_pad), lambda b, q: (b, q, 0)))
        out_shape = (jax.ShapeDtypeStruct((B, T, D), jnp.float32),
                     jax.ShapeDtypeStruct((B, T, S_pad), jnp.bfloat16))
    else:
        out_specs = pl.BlockSpec((1, TQ, D), lambda b, q: (b, q, 0))
        out_shape = jax.ShapeDtypeStruct((B, T, D), jnp.float32)

    # Advisory cost estimate so XLA schedules the custom call sensibly.
    flops = B * (2 * T * D * D + NQ * 2 * T * 2 * D * D + 2 * T * D * D   # self projs
                 + 4 * T * T * D                                          # self attn
                 + 2 * T * D * D + NQ * 2 * S_pad * 2 * D * D + 2 * T * D * D
                 + 4 * T * S_pad * D                                      # ctx attn
                 + 4 * T * D * F)                                         # FFN
    bytes_accessed = (int(inputs_bf.nbytes) * 2 + int(mem_bf.nbytes)
                      + int(src_mask.nbytes) + int(tgt_mask.nbytes)
                      + sum(int(w.nbytes) for w in wlist)
                      + B * T * D * 4 + (B * T * S_pad * 2 if return_attn else 0))
    cost = pl.CostEstimate(flops=int(flops),
                           transcendentals=int(B * heads * T * (T + S_pad)),
                           bytes_accessed=int(bytes_accessed))

    kernel = functools.partial(_decoder_layer_kernel, heads, return_attn)
    res = pl.pallas_call(
        kernel,
        grid=(B, NQ),
        in_specs=in_specs,
        out_specs=out_specs,
        out_shape=out_shape,
        cost_estimate=cost,
        compiler_params=pltpu.CompilerParams(
            dimension_semantics=("parallel", "parallel"),
            vmem_limit_bytes=_vmem_budget(T, S_pad, D, F, heads, TQ)),
    )(inputs_bf, inputs_bf, mem_bf, tgt_mask, src_mask, *wlist)

    if return_attn:
        out, attn = res
        return out, attn[:, :, :S]
    return res, None


# ----------------------- deterministic parameter init ------------------------

def init_params(key, d_model, d_ff):
    ks = jax.random.split(key, 32)
    i = iter(range(32))

    def w(shape, scale=0.05):
        return (scale * jax.random.normal(ks[next(i)], shape)).astype(jnp.float32)

    p = {
        "ln1_g": jnp.ones((1, d_model), jnp.float32),
        "ln1_b": jnp.zeros((1, d_model), jnp.float32),
        "ln2_g": jnp.ones((1, d_model), jnp.float32),
        "ln2_b": jnp.zeros((1, d_model), jnp.float32),
        "ffln_g": jnp.ones((1, d_model), jnp.float32),
        "ffln_b": jnp.zeros((1, d_model), jnp.float32),
    }
    # Linear weights stored pre-transposed: [in, out] so x @ W + b.
    for pre in ("sa", "ca"):
        for name in ("q", "k", "v", "o"):
            p[f"{pre}_w{name}"] = w((d_model, d_model))
            p[f"{pre}_b{name}"] = w((1, d_model), scale=0.02)
    p["ff_w1"] = w((d_model, d_ff))
    p["ff_b1"] = w((1, d_ff), scale=0.02)
    p["ff_w2"] = w((d_ff, d_model))
    p["ff_b2"] = w((1, d_model), scale=0.02)
    return p


# ------------------------- pure-JAX reference (check) -------------------------

def _mha_ref(q_in, kv_in, mask, wq, bq, wk, bk, wv, bv, wo, bo, heads):
    d_model = q_in.shape[-1]
    dh = d_model // heads
    scale = 1.0 / math.sqrt(dh)
    q = q_in @ wq + bq
    k = kv_in @ wk + bk
    v = kv_in @ wv + bv
    ctx_heads, top_attn = [], None
    for h in range(heads):
        qh = q[:, h * dh:(h + 1) * dh] * scale
        kh = k[:, h * dh:(h + 1) * dh]
        vh = v[:, h * dh:(h + 1) * dh]
        scores = qh @ kh.T
        scores = jnp.where(mask > 0, jnp.float32(-1e18), scores)
        scores = scores - jnp.max(scores, axis=-1, keepdims=True)
        e = jnp.exp(scores)
        attn = e / jnp.sum(e, axis=-1, keepdims=True)
        if h == 0:
            top_attn = attn
        ctx_heads.append(attn @ vh)
    ctx = jnp.concatenate(ctx_heads, axis=-1)
    return ctx @ wo + bo, top_attn


def reference(inputs, memory_bank, src_pad_mask, tgt_pad_mask, params, heads):
    B, T, D = inputs.shape
    future = jnp.triu(jnp.ones((T, T), jnp.float32), k=1)
    dec_mask = ((tgt_pad_mask.astype(jnp.float32) + future[None]) > 0).astype(jnp.float32)
    src_mask = src_pad_mask.astype(jnp.float32)
    p = params
    outs, attns = [], []
    for b in range(B):
        x, mem = inputs[b], memory_bank[b]
        input_norm = _layer_norm(x, p["ln1_g"], p["ln1_b"])
        q_sa, _ = _mha_ref(input_norm, input_norm, dec_mask[b],
                           p["sa_wq"], p["sa_bq"], p["sa_wk"], p["sa_bk"],
                           p["sa_wv"], p["sa_bv"], p["sa_wo"], p["sa_bo"], heads)
        query = q_sa + x
        query_norm = _layer_norm(query, p["ln2_g"], p["ln2_b"])
        mid, top_attn = _mha_ref(query_norm, mem, src_mask[b],
                                 p["ca_wq"], p["ca_bq"], p["ca_wk"], p["ca_bk"],
                                 p["ca_wv"], p["ca_bv"], p["ca_wo"], p["ca_bo"], heads)
        ff_in = mid + query
        ff_norm = _layer_norm(ff_in, p["ffln_g"], p["ffln_b"])
        inter = jnp.maximum(ff_norm @ p["ff_w1"] + p["ff_b1"], 0.0)
        outs.append(inter @ p["ff_w2"] + p["ff_b2"] + ff_in)
        attns.append(top_attn)
    return jnp.stack(outs), jnp.stack(attns)


# ----------------------------------- main -------------------------------------

if __name__ == "__main__":
    B, T, S = 2, 8, 12
    d_model, heads, d_ff = 32, 4, 64

    key = jax.random.PRNGKey(0)
    k_in, k_mem, k_par = jax.random.split(key, 3)

    inputs = jax.random.normal(k_in, (B, T, d_model), jnp.float32)
    memory_bank = jax.random.normal(k_mem, (B, S, d_model), jnp.float32)

    # Deterministic padding masks: True == padded position.
    src_lens = jnp.array([S, S - 3])
    tgt_lens = jnp.array([T - 1, T])
    src_pad_mask = (jnp.arange(S)[None, :] >= src_lens[:, None])[:, None, :]  # [B,1,S]
    tgt_pad_mask = (jnp.arange(T)[None, :] >= tgt_lens[:, None])[:, None, :]  # [B,1,T]

    params = init_params(k_par, d_model, d_ff)
    packed = prepack_params(params)          # hoisted: packed once, reused per call

    layer = jax.jit(functools.partial(multi_transformer_decoder_layer,
                                      heads=heads, return_attn=True))
    out, attn = layer(inputs, memory_bank, src_pad_mask, tgt_pad_mask, packed)
    out = jax.block_until_ready(out)
    attn = jax.block_until_ready(attn)

    ref_out, ref_attn = reference(inputs, memory_bank, src_pad_mask,
                                  tgt_pad_mask, params, heads)
    assert out.shape == (B, T, d_model) and attn.shape == (B, T, S)
    # bf16 activations/weights + approx reciprocal in the kernel vs f32 reference
    # -> loosened tolerance.
    assert jnp.allclose(out, ref_out, atol=3e-2, rtol=3e-2), \
        float(jnp.max(jnp.abs(out - ref_out)))
    assert jnp.allclose(attn.astype(jnp.float32), ref_attn, atol=3e-2, rtol=3e-2), \
        float(jnp.max(jnp.abs(attn.astype(jnp.float32) - ref_attn)))
    print("KERNEL_OK")
</pallas_src>

<mosaic_0001>
module attributes {stable_mosaic.version = 11 : i64} {
  func.func @_decoder_layer_kernel(%arg0: i32, %arg1: i32, %arg2: memref<1x8x32xbf16, #tpu.memory_space<vmem>>, %arg3: memref<1x8x32xbf16, #tpu.memory_space<vmem>>, %arg4: memref<1x128x32xbf16, #tpu.memory_space<vmem>>, %arg5: memref<1x1x8xf32, #tpu.memory_space<vmem>>, %arg6: memref<1x1x128xf32, #tpu.memory_space<vmem>>, %arg7: memref<1x32xf32, #tpu.memory_space<vmem>>, %arg8: memref<1x32xf32, #tpu.memory_space<vmem>>, %arg9: memref<1x32xf32, #tpu.memory_space<vmem>>, %arg10: memref<1x32xf32, #tpu.memory_space<vmem>>, %arg11: memref<1x32xf32, #tpu.memory_space<vmem>>, %arg12: memref<1x32xf32, #tpu.memory_space<vmem>>, %arg13: memref<32x32xbf16, #tpu.memory_space<vmem>>, %arg14: memref<1x32xf32, #tpu.memory_space<vmem>>, %arg15: memref<32x64xbf16, #tpu.memory_space<vmem>>, %arg16: memref<1x64xf32, #tpu.memory_space<vmem>>, %arg17: memref<32x32xbf16, #tpu.memory_space<vmem>>, %arg18: memref<1x32xf32, #tpu.memory_space<vmem>>, %arg19: memref<32x32xbf16, #tpu.memory_space<vmem>>, %arg20: memref<1x32xf32, #tpu.memory_space<vmem>>, %arg21: memref<32x64xbf16, #tpu.memory_space<vmem>>, %arg22: memref<1x64xf32, #tpu.memory_space<vmem>>, %arg23: memref<32x32xbf16, #tpu.memory_space<vmem>>, %arg24: memref<1x32xf32, #tpu.memory_space<vmem>>, %arg25: memref<32x64xbf16, #tpu.memory_space<vmem>>, %arg26: memref<1x64xf32, #tpu.memory_space<vmem>>, %arg27: memref<64x32xbf16, #tpu.memory_space<vmem>>, %arg28: memref<1x32xf32, #tpu.memory_space<vmem>>, %arg29: memref<1x8x32xf32, #tpu.memory_space<vmem>>, %arg30: memref<1x8x128xbf16, #tpu.memory_space<vmem>>) attributes {dimension_semantics = [#tpu.dimension_semantics<parallel>, #tpu.dimension_semantics<parallel>], iteration_bounds = array<i64: 2, 1>, scalar_prefetch = 0 : i64, scratch_operands = 0 : i64, tpu.core_type = #tpu.core_type<tc>, window_params = [{transform_indices = @transform_0, window_bounds = array<i64: 1, 8, 32>}, {transform_indices = @transform_1, window_bounds = array<i64: 1, 8, 32>}, {transform_indices = @transform_2, window_bounds = array<i64: 1, 128, 32>}, {transform_indices = @transform_3, window_bounds = array<i64: 1, 1, 8>}, {transform_indices = @transform_4, window_bounds = array<i64: 1, 1, 128>}, {pipeline_mode = #tpu.pipeline_mode<synchronous>, transform_indices = @transform_5, window_bounds = array<i64: 1, 32>}, {pipeline_mode = #tpu.pipeline_mode<synchronous>, transform_indices = @transform_6, window_bounds = array<i64: 1, 32>}, {pipeline_mode = #tpu.pipeline_mode<synchronous>, transform_indices = @transform_7, window_bounds = array<i64: 1, 32>}, {pipeline_mode = #tpu.pipeline_mode<synchronous>, transform_indices = @transform_8, window_bounds = array<i64: 1, 32>}, {pipeline_mode = #tpu.pipeline_mode<synchronous>, transform_indices = @transform_9, window_bounds = array<i64: 1, 32>}, {pipeline_mode = #tpu.pipeline_mode<synchronous>, transform_indices = @transform_10, window_bounds = array<i64: 1, 32>}, {pipeline_mode = #tpu.pipeline_mode<synchronous>, transform_indices = @transform_11, window_bounds = array<i64: 32, 32>}, {pipeline_mode = #tpu.pipeline_mode<synchronous>, transform_indices = @transform_12, window_bounds = array<i64: 1, 32>}, {pipeline_mode = #tpu.pipeline_mode<synchronous>, transform_indices = @transform_13, window_bounds = array<i64: 32, 64>}, {pipeline_mode = #tpu.pipeline_mode<synchronous>, transform_indices = @transform_14, window_bounds = array<i64: 1, 64>}, {pipeline_mode = #tpu.pipeline_mode<synchronous>, transform_indices = @transform_15, window_bounds = array<i64: 32, 32>}, {pipeline_mode = #tpu.pipeline_mode<synchronous>, transform_indices = @transform_16, window_bounds = array<i64: 1, 32>}, {pipeline_mode = #tpu.pipeline_mode<synchronous>, transform_indices = @transform_17, window_bounds = array<i64: 32, 32>}, {pipeline_mode = #tpu.pipeline_mode<synchronous>, transform_indices = @transform_18, window_bounds = array<i64: 1, 32>}, {pipeline_mode = #tpu.pipeline_mode<synchronous>, transform_indices = @transform_19, window_bounds = array<i64: 32, 64>}, {pipeline_mode = #tpu.pipeline_mode<synchronous>, transform_indices = @transform_20, window_bounds = array<i64: 1, 64>}, {pipeline_mode = #tpu.pipeline_mode<synchronous>, transform_indices = @transform_21, window_bounds = array<i64: 32, 32>}, {pipeline_mode = #tpu.pipeline_mode<synchronous>, transform_indices = @transform_22, window_bounds = array<i64: 1, 32>}, {pipeline_mode = #tpu.pipeline_mode<synchronous>, transform_indices = @transform_23, window_bounds = array<i64: 32, 64>}, {pipeline_mode = #tpu.pipeline_mode<synchronous>, transform_indices = @transform_24, window_bounds = array<i64: 1, 64>}, {pipeline_mode = #tpu.pipeline_mode<synchronous>, transform_indices = @transform_25, window_bounds = array<i64: 64, 32>}, {pipeline_mode = #tpu.pipeline_mode<synchronous>, transform_indices = @transform_26, window_bounds = array<i64: 1, 32>}, {transform_indices = @transform_27, window_bounds = array<i64: 1, 8, 32>}, {transform_indices = @transform_28, window_bounds = array<i64: 1, 8, 128>}]} {
    %c0 = arith.constant 0 : index
    %c0_0 = arith.constant 0 : index
    %c0_1 = arith.constant 0 : index
    %0 = vector.load %arg2[%c0, %c0_0, %c0_1] : memref<1x8x32xbf16, #tpu.memory_space<vmem>>, vector<1x8x32xbf16>
    %1 = vector.shape_cast %0 : vector<1x8x32xbf16> to vector<8x32xbf16>
    %2 = arith.extf %1 : vector<8x32xbf16> to vector<8x32xf32>
    %c0_2 = arith.constant 0 : index
    %c0_3 = arith.constant 0 : index
    %c0_4 = arith.constant 0 : index
    %3 = vector.load %arg3[%c0_2, %c0_3, %c0_4] : memref<1x8x32xbf16, #tpu.memory_space<vmem>>, vector<1x8x32xbf16>
    %4 = vector.shape_cast %3 : vector<1x8x32xbf16> to vector<8x32xbf16>
    %5 = arith.extf %4 : vector<8x32xbf16> to vector<8x32xf32>
    %c0_5 = arith.constant 0 : index
    %c0_6 = arith.constant 0 : index
    %c0_7 = arith.constant 0 : index
    %6 = vector.load %arg4[%c0_5, %c0_6, %c0_7] : memref<1x128x32xbf16, #tpu.memory_space<vmem>>, vector<1x128x32xbf16>
    %7 = vector.shape_cast %6 : vector<1x128x32xbf16> to vector<128x32xbf16>
    %c8_i32 = arith.constant 8 : i32
    %8 = arith.muli %arg1, %c8_i32 : i32
    %9 = tpu.iota {dimensions = array<i32: 0>} : vector<8x8xi32>
    %10 = vector.broadcast %8 : i32 to vector<8x8xi32>
    %11 = arith.addi %10, %9 : vector<8x8xi32>
    %12 = tpu.iota {dimensions = array<i32: 1>} : vector<8x8xi32>
    %13 = arith.cmpi sgt, %12, %11 : vector<8x8xi32>
    %c0_8 = arith.constant 0 : index
    %c0_9 = arith.constant 0 : index
    %c0_10 = arith.constant 0 : index
    %14 = vector.load %arg5[%c0_8, %c0_9, %c0_10] : memref<1x1x8xf32, #tpu.memory_space<vmem>>, vector<1x1x8xf32>
    %15 = vector.shape_cast %14 : vector<1x1x8xf32> to vector<1x8xf32>
    %cst = arith.constant 0.000000e+00 : f32
    %16 = vector.broadcast %cst : f32 to vector<1x8xf32>
    %17 = arith.cmpf ogt, %15, %16 : vector<1x8xf32>
    %18 = vector.broadcast %17 : vector<1x8xi1> to vector<8x8xi1>
    %19 = arith.ori %13, %18 : vector<8x8xi1>
    %c0_11 = arith.constant 0 : index
    %c0_12 = arith.constant 0 : index
    %c0_13 = arith.constant 0 : index
    %20 = vector.load %arg6[%c0_11, %c0_12, %c0_13] : memref<1x1x128xf32, #tpu.memory_space<vmem>>, vector<1x1x128xf32>
    %21 = vector.shape_cast %20 : vector<1x1x128xf32> to vector<1x128xf32>
    %cst_14 = arith.constant 0.000000e+00 : f32
    %22 = vector.broadcast %cst_14 : f32 to vector<1x128xf32>
    %23 = arith.cmpf ogt, %21, %22 : vector<1x128xf32>
    %c0_15 = arith.constant 0 : index
    %c0_16 = arith.constant 0 : index
    %24 = vector.load %arg7[%c0_15, %c0_16] : memref<1x32xf32, #tpu.memory_space<vmem>>, vector<1x32xf32>
    %c0_17 = arith.constant 0 : index
    %c0_18 = arith.constant 0 : index
    %25 = vector.load %arg8[%c0_17, %c0_18] : memref<1x32xf32, #tpu.memory_space<vmem>>, vector<1x32xf32>
    %cst_19 = arith.constant dense<0.000000e+00> : vector<8xf32>
    %26 = vector.multi_reduction <add>, %2, %cst_19 [1] : vector<8x32xf32> to vector<8xf32>
    %27 = vector.shape_cast %26 : vector<8xf32> to vector<8x1xf32>
    %cst_20 = arith.constant 3.200000e+01 : f32
    %28 = vector.broadcast %cst_20 : f32 to vector<8x1xf32>
    %29 = arith.divf %27, %28 : vector<8x1xf32>
    %30 = vector.broadcast %29 : vector<8x1xf32> to vector<8x32xf32>
    %31 = arith.subf %2, %30 : vector<8x32xf32>
    %32 = arith.mulf %31, %31 : vector<8x32xf32>
    %cst_21 = arith.constant dense<0.000000e+00> : vector<8xf32>
    %33 = vector.multi_reduction <add>, %32, %cst_21 [1] : vector<8x32xf32> to vector<8xf32>
    %34 = vector.shape_cast %33 : vector<8xf32> to vector<8x1xf32>
    %cst_22 = arith.constant 3.200000e+01 : f32
    %35 = vector.broadcast %cst_22 : f32 to vector<8x1xf32>
    %36 = arith.divf %34, %35 : vector<8x1xf32>
    %cst_23 = arith.constant 9.99999997E-7 : f32
    %37 = vector.broadcast %cst_23 : f32 to vector<8x1xf32>
    %38 = arith.addf %36, %37 : vector<8x1xf32>
    %39 = math.rsqrt %38 : vector<8x1xf32>
    %40 = vector.broadcast %39 : vector<8x1xf32> to vector<8x32xf32>
    %41 = arith.mulf %31, %40 : vector<8x32xf32>
    %42 = vector.broadcast %24 : vector<1x32xf32> to vector<8x32xf32>
    %43 = arith.mulf %41, %42 : vector<8x32xf32>
    %44 = vector.broadcast %25 : vector<1x32xf32> to vector<8x32xf32>
    %45 = arith.addf %43, %44 : vector<8x32xf32>
    %c0_24 = arith.constant 0 : index
    %c0_25 = arith.constant 0 : index
    %46 = vector.load %arg7[%c0_24, %c0_25] : memref<1x32xf32, #tpu.memory_space<vmem>>, vector<1x32xf32>
    %c0_26 = arith.constant 0 : index
    %c0_27 = arith.constant 0 : index
    %47 = vector.load %arg8[%c0_26, %c0_27] : memref<1x32xf32, #tpu.memory_space<vmem>>, vector<1x32xf32>
    %cst_28 = arith.constant dense<0.000000e+00> : vector<8xf32>
    %48 = vector.multi_reduction <add>, %5, %cst_28 [1] : vector<8x32xf32> to vector<8xf32>
    %49 = vector.shape_cast %48 : vector<8xf32> to vector<8x1xf32>
    %cst_29 = arith.constant 3.200000e+01 : f32
    %50 = vector.broadcast %cst_29 : f32 to vector<8x1xf32>
    %51 = arith.divf %49, %50 : vector<8x1xf32>
    %52 = vector.broadcast %51 : vector<8x1xf32> to vector<8x32xf32>
    %53 = arith.subf %5, %52 : vector<8x32xf32>
    %54 = arith.mulf %53, %53 : vector<8x32xf32>
    %cst_30 = arith.constant dense<0.000000e+00> : vector<8xf32>
    %55 = vector.multi_reduction <add>, %54, %cst_30 [1] : vector<8x32xf32> to vector<8xf32>
    %56 = vector.shape_cast %55 : vector<8xf32> to vector<8x1xf32>
    %cst_31 = arith.constant 3.200000e+01 : f32
    %57 = vector.broadcast %cst_31 : f32 to vector<8x1xf32>
    %58 = arith.divf %56, %57 : vector<8x1xf32>
    %cst_32 = arith.constant 9.99999997E-7 : f32
    %59 = vector.broadcast %cst_32 : f32 to vector<8x1xf32>
    %60 = arith.addf %58, %59 : vector<8x1xf32>
    %61 = math.rsqrt %60 : vector<8x1xf32>
    %62 = vector.broadcast %61 : vector<8x1xf32> to vector<8x32xf32>
    %63 = arith.mulf %53, %62 : vector<8x32xf32>
    %64 = vector.broadcast %46 : vector<1x32xf32> to vector<8x32xf32>
    %65 = arith.mulf %63, %64 : vector<8x32xf32>
    %66 = vector.broadcast %47 : vector<1x32xf32> to vector<8x32xf32>
    %67 = arith.addf %65, %66 : vector<8x32xf32>
    %68 = arith.truncf %45 : vector<8x32xf32> to vector<8x32xbf16>
    %c0_33 = arith.constant 0 : index
    %c0_34 = arith.constant 0 : index
    %69 = vector.load %arg13[%c0_33, %c0_34] : memref<32x32xbf16, #tpu.memory_space<vmem>>, vector<32x32xbf16>
    %cst_35 = arith.constant dense<0.000000e+00> : vector<8x32xf32>
    %70 = tpu.matmul %68, %69, %cst_35 {dimension_numbers = #tpu.dot_dimension_numbers<[1], [0], [0], [1], [0, 0, 1, 1], [], []>} : vector<8x32xbf16>, vector<32x32xbf16>, vector<8x32xf32> -> vector<8x32xf32>
    %c0_36 = arith.constant 0 : index
    %c0_37 = arith.constant 0 : index
    %71 = vector.load %arg14[%c0_36, %c0_37] : memref<1x32xf32, #tpu.memory_space<vmem>>, vector<1x32xf32>
    %72 = vector.broadcast %71 : vector<1x32xf32> to vector<8x32xf32>
    %73 = arith.addf %70, %72 : vector<8x32xf32>
    %cst_38 = arith.constant 0.353553385 : f32
    %74 = vector.broadcast %cst_38 : f32 to vector<8x32xf32>
    %75 = arith.mulf %73, %74 : vector<8x32xf32>
    %76 = arith.truncf %67 : vector<8x32xf32> to vector<8x32xbf16>
    %c0_39 = arith.constant 0 : index
    %c0_40 = arith.constant 0 : index
    %77 = vector.load %arg15[%c0_39, %c0_40] : memref<32x64xbf16, #tpu.memory_space<vmem>>, vector<32x64xbf16>
    %cst_41 = arith.constant dense<0.000000e+00> : vector<8x64xf32>
    %78 = tpu.matmul %76, %77, %cst_41 {dimension_numbers = #tpu.dot_dimension_numbers<[1], [0], [0], [1], [0, 0, 1, 1], [], []>} : vector<8x32xbf16>, vector<32x64xbf16>, vector<8x64xf32> -> vector<8x64xf32>
    %c0_42 = arith.constant 0 : index
    %c0_43 = arith.constant 0 : index
    %79 = vector.load %arg16[%c0_42, %c0_43] : memref<1x64xf32, #tpu.memory_space<vmem>>, vector<1x64xf32>
    %80 = vector.broadcast %79 : vector<1x64xf32> to vector<8x64xf32>
    %81 = arith.addf %78, %80 : vector<8x64xf32>
    %82 = vector.extract_strided_slice %81 {offsets = [0, 0], sizes = [8, 32], strides = [1, 1]} : vector<8x64xf32> to vector<8x32xf32>
    %83 = vector.extract_strided_slice %81 {offsets = [0, 32], sizes = [8, 32], strides = [1, 1]} : vector<8x64xf32> to vector<8x32xf32>
    %c0_44 = arith.constant 0 : index
    %c0_45 = arith.constant 0 : index
    %84 = vector.load %arg17[%c0_44, %c0_45] : memref<32x32xbf16, #tpu.memory_space<vmem>>, vector<32x32xbf16>
    %c0_46 = arith.constant 0 : index
    %c0_47 = arith.constant 0 : index
    %85 = vector.load %arg18[%c0_46, %c0_47] : memref<1x32xf32, #tpu.memory_space<vmem>>, vector<1x32xf32>
    %86 = vector.shape_cast %75 : vector<8x32xf32> to vector<8x4x8xf32>
    %87 = tpu.transpose %86, [1, 0, 2] : vector<8x4x8xf32> -> vector<4x8x8xf32>
    %88 = arith.truncf %87 : vector<4x8x8xf32> to vector<4x8x8xbf16>
    %89 = vector.shape_cast %82 : vector<8x32xf32> to vector<8x4x8xf32>
    %90 = tpu.transpose %89, [1, 0, 2] : vector<8x4x8xf32> -> vector<4x8x8xf32>
    %91 = arith.truncf %90 : vector<4x8x8xf32> to vector<4x8x8xbf16>
    %92 = vector.shape_cast %83 : vector<8x32xf32> to vector<8x4x8xf32>
    %93 = tpu.transpose %92, [1, 0, 2] : vector<8x4x8xf32> -> vector<4x8x8xf32>
    %94 = arith.truncf %93 : vector<4x8x8xf32> to vector<4x8x8xbf16>
    "tpu.trace_start"() <{level = 10 : i32, message = "hqd,hkd->hqk"}> : () -> ()
    %cst_48 = arith.constant dense<0.000000e+00> : vector<4x8x8xf32>
    %95 = tpu.matmul %88, %91, %cst_48 {dimension_numbers = #tpu.dot_dimension_numbers<[2], [2], [1], [1], [0, 0, 0, 1, 1, 1], [0], [0]>} : vector<4x8x8xbf16>, vector<4x8x8xbf16>, vector<4x8x8xf32> -> vector<4x8x8xf32>
    "tpu.trace_stop"() : () -> ()
    %96 = vector.shape_cast %19 : vector<8x8xi1> to vector<1x8x8xi1>
    %cst_49 = arith.constant -9.99999984E+17 : f32
    %97 = vector.shape_cast %96 : vector<1x8x8xi1> to vector<1x8x8xi1>
    %98 = vector.broadcast %97 : vector<1x8x8xi1> to vector<4x8x8xi1>
    %99 = vector.broadcast %cst_49 : f32 to vector<4x8x8xf32>
    %100 = arith.select %98, %99, %95 : vector<4x8x8xi1>, vector<4x8x8xf32>
    %cst_50 = arith.constant dense<0xFF800000> : vector<4x8xf32>
    %101 = vector.multi_reduction <maximumf>, %100, %cst_50 [2] : vector<4x8x8xf32> to vector<4x8xf32>
    %102 = vector.shape_cast %101 : vector<4x8xf32> to vector<4x8x1xf32>
    %103 = vector.broadcast %102 : vector<4x8x1xf32> to vector<4x8x8xf32>
    %104 = arith.subf %100, %103 : vector<4x8x8xf32>
    %105 = math.exp %104 : vector<4x8x8xf32>
    %cst_51 = arith.constant dense<0.000000e+00> : vector<4x8xf32>
    %106 = vector.multi_reduction <add>, %105, %cst_51 [2] : vector<4x8x8xf32> to vector<4x8xf32>
    %107 = vector.shape_cast %106 : vector<4x8xf32> to vector<4x8x1xf32>
    %108 = tpu.reciprocal %107 {approx = true} : vector<4x8x1xf32> -> vector<4x8x1xf32>
    %109 = vector.broadcast %108 : vector<4x8x1xf32> to vector<4x8x8xf32>
    %110 = arith.mulf %105, %109 : vector<4x8x8xf32>
    %111 = arith.truncf %110 : vector<4x8x8xf32> to vector<4x8x8xbf16>
    "tpu.trace_start"() <{level = 10 : i32, message = "hqk,hkd->hqd"}> : () -> ()
    %cst_52 = arith.constant dense<0.000000e+00> : vector<4x8x8xf32>
    %112 = tpu.matmul %111, %94, %cst_52 {dimension_numbers = #tpu.dot_dimension_numbers<[2], [1], [1], [2], [0, 0, 0, 1, 1, 2], [0], [0]>} : vector<4x8x8xbf16>, vector<4x8x8xbf16>, vector<4x8x8xf32> -> vector<4x8x8xf32>
    "tpu.trace_stop"() : () -> ()
    %113 = tpu.transpose %112, [1, 0, 2] : vector<4x8x8xf32> -> vector<8x4x8xf32>
    %114 = vector.shape_cast %113 : vector<8x4x8xf32> to vector<8x32xf32>
    %115 = arith.truncf %114 : vector<8x32xf32> to vector<8x32xbf16>
    %cst_53 = arith.constant dense<0.000000e+00> : vector<8x32xf32>
    %116 = tpu.matmul %115, %84, %cst_53 {dimension_numbers = #tpu.dot_dimension_numbers<[1], [0], [0], [1], [0, 0, 1, 1], [], []>} : vector<8x32xbf16>, vector<32x32xbf16>, vector<8x32xf32> -> vector<8x32xf32>
    %117 = vector.broadcast %85 : vector<1x32xf32> to vector<8x32xf32>
    %118 = arith.addf %116, %117 : vector<8x32xf32>
    %119 = arith.addf %118, %2 : vector<8x32xf32>
    %c0_54 = arith.constant 0 : index
    %c0_55 = arith.constant 0 : index
    %120 = vector.load %arg9[%c0_54, %c0_55] : memref<1x32xf32, #tpu.memory_space<vmem>>, vector<1x32xf32>
    %c0_56 = arith.constant 0 : index
    %c0_57 = arith.constant 0 : index
    %121 = vector.load %arg10[%c0_56, %c0_57] : memref<1x32xf32, #tpu.memory_space<vmem>>, vector<1x32xf32>
    %cst_58 = arith.constant dense<0.000000e+00> : vector<8xf32>
    %122 = vector.multi_reduction <add>, %119, %cst_58 [1] : vector<8x32xf32> to vector<8xf32>
    %123 = vector.shape_cast %122 : vector<8xf32> to vector<8x1xf32>
    %cst_59 = arith.constant 3.200000e+01 : f32
    %124 = vector.broadcast %cst_59 : f32 to vector<8x1xf32>
    %125 = arith.divf %123, %124 : vector<8x1xf32>
    %126 = vector.broadcast %125 : vector<8x1xf32> to vector<8x32xf32>
    %127 = arith.subf %119, %126 : vector<8x32xf32>
    %128 = arith.mulf %127, %127 : vector<8x32xf32>
    %cst_60 = arith.constant dense<0.000000e+00> : vector<8xf32>
    %129 = vector.multi_reduction <add>, %128, %cst_60 [1] : vector<8x32xf32> to vector<8xf32>
    %130 = vector.shape_cast %129 : vector<8xf32> to vector<8x1xf32>
    %cst_61 = arith.constant 3.200000e+01 : f32
    %131 = vector.broadcast %cst_61 : f32 to vector<8x1xf32>
    %132 = arith.divf %130, %131 : vector<8x1xf32>
    %cst_62 = arith.constant 9.99999997E-7 : f32
    %133 = vector.broadcast %cst_62 : f32 to vector<8x1xf32>
    %134 = arith.addf %132, %133 : vector<8x1xf32>
    %135 = math.rsqrt %134 : vector<8x1xf32>
    %136 = vector.broadcast %135 : vector<8x1xf32> to vector<8x32xf32>
    %137 = arith.mulf %127, %136 : vector<8x32xf32>
    %138 = vector.broadcast %120 : vector<1x32xf32> to vector<8x32xf32>
    %139 = arith.mulf %137, %138 : vector<8x32xf32>
    %140 = vector.broadcast %121 : vector<1x32xf32> to vector<8x32xf32>
    %141 = arith.addf %139, %140 : vector<8x32xf32>
    %142 = arith.truncf %141 : vector<8x32xf32> to vector<8x32xbf16>
    %c0_63 = arith.constant 0 : index
    %c0_64 = arith.constant 0 : index
    %143 = vector.load %arg19[%c0_63, %c0_64] : memref<32x32xbf16, #tpu.memory_space<vmem>>, vector<32x32xbf16>
    %cst_65 = arith.constant dense<0.000000e+00> : vector<8x32xf32>
    %144 = tpu.matmul %142, %143, %cst_65 {dimension_numbers = #tpu.dot_dimension_numbers<[1], [0], [0], [1], [0, 0, 1, 1], [], []>} : vector<8x32xbf16>, vector<32x32xbf16>, vector<8x32xf32> -> vector<8x32xf32>
    %c0_66 = arith.constant 0 : index
    %c0_67 = arith.constant 0 : index
    %145 = vector.load %arg20[%c0_66, %c0_67] : memref<1x32xf32, #tpu.memory_space<vmem>>, vector<1x32xf32>
    %146 = vector.broadcast %145 : vector<1x32xf32> to vector<8x32xf32>
    %147 = arith.addf %144, %146 : vector<8x32xf32>
    %cst_68 = arith.constant 0.353553385 : f32
    %148 = vector.broadcast %cst_68 : f32 to vector<8x32xf32>
    %149 = arith.mulf %147, %148 : vector<8x32xf32>
    %c0_69 = arith.constant 0 : index
    %c0_70 = arith.constant 0 : index
    %150 = vector.load %arg21[%c0_69, %c0_70] : memref<32x64xbf16, #tpu.memory_space<vmem>>, vector<32x64xbf16>
    %cst_71 = arith.constant dense<0.000000e+00> : vector<128x64xf32>
    %151 = tpu.matmul %7, %150, %cst_71 {dimension_numbers = #tpu.dot_dimension_numbers<[1], [0], [0], [1], [0, 0, 1, 1], [], []>} : vector<128x32xbf16>, vector<32x64xbf16>, vector<128x64xf32> -> vector<128x64xf32>
    %c0_72 = arith.constant 0 : index
    %c0_73 = arith.constant 0 : index
    %152 = vector.load %arg22[%c0_72, %c0_73] : memref<1x64xf32, #tpu.memory_space<vmem>>, vector<1x64xf32>
    %153 = vector.broadcast %152 : vector<1x64xf32> to vector<128x64xf32>
    %154 = arith.addf %151, %153 : vector<128x64xf32>
    %155 = vector.extract_strided_slice %154 {offsets = [0, 0], sizes = [128, 32], strides = [1, 1]} : vector<128x64xf32> to vector<128x32xf32>
    %156 = vector.extract_strided_slice %154 {offsets = [0, 32], sizes = [128, 32], strides = [1, 1]} : vector<128x64xf32> to vector<128x32xf32>
    %c0_74 = arith.constant 0 : index
    %c0_75 = arith.constant 0 : index
    %157 = vector.load %arg23[%c0_74, %c0_75] : memref<32x32xbf16, #tpu.memory_space<vmem>>, vector<32x32xbf16>
    %c0_76 = arith.constant 0 : index
    %c0_77 = arith.constant 0 : index
    %158 = vector.load %arg24[%c0_76, %c0_77] : memref<1x32xf32, #tpu.memory_space<vmem>>, vector<1x32xf32>
    %159 = vector.shape_cast %149 : vector<8x32xf32> to vector<8x4x8xf32>
    %160 = tpu.transpose %159, [1, 0, 2] : vector<8x4x8xf32> -> vector<4x8x8xf32>
    %161 = arith.truncf %160 : vector<4x8x8xf32> to vector<4x8x8xbf16>
    %162 = vector.shape_cast %155 : vector<128x32xf32> to vector<128x4x8xf32>
    %163 = tpu.transpose %162, [1, 0, 2] : vector<128x4x8xf32> -> vector<4x128x8xf32>
    %164 = arith.truncf %163 : vector<4x128x8xf32> to vector<4x128x8xbf16>
    %165 = vector.shape_cast %156 : vector<128x32xf32> to vector<128x4x8xf32>
    %166 = tpu.transpose %165, [1, 0, 2] : vector<128x4x8xf32> -> vector<4x128x8xf32>
    %167 = arith.truncf %166 : vector<4x128x8xf32> to vector<4x128x8xbf16>
    "tpu.trace_start"() <{level = 10 : i32, message = "hqd,hkd->hqk"}> : () -> ()
    %cst_78 = arith.constant dense<0.000000e+00> : vector<4x8x128xf32>
    %168 = tpu.matmul %161, %164, %cst_78 {dimension_numbers = #tpu.dot_dimension_numbers<[2], [2], [1], [1], [0, 0, 0, 1, 1, 1], [0], [0]>} : vector<4x8x8xbf16>, vector<4x128x8xbf16>, vector<4x8x128xf32> -> vector<4x8x128xf32>
    "tpu.trace_stop"() : () -> ()
    %169 = vector.shape_cast %23 : vector<1x128xi1> to vector<1x1x128xi1>
    %cst_79 = arith.constant -9.99999984E+17 : f32
    %170 = vector.shape_cast %169 : vector<1x1x128xi1> to vector<1x1x128xi1>
    %171 = vector.broadcast %170 : vector<1x1x128xi1> to vector<4x8x128xi1>
    %172 = vector.broadcast %cst_79 : f32 to vector<4x8x128xf32>
    %173 = arith.select %171, %172, %168 : vector<4x8x128xi1>, vector<4x8x128xf32>
    %cst_80 = arith.constant dense<0xFF800000> : vector<4x8xf32>
    %174 = vector.multi_reduction <maximumf>, %173, %cst_80 [2] : vector<4x8x128xf32> to vector<4x8xf32>
    %175 = vector.shape_cast %174 : vector<4x8xf32> to vector<4x8x1xf32>
    %176 = vector.broadcast %175 : vector<4x8x1xf32> to vector<4x8x128xf32>
    %177 = arith.subf %173, %176 : vector<4x8x128xf32>
    %178 = math.exp %177 : vector<4x8x128xf32>
    %cst_81 = arith.constant dense<0.000000e+00> : vector<4x8xf32>
    %179 = vector.multi_reduction <add>, %178, %cst_81 [2] : vector<4x8x128xf32> to vector<4x8xf32>
    %180 = vector.shape_cast %179 : vector<4x8xf32> to vector<4x8x1xf32>
    %181 = tpu.reciprocal %180 {approx = true} : vector<4x8x1xf32> -> vector<4x8x1xf32>
    %182 = vector.broadcast %181 : vector<4x8x1xf32> to vector<4x8x128xf32>
    %183 = arith.mulf %178, %182 : vector<4x8x128xf32>
    %184 = arith.truncf %183 : vector<4x8x128xf32> to vector<4x8x128xbf16>
    "tpu.trace_start"() <{level = 10 : i32, message = "hqk,hkd->hqd"}> : () -> ()
    %cst_82 = arith.constant dense<0.000000e+00> : vector<4x8x8xf32>
    %185 = tpu.matmul %184, %167, %cst_82 {dimension_numbers = #tpu.dot_dimension_numbers<[2], [1], [1], [2], [0, 0, 0, 1, 1, 2], [0], [0]>} : vector<4x8x128xbf16>, vector<4x128x8xbf16>, vector<4x8x8xf32> -> vector<4x8x8xf32>
    "tpu.trace_stop"() : () -> ()
    %186 = tpu.transpose %185, [1, 0, 2] : vector<4x8x8xf32> -> vector<8x4x8xf32>
    %187 = vector.shape_cast %186 : vector<8x4x8xf32> to vector<8x32xf32>
    %188 = arith.truncf %187 : vector<8x32xf32> to vector<8x32xbf16>
    %cst_83 = arith.constant dense<0.000000e+00> : vector<8x32xf32>
    %189 = tpu.matmul %188, %157, %cst_83 {dimension_numbers = #tpu.dot_dimension_numbers<[1], [0], [0], [1], [0, 0, 1, 1], [], []>} : vector<8x32xbf16>, vector<32x32xbf16>, vector<8x32xf32> -> vector<8x32xf32>
    %190 = vector.broadcast %158 : vector<1x32xf32> to vector<8x32xf32>
    %191 = arith.addf %189, %190 : vector<8x32xf32>
    %192 = vector.extract_strided_slice %183 {offsets = [0, 0, 0], sizes = [1, 8, 128], strides = [1, 1, 1]} : vector<4x8x128xf32> to vector<1x8x128xf32>
    %193 = vector.shape_cast %192 : vector<1x8x128xf32> to vector<8x128xf32>
    %194 = arith.addf %191, %119 : vector<8x32xf32>
    %c0_84 = arith.constant 0 : index
    %c0_85 = arith.constant 0 : index
    %195 = vector.load %arg11[%c0_84, %c0_85] : memref<1x32xf32, #tpu.memory_space<vmem>>, vector<1x32xf32>
    %c0_86 = arith.constant 0 : index
    %c0_87 = arith.constant 0 : index
    %196 = vector.load %arg12[%c0_86, %c0_87] : memref<1x32xf32, #tpu.memory_space<vmem>>, vector<1x32xf32>
    %cst_88 = arith.constant dense<0.000000e+00> : vector<8xf32>
    %197 = vector.multi_reduction <add>, %194, %cst_88 [1] : vector<8x32xf32> to vector<8xf32>
    %198 = vector.shape_cast %197 : vector<8xf32> to vector<8x1xf32>
    %cst_89 = arith.constant 3.200000e+01 : f32
    %199 = vector.broadcast %cst_89 : f32 to vector<8x1xf32>
    %200 = arith.divf %198, %199 : vector<8x1xf32>
    %201 = vector.broadcast %200 : vector<8x1xf32> to vector<8x32xf32>
    %202 = arith.subf %194, %201 : vector<8x32xf32>
    %203 = arith.mulf %202, %202 : vector<8x32xf32>
    %cst_90 = arith.constant dense<0.000000e+00> : vector<8xf32>
    %204 = vector.multi_reduction <add>, %203, %cst_90 [1] : vector<8x32xf32> to vector<8xf32>
    %205 = vector.shape_cast %204 : vector<8xf32> to vector<8x1xf32>
    %cst_91 = arith.constant 3.200000e+01 : f32
    %206 = vector.broadcast %cst_91 : f32 to vector<8x1xf32>
    %207 = arith.divf %205, %206 : vector<8x1xf32>
    %cst_92 = arith.constant 9.99999997E-7 : f32
    %208 = vector.broadcast %cst_92 : f32 to vector<8x1xf32>
    %209 = arith.addf %207, %208 : vector<8x1xf32>
    %210 = math.rsqrt %209 : vector<8x1xf32>
    %211 = vector.broadcast %210 : vector<8x1xf32> to vector<8x32xf32>
    %212 = arith.mulf %202, %211 : vector<8x32xf32>
    %213 = vector.broadcast %195 : vector<1x32xf32> to vector<8x32xf32>
    %214 = arith.mulf %212, %213 : vector<8x32xf32>
    %215 = vector.broadcast %196 : vector<1x32xf32> to vector<8x32xf32>
    %216 = arith.addf %214, %215 : vector<8x32xf32>
    %217 = arith.truncf %216 : vector<8x32xf32> to vector<8x32xbf16>
    %c0_93 = arith.constant 0 : index
    %c0_94 = arith.constant 0 : index
    %218 = vector.load %arg25[%c0_93, %c0_94] : memref<32x64xbf16, #tpu.memory_space<vmem>>, vector<32x64xbf16>
    %cst_95 = arith.constant dense<0.000000e+00> : vector<8x64xf32>
    %219 = tpu.matmul %217, %218, %cst_95 {dimension_numbers = #tpu.dot_dimension_numbers<[1], [0], [0], [1], [0, 0, 1, 1], [], []>} : vector<8x32xbf16>, vector<32x64xbf16>, vector<8x64xf32> -> vector<8x64xf32>
    %c0_96 = arith.constant 0 : index
    %c0_97 = arith.constant 0 : index
    %220 = vector.load %arg26[%c0_96, %c0_97] : memref<1x64xf32, #tpu.memory_space<vmem>>, vector<1x64xf32>
    %221 = vector.broadcast %220 : vector<1x64xf32> to vector<8x64xf32>
    %222 = arith.addf %219, %221 : vector<8x64xf32>
    %cst_98 = arith.constant 0.000000e+00 : f32
    %223 = vector.broadcast %cst_98 : f32 to vector<8x64xf32>
    %224 = arith.maximumf %222, %223 : vector<8x64xf32>
    %225 = arith.truncf %224 : vector<8x64xf32> to vector<8x64xbf16>
    %c0_99 = arith.constant 0 : index
    %c0_100 = arith.constant 0 : index
    %226 = vector.load %arg27[%c0_99, %c0_100] : memref<64x32xbf16, #tpu.memory_space<vmem>>, vector<64x32xbf16>
    %cst_101 = arith.constant dense<0.000000e+00> : vector<8x32xf32>
    %227 = tpu.matmul %225, %226, %cst_101 {dimension_numbers = #tpu.dot_dimension_numbers<[1], [0], [0], [1], [0, 0, 1, 1], [], []>} : vector<8x64xbf16>, vector<64x32xbf16>, vector<8x32xf32> -> vector<8x32xf32>
    %c0_102 = arith.constant 0 : index
    %c0_103 = arith.constant 0 : index
    %228 = vector.load %arg28[%c0_102, %c0_103] : memref<1x32xf32, #tpu.memory_space<vmem>>, vector<1x32xf32>
    %229 = vector.broadcast %228 : vector<1x32xf32> to vector<8x32xf32>
    %230 = arith.addf %227, %229 : vector<8x32xf32>
    %231 = arith.addf %230, %194 : vector<8x32xf32>
    %c0_104 = arith.constant 0 : index
    %c0_105 = arith.constant 0 : index
    %c0_106 = arith.constant 0 : index
    %232 = vector.load %arg29[%c0_104, %c0_105, %c0_106] : memref<1x8x32xf32, #tpu.memory_space<vmem>>, vector<1x8x32xf32>
    %233 = vector.shape_cast %232 : vector<1x8x32xf32> to vector<8x32xf32>
    %234 = vector.shape_cast %231 : vector<8x32xf32> to vector<1x8x32xf32>
    tpu.vector_store %arg29[%c0_104, %c0_105, %c0_106], %234 {strides = array<i32>} : memref<1x8x32xf32, #tpu.memory_space<vmem>>, vector<1x8x32xf32>,
    %235 = arith.truncf %193 : vector<8x128xf32> to vector<8x128xbf16>
    %c0_107 = arith.constant 0 : index
    %c0_108 = arith.constant 0 : index
    %c0_109 = arith.constant 0 : index
    %236 = vector.load %arg30[%c0_107, %c0_108, %c0_109] : memref<1x8x128xbf16, #tpu.memory_space<vmem>>, vector<1x8x128xbf16>
    %237 = vector.shape_cast %236 : vector<1x8x128xbf16> to vector<8x128xbf16>
    %238 = vector.shape_cast %235 : vector<8x128xbf16> to vector<1x8x128xbf16>
    tpu.vector_store %arg30[%c0_107, %c0_108, %c0_109], %238 {strides = array<i32>} : memref<1x8x128xbf16, #tpu.memory_space<vmem>>, vector<1x8x128xbf16>,
    return
  }
  func.func @transform_0(%arg0: i32, %arg1: i32) -> (i32, i32, i32) {
    %c0_i32 = arith.constant 0 : i32
    %c0_i32_0 = arith.constant 0 : i32
    return %arg0, %arg1, %c0_i32 : i32, i32, i32
  }
  func.func @transform_1(%arg0: i32, %arg1: i32) -> (i32, i32, i32) {
    %c0_i32 = arith.constant 0 : i32
    %c0_i32_0 = arith.constant 0 : i32
    %c0_i32_1 = arith.constant 0 : i32
    return %arg0, %c0_i32, %c0_i32_0 : i32, i32, i32
  }
  func.func @transform_2(%arg0: i32, %arg1: i32) -> (i32, i32, i32) {
    %c0_i32 = arith.constant 0 : i32
    %c0_i32_0 = arith.constant 0 : i32
    %c0_i32_1 = arith.constant 0 : i32
    return %arg0, %c0_i32, %c0_i32_0 : i32, i32, i32
  }
  func.func @transform_3(%arg0: i32, %arg1: i32) -> (i32, i32, i32) {
    %c0_i32 = arith.constant 0 : i32
    %c0_i32_0 = arith.constant 0 : i32
    %c0_i32_1 = arith.constant 0 : i32
    return %arg0, %c0_i32, %c0_i32_0 : i32, i32, i32
  }
  func.func @transform_4(%arg0: i32, %arg1: i32) -> (i32, i32, i32) {
    %c0_i32 = arith.constant 0 : i32
    %c0_i32_0 = arith.constant 0 : i32
    %c0_i32_1 = arith.constant 0 : i32
    return %arg0, %c0_i32, %c0_i32_0 : i32, i32, i32
  }
  func.func @transform_5(%arg0: i32, %arg1: i32) -> (i32, i32) {
    %c0_i32 = arith.constant 0 : i32
    %c0_i32_0 = arith.constant 0 : i32
    %c0_i32_1 = arith.constant 0 : i32
    return %c0_i32, %c0_i32_0 : i32, i32
  }
  func.func @transform_6(%arg0: i32, %arg1: i32) -> (i32, i32) {
    %c0_i32 = arith.constant 0 : i32
    %c0_i32_0 = arith.constant 0 : i32
    %c0_i32_1 = arith.constant 0 : i32
    return %c0_i32, %c0_i32_0 : i32, i32
  }
  func.func @transform_7(%arg0: i32, %arg1: i32) -> (i32, i32) {
    %c0_i32 = arith.constant 0 : i32
    %c0_i32_0 = arith.constant 0 : i32
    %c0_i32_1 = arith.constant 0 : i32
    return %c0_i32, %c0_i32_0 : i32, i32
  }
  func.func @transform_8(%arg0: i32, %arg1: i32) -> (i32, i32) {
    %c0_i32 = arith.constant 0 : i32
    %c0_i32_0 = arith.constant 0 : i32
    %c0_i32_1 = arith.constant 0 : i32
    return %c0_i32, %c0_i32_0 : i32, i32
  }
  func.func @transform_9(%arg0: i32, %arg1: i32) -> (i32, i32) {
    %c0_i32 = arith.constant 0 : i32
    %c0_i32_0 = arith.constant 0 : i32
    %c0_i32_1 = arith.constant 0 : i32
    return %c0_i32, %c0_i32_0 : i32, i32
  }
  func.func @transform_10(%arg0: i32, %arg1: i32) -> (i32, i32) {
    %c0_i32 = arith.constant 0 : i32
    %c0_i32_0 = arith.constant 0 : i32
    %c0_i32_1 = arith.constant 0 : i32
    return %c0_i32, %c0_i32_0 : i32, i32
  }
  func.func @transform_11(%arg0: i32, %arg1: i32) -> (i32, i32) {
    %c0_i32 = arith.constant 0 : i32
    %c0_i32_0 = arith.constant 0 : i32
    %c0_i32_1 = arith.constant 0 : i32
    return %c0_i32, %c0_i32_0 : i32, i32
  }
  func.func @transform_12(%arg0: i32, %arg1: i32) -> (i32, i32) {
    %c0_i32 = arith.constant 0 : i32
    %c0_i32_0 = arith.constant 0 : i32
    %c0_i32_1 = arith.constant 0 : i32
    return %c0_i32, %c0_i32_0 : i32, i32
  }
  func.func @transform_13(%arg0: i32, %arg1: i32) -> (i32, i32) {
    %c0_i32 = arith.constant 0 : i32
    %c0_i32_0 = arith.constant 0 : i32
    %c0_i32_1 = arith.constant 0 : i32
    return %c0_i32, %c0_i32_0 : i32, i32
  }
  func.func @transform_14(%arg0: i32, %arg1: i32) -> (i32, i32) {
    %c0_i32 = arith.constant 0 : i32
    %c0_i32_0 = arith.constant 0 : i32
    %c0_i32_1 = arith.constant 0 : i32
    return %c0_i32, %c0_i32_0 : i32, i32
  }
  func.func @transform_15(%arg0: i32, %arg1: i32) -> (i32, i32) {
    %c0_i32 = arith.constant 0 : i32
    %c0_i32_0 = arith.constant 0 : i32
    %c0_i32_1 = arith.constant 0 : i32
    return %c0_i32, %c0_i32_0 : i32, i32
  }
  func.func @transform_16(%arg0: i32, %arg1: i32) -> (i32, i32) {
    %c0_i32 = arith.constant 0 : i32
    %c0_i32_0 = arith.constant 0 : i32
    %c0_i32_1 = arith.constant 0 : i32
    return %c0_i32, %c0_i32_0 : i32, i32
  }
  func.func @transform_17(%arg0: i32, %arg1: i32) -> (i32, i32) {
    %c0_i32 = arith.constant 0 : i32
    %c0_i32_0 = arith.constant 0 : i32
    %c0_i32_1 = arith.constant 0 : i32
    return %c0_i32, %c0_i32_0 : i32, i32
  }
  func.func @transform_18(%arg0: i32, %arg1: i32) -> (i32, i32) {
    %c0_i32 = arith.constant 0 : i32
    %c0_i32_0 = arith.constant 0 : i32
    %c0_i32_1 = arith.constant 0 : i32
    return %c0_i32, %c0_i32_0 : i32, i32
  }
  func.func @transform_19(%arg0: i32, %arg1: i32) -> (i32, i32) {
    %c0_i32 = arith.constant 0 : i32
    %c0_i32_0 = arith.constant 0 : i32
    %c0_i32_1 = arith.constant 0 : i32
    return %c0_i32, %c0_i32_0 : i32, i32
  }
  func.func @transform_20(%arg0: i32, %arg1: i32) -> (i32, i32) {
    %c0_i32 = arith.constant 0 : i32
    %c0_i32_0 = arith.constant 0 : i32
    %c0_i32_1 = arith.constant 0 : i32
    return %c0_i32, %c0_i32_0 : i32, i32
  }
  func.func @transform_21(%arg0: i32, %arg1: i32) -> (i32, i32) {
    %c0_i32 = arith.constant 0 : i32
    %c0_i32_0 = arith.constant 0 : i32
    %c0_i32_1 = arith.constant 0 : i32
    return %c0_i32, %c0_i32_0 : i32, i32
  }
  func.func @transform_22(%arg0: i32, %arg1: i32) -> (i32, i32) {
    %c0_i32 = arith.constant 0 : i32
    %c0_i32_0 = arith.constant 0 : i32
    %c0_i32_1 = arith.constant 0 : i32
    return %c0_i32, %c0_i32_0 : i32, i32
  }
  func.func @transform_23(%arg0: i32, %arg1: i32) -> (i32, i32) {
    %c0_i32 = arith.constant 0 : i32
    %c0_i32_0 = arith.constant 0 : i32
    %c0_i32_1 = arith.constant 0 : i32
    return %c0_i32, %c0_i32_0 : i32, i32
  }
  func.func @transform_24(%arg0: i32, %arg1: i32) -> (i32, i32) {
    %c0_i32 = arith.constant 0 : i32
    %c0_i32_0 = arith.constant 0 : i32
    %c0_i32_1 = arith.constant 0 : i32
    return %c0_i32, %c0_i32_0 : i32, i32
  }
  func.func @transform_25(%arg0: i32, %arg1: i32) -> (i32, i32) {
    %c0_i32 = arith.constant 0 : i32
    %c0_i32_0 = arith.constant 0 : i32
    %c0_i32_1 = arith.constant 0 : i32
    return %c0_i32, %c0_i32_0 : i32, i32
  }
  func.func @transform_26(%arg0: i32, %arg1: i32) -> (i32, i32) {
    %c0_i32 = arith.constant 0 : i32
    %c0_i32_0 = arith.constant 0 : i32
    %c0_i32_1 = arith.constant 0 : i32
    return %c0_i32, %c0_i32_0 : i32, i32
  }
  func.func @transform_27(%arg0: i32, %arg1: i32) -> (i32, i32, i32) {
    %c0_i32 = arith.constant 0 : i32
    %c0_i32_0 = arith.constant 0 : i32
    return %arg0, %arg1, %c0_i32 : i32, i32, i32
  }
  func.func @transform_28(%arg0: i32, %arg1: i32) -> (i32, i32, i32) {
    %c0_i32 = arith.constant 0 : i32
    %c0_i32_0 = arith.constant 0 : i32
    return %arg0, %arg1, %c0_i32 : i32, i32, i32
  }
}

</mosaic_0001>

<bundles_post_ra>
// kernel: multi_transformer_decoder_layer.1
= control target key start
LH: loop header
LB: loop body
LE: loop exit
PB: predicated region body
PF: predicated region fallthrough
CT: control target
= control target key end

     0   :  { %s12363_s0 = inlined_call_operand.vmem [shape: bf16[2,8,32], index: 0, kind: input, shape index: {}, may-alias: {0,1}]   ;;  %s12364_s1 = inlined_call_operand.vmem [shape: bf16[2,8,32], index: 1, kind: input, shape index: {}, may-alias: {0,1}]   ;;  %s12365_s2 = inlined_call_operand.vmem [shape: bf16[2,128,32], index: 2, kind: input, shape index: {}]   ;;  %s12366_s3 = inlined_call_operand.vmem [shape: f32[2,1,8], index: 3, kind: input, shape index: {}]   ;;  %s12367_s4 = inlined_call_operand.vmem [shape: f32[2,1,128], index: 4, kind: input, shape index: {}]   ;;  %s12368_s5 = inlined_call_operand.vmem [shape: f32[1,32], index: 5, kind: input, shape index: {}]   ;;  %s12369_s6 = inlined_call_operand.vmem [shape: f32[1,32], index: 6, kind: input, shape index: {}]   ;;  %s12370_s7 = inlined_call_operand.vmem [shape: f32[1,32], index: 7, kind: input, shape index: {}]   ;;  %s12371_s8 = inlined_call_operand.vmem [shape: f32[1,32], index: 8, kind: input, shape index: {}]   ;;  %s12372_s9 = inlined_call_operand.vmem [shape: f32[1,32], index: 9, kind: input, shape index: {}]   ;;  %s12373_s10 = inlined_call_operand.vmem [shape: f32[1,32], index: 10, kind: input, shape index: {}]   ;;  %s12374_s11 = inlined_call_operand.vmem [shape: bf16[32,32], index: 11, kind: input, shape index: {}]   ;;  %s12375_s12 = inlined_call_operand.vmem [shape: f32[1,32], index: 12, kind: input, shape index: {}]   ;;  %s12376_s13 = inlined_call_operand.vmem [shape: bf16[32,64], index: 13, kind: input, shape index: {}]   ;;  %s12377_s14 = inlined_call_operand.vmem [shape: f32[1,64], index: 14, kind: input, shape index: {}]   ;;  %s12378_s15 = inlined_call_operand.vmem [shape: bf16[32,32], index: 15, kind: input, shape index: {}]   ;;  %s12379_s16 = inlined_call_operand.vmem [shape: f32[1,32], index: 16, kind: input, shape index: {}]   ;;  %s12380_s17 = inlined_call_operand.vmem [shape: bf16[32,32], index: 17, kind: input, shape index: {}]   ;;  %s12381_s18 = inlined_call_operand.vmem [shape: f32[1,32], index: 18, kind: input, shape index: {}]   ;;  %s12382_s19 = inlined_call_operand.vmem [shape: bf16[32,64], index: 19, kind: input, shape index: {}]   ;;  %s12383_s20 = inlined_call_operand.vmem [shape: f32[1,64], index: 20, kind: input, shape index: {}]   ;;  %s12384_s21 = inlined_call_operand.vmem [shape: bf16[32,32], index: 21, kind: input, shape index: {}]   ;;  %s12385_s22 = inlined_call_operand.vmem [shape: f32[1,32], index: 22, kind: input, shape index: {}]   ;;  %s12386_s23 = inlined_call_operand.vmem [shape: bf16[32,64], index: 23, kind: input, shape index: {}]   ;;  %s12387_s24 = inlined_call_operand.vmem [shape: f32[1,64], index: 24, kind: input, shape index: {}]   ;;  %s12388_s25 = inlined_call_operand.vmem [shape: bf16[64,32], index: 25, kind: input, shape index: {}]   ;;  %s12389_s26 = inlined_call_operand.vmem [shape: f32[1,32], index: 26, kind: input, shape index: {}]   ;;  %s12390_s27 = inlined_call_operand.hbm [shape: f32[2,8,32], index: 27, kind: output, shape index: {0}]   ;;  %s12391_s28 = inlined_call_operand.hbm [shape: bf16[2,8,128], index: 28, kind: output, shape index: {1}]  }
   0x1   :  { %12507 = sst [smem:[#allocation103_spill]] %s12363_s0 }
   0x2   :  { %12508 = sst [smem:[#allocation104_spill]] %s12364_s1 }
   0x3   :  { %12509 = sst [smem:[#allocation105_spill]] %s12365_s2 }
   0x4   :  { %12510 = sst [smem:[#allocation106_spill]] %s12366_s3 }
   0x5   :  { %12511 = sst [smem:[#allocation107_spill]] %s12367_s4 }
   0x6   :  { %12512 = sst [smem:[#allocation108_spill]] %s12368_s5 }
   0x7   :  { %12513 = sst [smem:[#allocation109_spill]] %s12369_s6 }
   0x8   :  { %12514 = sst [smem:[#allocation110_spill]] %s12370_s7 }
   0x9   :  { %12515 = sst [smem:[#allocation111_spill]] %s12371_s8 }
   0xa   :  { %12516 = sst [smem:[#allocation112_spill]] %s12372_s9 }
   0xb   :  { %12517 = sst [smem:[#allocation113_spill]] %s12373_s10 }
   0xc   :  { %12518 = sst [smem:[#allocation114_spill]] %s12374_s11 }
   0xd   :  { %12519 = sst [smem:[#allocation115_spill]] %s12375_s12 }
   0xe   :  { %12520 = sst [smem:[#allocation116_spill]] %s12389_s26 }
   0xf   :  { %12521 = sst [smem:[#allocation117_spill]] %s12390_s27 }
  0x10   :  { %12522 = sst [smem:[#allocation118_spill]] %s12391_s28 }
  0x11   :  { %34 = vsyncpa [#allocation3], 0 }
  0x12   :  { %36 = vsyncpa [#allocation3 + $0x1], 0 }
  0x13   :  { %37 = vsyncpa [#allocation5], 0 }
  0x14   :  { %39 = vsyncpa [#allocation5 + $0x1], 0  ;;  %s9501_s8 = smov 0   ;;  %s9503_s5 = smov 0  }
  0x15   :  { %s9505_s9 = smov 0   ;;  %s9507_s30 = smov 0  }
  0x16   :  { %s9509_s3 = smov 0   ;;  %s9511_s6 = smov 0  }
  0x17 LB: > { %12523 = sst [smem:[#allocation8_spill]] %s9320_s8  ;;  %s8522_s10 = sadd.s32 4294967295, %s9340_s6   ;;  %s9340_s6 = sphi %s9511_s6, %s45_s6   ;;  %s9336_s3 = sphi %s9509_s3, %s12815_s3   ;;  %s9332_s30 = sphi %s9507_s30, %s12814_s30   ;;  %s9328_s9 = sphi %s9505_s9, %s12813_s9   ;;  %s9324_s5 = sphi %s9503_s5, %s12817_s5   ;;  %s9320_s8 = sphi %s9501_s8, %s12816_s8  }
  0x18   : > { %12524 = sst [smem:[#allocation9_spill]] %s9328_s9  ;;  %s8523_s0 = sadd.s32 4294967294, %s9340_s6  }
  0x19   : > { %12525 = sst [smem:[#allocation10_spill]] %s9336_s3  ;;  %s57_s11 = sadd.s32 1, %s9336_s3 }
  0x1a   : > { %12526 = sst [smem:[#allocation11_spill]] %s9340_s6  ;;  %s660_s29 = sadd.s32 1, %s9328_s9 }
  0x1b   : > { %p59_p0 = scmp.ge.s32.totalorder %s57_s11, 2  ;;  %p670_p1 = scmp.ne.s32.totalorder %s9328_s9, %s9324_s5 }
  0x1c   : > { %p671_p2 = scmp.eq.s32.totalorder %s8522_s10, 1  ;;  %p676_p3 = scmp.ne.s32.totalorder %s9324_s5, %s9320_s8 }
  0x1d   : > { %s12819_s11 = smov (%p59_p0, %s57_s11), 0  ;;  %p677_p5 = scmp.eq.s32.totalorder %s8523_s0, 1 }
  0x1e   : > { %12527 = sst [smem:[#allocation12_spill]] %s12819_s11  ;;  %p9541_p4 = por %p671_p2, %p670_p1 }
  0x1f   : > { %s655_s7 = ssub.s32 %s9336_s3, %s12819_s11  ;;  %p8526_p6 = scmp.ge.s32.totalorder %s9340_s6, 1 }
  0x20   : > { %p658_p7 = scmp.eq.s32.totalorder %s655_s7, 0  ;;  %p9548_p8 = por %p677_p5, %p676_p3 }
  0x21   : > { %p826_p9 = scmp.lt.s32.totalorder %s9340_s6, 3 }
  0x22   : > { %s12529_s12 = scalar_select %p9548_p8, 1, 0 }
  0x23   : > { %s9554_s1 = scalar_select %p658_p7, %s9328_s9, %s660_s29  }
  0x24   : > { %12530 = sst [smem:[#allocation13_spill]] %s12529_s12  ;;  %p827_p10 = pnand %p8526_p6, %p826_p9 }
  0x25   : > { %12531 = sst [smem:[#allocation14_spill]] %s9554_s1 }
  0x26   : > { %830 = sbr.rel (%p827_p10) target bundleno = 4483 (0x1183), region = 128 }
  0x2d   : > { %p922_p11 = scmp.lt.s32.totalorder %s9332_s30, 1  ;;  %vm986_vm0 = vcmask 261120   ;;  %s12532_s3 = sld [smem:[#allocation104_spill]]  ;;  %v9164_v16 = vld [vmem:[%s12376_s13] sm:$0xff]   ;;  %v12404_v18 = vmov 0.0   ;;  %v9166_v19 = vld [vmem:[%s12376_s13 + $0x8] sm:$0xff]   ;;  %v966_v52 = vlaneseq }
  0x2e   : > { %s12533_s29 = sld [smem:[#allocation105_spill]]  ;;  %s12534_s26 = sld [smem:[#allocation103_spill]]  ;;  %8812 = vmatprep.subr.bf16.mxu1 %v12404_v18  ;;  %8804 = vmatprep.subr.bf16.mxu0 %v12404_v18  ;;  %vm9343_vm1 = vmmov 0   ;;  %v8539_v39 = vld [vmem:[%s12377_s14] ss:$0 sm:$0xff]  ;;  %vm1622_vm2 = vcmask 64512  }
  0x2f   : > { %s9558_s4 = scalar_select %p922_p11, %s9332_s30, 1  ;;  %8813 = vmatpush3.bf16.msra.mxu1 %v9164_v16  ;;  %8816 = vmatprep.mubr.msk.bf16.mxu1 %vm9343_vm1, %v12404_v18  ;;  %v9347_v53 = vmov 1983009808   ;;  %v9348_v55 = vmov 1934713408   ;;  %v9633_v57 = vshrl.u32 %v966_v52, 7 }
  0x30   : > { %s12535_s9 = sld [smem:[#allocation114_spill]]  ;;  %8814 = vmatprep.subr.bf16.mxu1 %v12404_v18  ;;  %8808 = vmatprep.mubr.msk.bf16.mxu0 %vm9343_vm1, %v12404_v18  ;;  %s12539_s12 = sld [smem:[#allocation115_spill]]  ;;  %v1183_v54 = vunpack.c.l.s4 %v9347_v53  ;;  %v1215_v56 = vunpack.c.l.s4 %v9348_v55  ;;  %vm1864_vm7 = vcmask 1043456   ;;  %vm2195_vm8 = vcmask 130048  }
  0x31   : > { %s8529_s10 = sshll.u32 %s9558_s4, 2  ;;  %s8682_s0 = sshll.u32 %s9558_s4, 6  ;;  %12540 = vst [vmem:[#allocation15_spill] sm:$0xff] %v9633_v57  ;;  %vm2197_vm9 = vcmask 195584   ;;  %vm8295_vm12 = vcmask 523264  }
  0x32   : > { %s9346_s7 = smov 104   ;;  %v1184_v58 = vunpack.c.0.s8 %v1183_v54  ;;  %v1216_v60 = vunpack.c.0.s8 %v1215_v56  ;;  %s12541_s27 = sld [smem:[#allocation106_spill]] }
  0x33   : > { %s932_s8 = scalar_lea.vmem %s12532_s3, %s8529_s10  ;;  %8815 = vmatpush3.bf16.msra.mxu1 %v9166_v19  ;;  %s12560_s3 = sld [smem:[#allocation110_spill]] }
  0x34   : > { %s9568_s1 = scalar_lea.vmem %s12533_s29, %s8682_s0  ;;  %v947_v0 = vld [vmem:[%s932_s8] sm:$0xf]  ;;  %s928_s28 = scalar_lea.vmem %s12534_s26, %s8529_s10  ;;  %8826 = vmatprep.subr.bf16.mxu1 %v12404_v18  ;;  %v9638_v61 = vsub.s32 %v1184_v58, %v9633_v57 }
  0x35   : > { %v948_v1 = vunpack.c.l.bf16 %v947_v0  ;;  %v945_v2 = vld [vmem:[%s928_s28] sm:$0xf]  ;;  %s12537_s29 = sld [smem:[#allocation108_spill]]  ;;  %s12538_s28 = sld [smem:[#allocation109_spill]] }
  0x36   : > { %v9573_v3 = vunpack.c.l.bf16 %v945_v2  ;;  %s12536_s11 = smov %s12535_s9  ;;  %v9165_v17 = vld [vmem:[%s12535_s9] sm:$0xff]   ;;  %s9344_s10 = smov 120  }
  0x37   : > { %v1015_v4 = vsel %vm986_vm0, %v948_v1, 0.0  ;;  %8805 = vmatpush3.bf16.msra.mxu0 %v9165_v17  ;;  %v9167_v20 = vld [vmem:[%s12536_s11 + $0x8] sm:$0xff]   ;;  %v8535_v44 = vld [vmem:[%s12539_s12] ss:$0 sm:$0xff]  ;;  %s9345_s0 = smov 112   ;;  %s9350_s8 = smov 96  }
  0x38   : > { %1016 = vadd.xlane.f32.xlu0 %v1015_v4  ;;  %v987_v5 = vsel %vm986_vm0, %v9573_v3, 0.0  ;;  %8806 = vmatprep.subr.bf16.mxu0 %v12404_v18  ;;  %s9352_s26 = smov 8  }
  0x3b   : > { %8807 = vmatpush3.bf16.msra.mxu0 %v9167_v20  ;;  %v8533_v28 = vld [vmem:[%s12537_s29] ss:$0 sm:$0xff]  ;;  %s9351_s29 = smov 16  }
  0x3c   : > { %988 = vadd.xlane.f32.xlu0 %v987_v5  ;;  %8820 = vmatprep.subr.bf16.mxu0 %v12404_v18  ;;  %v8534_v30 = vld [vmem:[%s12538_s28] ss:$0 sm:$0xff]  ;;  %v9653_v5 = vsub.s32 %v1216_v60, %v9633_v57  ;;  %s940_s28 = scalar_lea.vmem %s12541_s27, %s9558_s4  ;;  %s9353_s27 = smov 24  }
  0xc5   : > { %v1017_v6 = vpop.xlane.xlu0 %1016 }
  0xc6   : > { %v1018_v7 = vmul.f32 0.03125, %v1017_v6 }
  0xc8   : > { %v1019_v8 = vsub.f32 %v948_v1, %v1018_v7 }
  0xc9   : > { %v989_v9 = vpop.xlane.xlu0 %988 }
  0xca   : > { %v991_v10 = vmul.f32 0.03125, %v989_v9  ;;  %v1020_v11 = vmul.f32 %v1019_v8, %v1019_v8 }
  0xcc   : > { %v992_v12 = vsub.f32 %v9573_v3, %v991_v10  ;;  %v1021_v13 = vsel %vm986_vm0, %v1020_v11, 0.0 }
  0xcd   : > { %1022 = vadd.xlane.f32.xlu1 %v1021_v13 }
  0xce   : > { %v993_v14 = vmul.f32 %v992_v12, %v992_v12 }
  0xd0   : > { %v994_v15 = vsel %vm986_vm0, %v993_v14, 0.0 }
  0xd1   : > { %995 = vadd.xlane.f32.xlu1 %v994_v15 }
 0x15a   : > { %v1023_v21 = vpop.xlane.xlu1 %1022 }
 0x15b   : > { %v1024_v22 = vmul.f32 0.03125, %v1023_v21 }
 0x15d   : > { %v1025_v23 = vadd.f32 1e-06, %v1024_v22 }
 0x15e   : > { %v996_v24 = vpop.xlane.xlu1 %995 }
 0x15f   : > { %9190 = vrsqrt.f32 %v1025_v23  ;;  %v997_v25 = vmul.f32 0.03125, %v996_v24 }
 0x161   : > { %v998_v26 = vadd.f32 1e-06, %v997_v25 }
 0x163   : > { %9192 = vrsqrt.f32 %v998_v26 }
 0x169   : > { %v9191_v27 = vpop.eup %9190 }
 0x16a   : > { %v1027_v29 = vmul.f32 %v9191_v27, %v1019_v8 }
 0x16c   : > { %v1028_v31 = vmul.f32 %v8533_v28, %v1027_v29 }
 0x16d   : > { %v9193_v32 = vpop.eup %9192 }
 0x16e   : > { %v1029_v33 = vadd.f32 %v8534_v30, %v1028_v31  ;;  %v1000_v34 = vmul.f32 %v9193_v32, %v992_v12 }
 0x170   : > { %v1098_v35 = vpack.c.bf16 %v1029_v33, %v1029_v33  ;;  %v1007_v36 = vmul.f32 %v8533_v28, %v1000_v34 }
 0x172   : > { %8817 = vmatmul.mubr.msk.bf16.vlgmr.msra.gmra.mrb[0].mxu1 %vm986_vm0, %v1098_v35  ;;  %v1014_v37 = vadd.f32 %v8534_v30, %v1007_v36 }
 0x173   : > { %8828 = vmatprep.mubr.msk.bf16.mxu1 %vm9343_vm1, %v12404_v18 }
 0x174   : > { %v1030_v38 = vpack.c.bf16 %v1014_v37, %v1014_v37 }
 0x176   : > { %8809 = vmatmul.mubr.msk.bf16.vlgmr.msra.gmra.mrb[0].mxu0 %vm986_vm0, %v1030_v38 }
 0x177   : > { %8822 = vmatprep.mubr.msk.bf16.mxu0 %vm9343_vm1, %v12404_v18 }
 0x245   : > { %v1159_v40 = vpop.f32.mrb[0].mxu1 }
 0x246   : > { %v9618_v41 = vadd.f32 %v8539_v39, %v1159_v40  ;;  %v8818_v42 = vpop.f32.mrb[1].mxu1 }
 0x247   : > { %v1162_v43 = vpop.f32.mrb[2].mxu1 }
 0x248   : > { %v8819_v45 = vpop.f32.mrb[3].mxu1  ;;  %1321 = vrot.lane.b32.xlu0 %v9618_v41, %s9344_s10  ;;  %1324 = vrot.lane.b32.xlu1 %v9618_v41, %s9345_s0 }
 0x249   : > { %v1091_v46 = vpop.f32.mrb[0].mxu0 }
 0x24a   : > { %v1092_v47 = vadd.f32 %v8535_v44, %v1091_v46  ;;  %v8810_v48 = vpop.f32.mrb[1].mxu0 }
 0x24b   : > { %v1094_v49 = vpop.f32.mrb[2].mxu0 }
 0x24c   : > { %v1097_v50 = vmul.f32 0.35355338, %v1092_v47  ;;  %1327 = vrot.lane.b32.xlu1 %v9618_v41, %s9346_s7  ;;  %v8811_v51 = vpop.f32.mrb[3].mxu0 }
 0x24e   : > { %1174 = vrot.lane.b32.xlu0 %v1097_v50, %s9345_s0 }
 0x250   : > { %1171 = vrot.lane.b32.xlu1 %v1097_v50, %s9344_s10 }
 0x254   : > { %1177 = vrot.lane.b32.xlu1 %v1097_v50, %s9346_s7 }
 0x2ba   : > { %v9635_v59 = vpop.permute.xlu1 %1324  ;;  %v9644_v0 = vpop.permute.xlu0 %1321 }
 0x2bb   : > { %v1330_v62 = vcombine.low %v9618_v41, %v9635_v59  ;;  %v1331_v63 = vcombine.high %v9618_v41, %v9635_v59 }
 0x2bd   : > { %v1338_v6 = vrot.slane %v1330_v62, %v9638_v61  ;;  %v1345_v7 = vrot.slane %v1331_v63, %v9638_v61 }
 0x2be   : > { %v9646_v1 = vpop.permute.xlu1 %1327 }
 0x2bf   : > { %v1346_v2 = vcombine.low %v9644_v0, %v9646_v1  ;;  %v1347_v4 = vcombine.high %v9644_v0, %v9646_v1 }
 0x2c0   : > { %v1175_v15 = vpop.permute.xlu0 %1174 }
 0x2c1   : > { %v1354_v8 = vrot.slane %v1346_v2, %v9638_v61  ;;  %v1361_v9 = vrot.slane %v1347_v4, %v9638_v61  ;;  %v1180_v21 = vcombine.low %v1097_v50, %v1175_v15  ;;  %v1181_v22 = vcombine.high %v1097_v50, %v1175_v15 }
 0x2c2   : > { %v1172_v10 = vpop.permute.xlu1 %1171 }
 0x2c3   : > { %v1362_v11 = vcombine.low %v1338_v6, %v1354_v8  ;;  %v1363_v12 = vcombine.high %v1338_v6, %v1354_v8  ;;  %v1378_v13 = vcombine.low %v1345_v7, %v1361_v9  ;;  %v1379_v14 = vcombine.high %v1345_v7, %v1361_v9 }
 0x2c4   : > { %v1188_v34 = vrot.slane %v1180_v21, %v9638_v61  ;;  %v1195_v35 = vrot.slane %v1181_v22, %v9638_v61 }
 0x2c5   : > { %v1370_v16 = vrot.slane %v1362_v11, %v9653_v5  ;;  %v1377_v17 = vrot.slane %v1363_v12, %v9653_v5  ;;  %v1386_v19 = vrot.slane %v1378_v13, %v9653_v5  ;;  %v1393_v20 = vrot.slane %v1379_v14, %v9653_v5 }
 0x2c6   : > { %v1178_v23 = vpop.permute.xlu1 %1177 }
 0x2c7   : > { %v1398_v24 = vcombine.low %v1370_v16, %v1377_v17  ;;  %v8545_v25 = vcombine.high %v1370_v16, %v1377_v17  ;;  %v1414_v26 = vcombine.low %v1386_v19, %v1393_v20  ;;  %v8546_v27 = vcombine.high %v1386_v19, %v1393_v20 }
 0x2c8   : > { %v1196_v28 = vcombine.low %v1172_v10, %v1178_v23  ;;  %v1197_v29 = vcombine.high %v1172_v10, %v1178_v23 }
 0x2c9   : > { %v1405_v30 = vrot.slane %v1398_v24, %v9638_v61  ;;  %v1413_v31 = vrot.slane %v8545_v25, %v9638_v61  ;;  %v1421_v32 = vrot.slane %v1414_v26, %v9638_v61  ;;  %v1429_v33 = vrot.slane %v8546_v27, %v9638_v61 }
 0x2ca   : > { %v1204_v36 = vrot.slane %v1196_v28, %v9638_v61  ;;  %v1211_v37 = vrot.slane %v1197_v29, %v9638_v61 }
 0x2cb   : > { %v1430_v38 = vcombine.low %v1405_v30, %v1413_v31  ;;  %v1446_v39 = vcombine.low %v1421_v32, %v1429_v33  ;;  %v1431_v40 = vcombine.high %v1405_v30, %v1413_v31  ;;  %v1447_v42 = vcombine.high %v1421_v32, %v1429_v33 }
 0x2cc   : > { %v1212_v43 = vcombine.low %v1188_v34, %v1204_v36  ;;  %v1213_v44 = vcombine.high %v1188_v34, %v1204_v36  ;;  %v1228_v45 = vcombine.low %v1195_v35, %v1211_v37  ;;  %v1229_v46 = vcombine.high %v1195_v35, %v1211_v37  ;;  %v973_v36 = vld [vmem:[%s940_s28] sm:$0x1]  ;;  %s12566_s28 = sld [smem:[#allocation111_spill]] }
 0x2cd   : > { %v1438_v47 = vrot.slane %v1430_v38, %v9653_v5  ;;  %v1454_v48 = vrot.slane %v1446_v39, %v9653_v5  ;;  %v1445_v56 = vrot.slane %v1431_v40, %v9653_v5  ;;  %v1461_v58 = vrot.slane %v1447_v42, %v9653_v5 }
 0x2ce   : > { %v1220_v49 = vrot.slane %v1212_v43, %v9653_v5  ;;  %v1227_v50 = vrot.slane %v1213_v44, %v9653_v5  ;;  %v1236_v51 = vrot.slane %v1228_v45, %v9653_v5  ;;  %v1243_v53 = vrot.slane %v1229_v46, %v9653_v5 }
 0x2cf   : > { %v1462_v54 = vcombine.low %v1438_v47, %v1454_v48  ;;  %v1463_v55 = vcombine.high %v1438_v47, %v1454_v48  ;;  %v1464_v15 = vcombine.low %v1445_v56, %v1461_v58  ;;  %v1465_v16 = vcombine.high %v1445_v56, %v1461_v58 }
 0x2d0   : > { %v1248_v60 = vcombine.low %v1220_v49, %v1227_v50  ;;  %v8543_v62 = vcombine.high %v1220_v49, %v1227_v50  ;;  %v1264_v63 = vcombine.low %v1236_v51, %v1243_v53  ;;  %v8544_v2 = vcombine.high %v1236_v51, %v1243_v53 }
 0x2d1   : > { %v1466_v4 = vpack.c.bf16 %v1462_v54, %v1462_v54  ;;  %v1467_v6 = vpack.c.bf16 %v1463_v55, %v1463_v55  ;;  %v1468_v24 = vpack.c.bf16 %v1464_v15, %v1464_v15  ;;  %v1469_v25 = vpack.c.bf16 %v1465_v16, %v1465_v16 }
 0x2d2   : > { %v1255_v7 = vrot.slane %v1248_v60, %v9638_v61  ;;  %v1263_v8 = vrot.slane %v8543_v62, %v9638_v61  ;;  %v1271_v9 = vrot.slane %v1264_v63, %v9638_v61  ;;  %v1279_v10 = vrot.slane %v8544_v2, %v9638_v61 }
 0x2d3   : > { %v1627_v11 = vsel %vm1622_vm2, %v1466_v4, 0  ;;  %v1673_v12 = vsel %vm1622_vm2, %v1467_v6, 0  ;;  %v1719_v30 = vsel %vm1622_vm2, %v1468_v24, 0  ;;  %v1765_v31 = vsel %vm1622_vm2, %v1469_v25, 0 }
 0x2d4   : > { %v1280_v13 = vcombine.low %v1255_v7, %v1263_v8  ;;  %v1296_v14 = vcombine.low %v1271_v9, %v1279_v10  ;;  %8821 = vmatpush3.bf16.xpose.msra.mxu0 %v1627_v11  ;;  %8827 = vmatpush3.bf16.xpose.msra.mxu1 %v1673_v12  ;;  %v1281_v17 = vcombine.high %v1255_v7, %v1263_v8  ;;  %vm974_vm3 = vcmp.gt.f32.partialorder %v973_v36, 0.0 }
 0x2d5   : > { %8832 = vmatprep.subr.bf16.mxu0 %v12404_v18  ;;  %v1297_v19 = vcombine.high %v1271_v9, %v1279_v10  ;;  %8838 = vmatprep.subr.bf16.mxu1 %v12404_v18  ;;  %v12402_v37 = vsub.s32 0, %v9633_v57  ;;  %v12403_v38 = vmov 0   ;;  %v971_v40 = vand.u32 127, %v966_v52 }
 0x2d6   : > { %v1288_v20 = vrot.slane %v1280_v13, %v9653_v5  ;;  %v1304_v21 = vrot.slane %v1296_v14, %v9653_v5  ;;  %v1295_v28 = vrot.slane %v1281_v17, %v9653_v5  ;;  %v975_v39 = vsel %vm974_vm3, 1, %v12403_v38 }
 0x2d7   : > { %v1311_v29 = vrot.slane %v1297_v19, %v9653_v5  ;;  %v979_v42 = vrot.slane %v975_v39, %v12402_v37  ;;  %vm972_vm4 = vcmp.gt.s32.totalorder %v971_v40, %v9633_v57 }
 0x2d8   : > { %v1312_v22 = vcombine.low %v1288_v20, %v1304_v21  ;;  %v1313_v23 = vcombine.high %v1288_v20, %v1304_v21 }
 0x2d9   : > { %v1314_v32 = vcombine.low %v1295_v28, %v1311_v29  ;;  %v1315_v33 = vcombine.high %v1295_v28, %v1311_v29  ;;  %vm980_vm5 = vcmp.eq.s32.totalorder %v979_v42, 1 }
 0x2da   : > { %v1316_v26 = vpack.c.bf16 %v1312_v22, %v1312_v22  ;;  %v1317_v27 = vpack.c.bf16 %v1313_v23, %v1313_v23  ;;  %vm9717_vm6 = vmor %vm972_vm4, %vm980_vm5 }
 0x2db   : > { %v1318_v34 = vpack.c.bf16 %v1314_v32, %v1314_v32  ;;  %v1319_v35 = vpack.c.bf16 %v1315_v33, %v1315_v33 }
 0x2dc   : > { %8823 = vmatmul.mubr.msk.bf16.vlgmr.msra.gmra.mrb[4].mxu0 %vm1622_vm2, %v1316_v26  ;;  %8829 = vmatmul.mubr.msk.bf16.vlgmr.msra.gmra.mrb[4].mxu1 %vm1622_vm2, %v1317_v27 }
 0x2dd   : > { %8833 = vmatpush3.bf16.xpose.msra.mxu0 %v1719_v30  ;;  %8839 = vmatpush3.bf16.xpose.msra.mxu1 %v1765_v31 }
 0x2de   : > { %8834 = vmatprep.mubr.msk.bf16.mxu0 %vm9343_vm1, %v12404_v18  ;;  %8840 = vmatprep.mubr.msk.bf16.mxu1 %vm9343_vm1, %v12404_v18 }
 0x2df   : > { %8844 = vmatprep.subr.bf16.mxu0 %v12404_v18  ;;  %8850 = vmatprep.subr.bf16.mxu1 %v12404_v18 }
 0x2e4   : > { %8835 = vmatmul.mubr.msk.bf16.vlgmr.msra.gmra.mrb[8].mxu0 %vm1622_vm2, %v1318_v34  ;;  %8841 = vmatmul.mubr.msk.bf16.vlgmr.msra.gmra.mrb[8].mxu1 %vm1622_vm2, %v1319_v35 }
 0x2e5   : > { %8846 = vmatprep.mubr.msk.bf16.mxu0 %vm9343_vm1, %v12404_v18  ;;  %8852 = vmatprep.mubr.msk.bf16.mxu1 %vm9343_vm1, %v12404_v18 }
 0x3af   : > { %v1663_v44 = vpop.f32.mrb[4].mxu0  ;;  %v1709_v45 = vpop.f32.mrb[4].mxu1 }
 0x3b0   : > { %v1809_v46 = vsel %vm9717_vm6, -1e+18, %v1663_v44  ;;  %v1810_v47 = vsel %vm9717_vm6, -1e+18, %v1709_v45  ;;  %v8824_v48 = vpop.f32.mrb[5].mxu0  ;;  %v8830_v52 = vpop.f32.mrb[5].mxu1 }
 0x3b1   : > { %v1666_v49 = vpop.f32.mrb[6].mxu0  ;;  %v1712_v50 = vpop.f32.mrb[6].mxu1  ;;  %v1816_v51 = vsel %vm1622_vm2, %v1810_v47, -inf  ;;  %v1813_v53 = vsel %vm1622_vm2, %v1809_v46, -inf }
 0x3b2   : > { %1817 = vmax.xlane.f32.xlu1 %v1816_v51  ;;  %v8831_v54 = vpop.f32.mrb[7].mxu1  ;;  %1814 = vmax.xlane.f32.xlu0 %v1813_v53  ;;  %v8825_v55 = vpop.f32.mrb[7].mxu0 }
 0x3b7   : > { %v1755_v56 = vpop.f32.mrb[8].mxu0  ;;  %v1801_v58 = vpop.f32.mrb[8].mxu1 }
 0x3b8   : > { %v1811_v60 = vsel %vm9717_vm6, -1e+18, %v1755_v56  ;;  %v8836_v62 = vpop.f32.mrb[9].mxu0  ;;  %v8842_v63 = vpop.f32.mrb[9].mxu1  ;;  %v1812_v7 = vsel %vm9717_vm6, -1e+18, %v1801_v58 }
 0x3b9   : > { %v1758_v2 = vpop.f32.mrb[10].mxu0  ;;  %v1804_v4 = vpop.f32.mrb[10].mxu1  ;;  %v1819_v6 = vsel %vm1622_vm2, %v1811_v60, -inf  ;;  %v1822_v10 = vsel %vm1622_vm2, %v1812_v7, -inf }
 0x3ba   : > { %v8843_v8 = vpop.f32.mrb[11].mxu1  ;;  %1820 = vmax.xlane.f32.xlu0 %v1819_v6  ;;  %v8837_v9 = vpop.f32.mrb[11].mxu0 }
 0x3be   : > { %1823 = vmax.xlane.f32.xlu0 %v1822_v10 }
 0x3c3   : > { %1472 = vrot.lane.b32.xlu1 %v9644_v0, %s9350_s8 }
 0x3c7   : > { %1474 = vrot.lane.b32.xlu1 %v9635_v59, %s9350_s8 }
 0x43f   : > { %v1818_v11 = vpop.xlane.xlu1 %1817  ;;  %v1815_v12 = vpop.xlane.xlu0 %1814 }
 0x440   : > { %v1826_v13 = vsub.f32 %v1810_v47, %v1818_v11  ;;  %v1825_v14 = vsub.f32 %v1809_v46, %v1815_v12 }
 0x442   : > { %v1831_v15 = vmul.f32 1.442695, %v1826_v13  ;;  %v1829_v16 = vmul.f32 1.442695, %v1825_v14 }
 0x444   : > { %9194 = vpow2.f32 %v1831_v15 }
 0x445   : > { %9196 = vpow2.f32 %v1829_v16 }
 0x447   : > { %v1821_v59 = vpop.xlane.xlu0 %1820 }
 0x448   : > { %v1827_v23 = vsub.f32 %v1811_v60, %v1821_v59 }
 0x44a   : > { %v1833_v25 = vmul.f32 1.442695, %v1827_v23 }
 0x44b   : > { %v1824_v21 = vpop.xlane.xlu0 %1823 }
 0x44c   : > { %v1828_v22 = vsub.f32 %v1812_v7, %v1824_v21 }
 0x44e   : > { %v9737_v17 = vpop.eup %9194  ;;  %v1835_v24 = vmul.f32 1.442695, %v1828_v22 }
 0x44f   : > { %v9739_v19 = vpop.eup %9196  ;;  %v1840_v20 = vsel %vm1622_vm2, %v9737_v17, 0.0 }
 0x450   : > { %1841 = vadd.xlane.f32.xlu1 %v1840_v20  ;;  %v1837_v0 = vsel %vm1622_vm2, %v9739_v19, 0.0  ;;  %9198 = vpow2.f32 %v1835_v24 }
 0x451   : > { %1838 = vadd.xlane.f32.xlu0 %v1837_v0  ;;  %9200 = vpow2.f32 %v1833_v25 }
 0x45a   : > { %v9749_v26 = vpop.eup %9198 }
 0x45b   : > { %v9751_v27 = vpop.eup %9200  ;;  %v1846_v28 = vsel %vm1622_vm2, %v9749_v26, 0.0 }
 0x461   : > { %1476 = vrot.lane.b32.xlu1 %v9646_v1, %s9350_s8  ;;  %v1843_v1 = vsel %vm1622_vm2, %v9751_v27, 0.0 }
 0x467   : > { %1470 = vrot.lane.b32.xlu0 %v9618_v41, %s9350_s8  ;;  %v1473_v41 = vpop.permute.xlu1 %1472 }
 0x46b   : > { %v1475_v29 = vpop.permute.xlu1 %1474 }
 0x485   : > { %1847 = vadd.xlane.f32.xlu1 %v1846_v28 }
 0x486   : > { %1844 = vadd.xlane.f32.xlu0 %v1843_v1 }
 0x4dd   : > { %v1842_v30 = vpop.xlane.xlu1 %1841 }
 0x4de   : > { %v1839_v31 = vpop.xlane.xlu0 %1838  ;;  %9202 = vrcp.f32 %v1842_v30 }
 0x4df   : > { %9204 = vrcp.f32 %v1839_v31 }
 0x4e1   : > { %v1477_v32 = vpop.permute.xlu1 %1476 }
 0x4e2   : > { %v1498_v33 = vcombine.low %v1473_v41, %v1477_v32  ;;  %v1499_v34 = vcombine.high %v1473_v41, %v1477_v32  ;;  %v1471_v35 = vpop.permute.xlu0 %1470 }
 0x4e3   : > { %v1482_v36 = vcombine.low %v1471_v35, %v1475_v29  ;;  %v1483_v39 = vcombine.high %v1471_v35, %v1475_v29 }
 0x4e4   : > { %v1506_v40 = vrot.slane %v1498_v33, %v9638_v61  ;;  %v1513_v42 = vrot.slane %v1499_v34, %v9638_v61 }
 0x4e5   : > { %v1490_v43 = vrot.slane %v1482_v36, %v9638_v61  ;;  %v1497_v44 = vrot.slane %v1483_v39, %v9638_v61 }
 0x4e7   : > { %v1514_v45 = vcombine.low %v1490_v43, %v1506_v40  ;;  %v1515_v46 = vcombine.high %v1490_v43, %v1506_v40  ;;  %v1530_v47 = vcombine.low %v1497_v44, %v1513_v42  ;;  %v1531_v48 = vcombine.high %v1497_v44, %v1513_v42 }
 0x4e8   : > { %v9203_v8 = vpop.eup %9202 }
 0x4e9   : > { %v1522_v52 = vrot.slane %v1514_v45, %v9653_v5  ;;  %v1529_v49 = vrot.slane %v1515_v46, %v9653_v5  ;;  %v1538_v50 = vrot.slane %v1530_v47, %v9653_v5  ;;  %v1545_v51 = vrot.slane %v1531_v48, %v9653_v5  ;;  %v9205_v13 = vpop.eup %9204 }
 0x4ea   : > { %v1853_v21 = vmul.f32 %v9205_v13, %v9739_v19  ;;  %v1854_v22 = vmul.f32 %v9203_v8, %v9737_v17 }
 0x4eb   : > { %v1550_v53 = vcombine.low %v1522_v52, %v1529_v49  ;;  %v8547_v54 = vcombine.high %v1522_v52, %v1529_v49  ;;  %v1566_v55 = vcombine.low %v1538_v50, %v1545_v51  ;;  %v8548_v56 = vcombine.high %v1538_v50, %v1545_v51 }
 0x4ec   : > { %v1857_v1 = vpack.c.bf16 %v1853_v21, %v1853_v21  ;;  %v1858_v41 = vpack.c.bf16 %v1854_v22, %v1854_v22 }
 0x4ed   : > { %v1557_v58 = vrot.slane %v1550_v53, %v9638_v61  ;;  %v1565_v60 = vrot.slane %v8547_v54, %v9638_v61  ;;  %v1573_v62 = vrot.slane %v1566_v55, %v9638_v61  ;;  %v1581_v63 = vrot.slane %v8548_v56, %v9638_v61 }
 0x4ef   : > { %v1582_v2 = vcombine.low %v1557_v58, %v1565_v60  ;;  %v1598_v4 = vcombine.low %v1573_v62, %v1581_v63  ;;  %v1583_v6 = vcombine.high %v1557_v58, %v1565_v60  ;;  %v1599_v7 = vcombine.high %v1573_v62, %v1581_v63 }
 0x4f1   : > { %v1590_v9 = vrot.slane %v1582_v2, %v9653_v5  ;;  %v1606_v10 = vrot.slane %v1598_v4, %v9653_v5  ;;  %v1597_v11 = vrot.slane %v1583_v6, %v9653_v5  ;;  %v1613_v12 = vrot.slane %v1599_v7, %v9653_v5  ;;  %v9168_v4 = vld [vmem:[%s12378_s15] sm:$0xff]  }
 0x4f3   : > { %v1614_v14 = vcombine.low %v1590_v9, %v1606_v10  ;;  %v1615_v15 = vcombine.high %v1590_v9, %v1606_v10  ;;  %v1616_v16 = vcombine.low %v1597_v11, %v1613_v12  ;;  %v1617_v20 = vcombine.high %v1597_v11, %v1613_v12 }
 0x4f5   : > { %v1618_v0 = vpack.c.bf16 %v1614_v14, %v1614_v14  ;;  %v1619_v59 = vpack.c.bf16 %v1615_v15, %v1615_v15  ;;  %v1620_v25 = vpack.c.bf16 %v1616_v16, %v1616_v16  ;;  %v1621_v28 = vpack.c.bf16 %v1617_v20, %v1617_v20  ;;  %v9169_v14 = vld [vmem:[%s12378_s15 + $0x8] sm:$0xff]  }
 0x4f7   : > { %v1866_v23 = vsel %vm1864_vm7, %v1618_v0, 0  ;;  %v1912_v24 = vsel %vm1864_vm7, %v1619_v59, 0  ;;  %v1958_v17 = vsel %vm1864_vm7, %v1620_v25, 0  ;;  %v2004_v19 = vsel %vm1864_vm7, %v1621_v28, 0 }
 0x4f8   : > { %8845 = vmatpush3.bf16.msra.mxu0 %v1866_v23  ;;  %8851 = vmatpush3.bf16.msra.mxu1 %v1912_v24 }
 0x4f9   : > { %8856 = vmatprep.subr.bf16.mxu0 %v12404_v18  ;;  %8862 = vmatprep.subr.bf16.mxu1 %v12404_v18 }
 0x4fb   : > { %8847 = vmatmul.mubr.msk.bf16.vlgmr.msra.gmra.mrb[12].mxu0 %vm1622_vm2, %v1857_v1  ;;  %8853 = vmatmul.mubr.msk.bf16.vlgmr.msra.gmra.mrb[12].mxu1 %vm1622_vm2, %v1858_v41 }
 0x4fc   : > { %8857 = vmatpush3.bf16.msra.mxu0 %v1958_v17  ;;  %8863 = vmatpush3.bf16.msra.mxu1 %v2004_v19 }
 0x4fd   : > { %8858 = vmatprep.mubr.msk.bf16.mxu0 %vm9343_vm1, %v12404_v18  ;;  %8864 = vmatprep.mubr.msk.bf16.mxu1 %vm9343_vm1, %v12404_v18 }
 0x4fe   : > { %8868 = vmatprep.subr.bf16.mxu0 %v12404_v18  ;;  %8876 = vmatprep.subr.bf16.mxu1 %v12404_v18 }
 0x512   : > { %v1848_v29 = vpop.xlane.xlu1 %1847 }
 0x513   : > { %9206 = vrcp.f32 %v1848_v29  ;;  %v1845_v30 = vpop.xlane.xlu0 %1844 }
 0x514   : > { %9208 = vrcp.f32 %v1845_v30 }
 0x51d   : > { %v9207_v31 = vpop.eup %9206 }
 0x51e   : > { %v9209_v32 = vpop.eup %9208  ;;  %v1856_v33 = vmul.f32 %v9207_v31, %v9749_v26 }
 0x51f   : > { %v1855_v34 = vmul.f32 %v9209_v32, %v9751_v27 }
 0x520   : > { %v1860_v35 = vpack.c.bf16 %v1856_v33, %v1856_v33 }
 0x521   : > { %v1859_v36 = vpack.c.bf16 %v1855_v34, %v1855_v34 }
 0x522   : > { %8865 = vmatmul.mubr.msk.bf16.vlgmr.msra.gmra.mrb[16].mxu1 %vm1622_vm2, %v1860_v35 }
 0x523   : > { %8859 = vmatmul.mubr.msk.bf16.vlgmr.msra.gmra.mrb[16].mxu0 %vm1622_vm2, %v1859_v36  ;;  %8880 = vmatprep.mubr.msk.bf16.mxu1 %vm9343_vm1, %v12404_v18 }
 0x524   : > { %8872 = vmatprep.mubr.msk.bf16.mxu0 %vm9343_vm1, %v12404_v18  ;;  %8869 = vmatpush3.bf16.msra.mxu0 %v9168_v4 }
 0x525   : > { %8870 = vmatprep.subr.bf16.mxu0 %v12404_v18 }
 0x528   : > { %8871 = vmatpush3.bf16.msra.mxu0 %v9169_v14 }
 0x5ce   : > { %v1902_v39 = vpop.f32.mrb[12].mxu0  ;;  %v1948_v40 = vpop.f32.mrb[12].mxu1 }
 0x5cf   : > { %v8848_v42 = vpop.f32.mrb[13].mxu0  ;;  %v8854_v43 = vpop.f32.mrb[13].mxu1 }
 0x5d0   : > { %v1905_v44 = vpop.f32.mrb[14].mxu0  ;;  %v1951_v26 = vpop.f32.mrb[14].mxu1 }
 0x5d1   : > { %v8849_v45 = vpop.f32.mrb[15].mxu0  ;;  %v8855_v27 = vpop.f32.mrb[15].mxu1  ;;  %v9170_v44 = vld [vmem:[%s12382_s19] sm:$0xff]   ;;  %v9171_v26 = vld [vmem:[%s12382_s19 + $0x8] sm:$0xff]  }
 0x5d2   : > { %v9172_v45 = vld [vmem:[%s9568_s1] sm:$0xff]   ;;  %8884 = vmatprep.subr.bf16.mxu0 %v9170_v44  ;;  %v9173_v27 = vld [vmem:[%s9568_s1 + $0x8] sm:$0xff]  }
 0x5f5   : > { %v2040_v46 = vpop.f32.mrb[16].mxu1 }
 0x5f6   : > { %v1994_v47 = vpop.f32.mrb[16].mxu0  ;;  %v2062_v48 = vcombine.low %v1948_v40, %v2040_v46  ;;  %v2063_v52 = vcombine.high %v1948_v40, %v2040_v46  ;;  %v8866_v49 = vpop.f32.mrb[17].mxu1  ;;  %v9174_v46 = vld [vmem:[%s9568_s1 + $0x10] sm:$0xff]  }
 0x5f7   : > { %v2046_v50 = vcombine.low %v1902_v39, %v1994_v47  ;;  %v2047_v51 = vcombine.high %v1902_v39, %v1994_v47  ;;  %v8860_v53 = vpop.f32.mrb[17].mxu0  ;;  %v2043_v54 = vpop.f32.mrb[18].mxu1  ;;  %v9175_v47 = vld [vmem:[%s9568_s1 + $0x18] sm:$0xff]   ;;  %v8559_v49 = vld [vmem:[%s12379_s16] ss:$0 sm:$0xff] }
 0x5f8   : > { %v2070_v55 = vrot.slane %v2062_v48, %v9638_v61  ;;  %v2077_v56 = vrot.slane %v2063_v52, %v9638_v61  ;;  %v1997_v58 = vpop.f32.mrb[18].mxu0  ;;  %v8867_v60 = vpop.f32.mrb[19].mxu1  ;;  %v9176_v48 = vld [vmem:[%s9568_s1 + $0x20] sm:$0xff]   ;;  %v9177_v52 = vld [vmem:[%s9568_s1 + $0x28] sm:$0xff]  }
 0x5f9   : > { %v2054_v62 = vrot.slane %v2046_v50, %v9638_v61  ;;  %v2061_v63 = vrot.slane %v2047_v51, %v9638_v61  ;;  %v8861_v2 = vpop.f32.mrb[19].mxu0  ;;  %v9178_v60 = vld [vmem:[%s9568_s1 + $0x30] sm:$0xff]  }
 0x5fb   : > { %v2078_v6 = vcombine.low %v2054_v62, %v2070_v55  ;;  %v2079_v7 = vcombine.high %v2054_v62, %v2070_v55  ;;  %v2094_v8 = vcombine.low %v2061_v63, %v2077_v56  ;;  %v2095_v9 = vcombine.high %v2061_v63, %v2077_v56  ;;  %v9179_v62 = vld [vmem:[%s9568_s1 + $0x38] sm:$0xff]   ;;  %s8679_s1 = sshll.u32 %s9332_s30, 6 }
 0x5fd   : > { %v2086_v10 = vrot.slane %v2078_v6, %v9653_v5  ;;  %v2093_v11 = vrot.slane %v2079_v7, %v9653_v5  ;;  %v2102_v12 = vrot.slane %v2094_v8, %v9653_v5  ;;  %v2109_v13 = vrot.slane %v2095_v9, %v9653_v5 }
 0x5ff   : > { %v2114_v15 = vcombine.low %v2086_v10, %v2093_v11  ;;  %v8557_v16 = vcombine.high %v2086_v10, %v2093_v11  ;;  %v2130_v20 = vcombine.low %v2102_v12, %v2109_v13  ;;  %v8558_v0 = vcombine.high %v2102_v12, %v2109_v13  ;;  %v9869_v10 = vld [vmem:[%s12383_s20] ss:$0 sm:$0xff] }
 0x601   : > { %v2121_v59 = vrot.slane %v2114_v15, %v9638_v61  ;;  %v2129_v21 = vrot.slane %v8557_v16, %v9638_v61  ;;  %v2137_v22 = vrot.slane %v2130_v20, %v9638_v61  ;;  %v2145_v23 = vrot.slane %v8558_v0, %v9638_v61  ;;  %v9180_v15 = vld [vmem:[%s12380_s17] sm:$0xff]   ;;  %v9181_v20 = vld [vmem:[%s12380_s17 + $0x8] sm:$0xff]  }
 0x602   : > { %8877 = vmatpush3.bf16.msra.mxu1 %v9180_v15 }
 0x603   : > { %v2147_v24 = vcombine.high %v2121_v59, %v2129_v21  ;;  %v2163_v25 = vcombine.high %v2137_v22, %v2145_v23  ;;  %v2146_v28 = vcombine.low %v2121_v59, %v2129_v21  ;;  %v2162_v1 = vcombine.low %v2137_v22, %v2145_v23  ;;  %8878 = vmatprep.subr.bf16.mxu1 %v12404_v18 }
 0x605   : > { %v2161_v41 = vrot.slane %v2147_v24, %v9653_v5  ;;  %v2177_v17 = vrot.slane %v2163_v25, %v9653_v5  ;;  %v2154_v19 = vrot.slane %v2146_v28, %v9653_v5  ;;  %v2170_v29 = vrot.slane %v2162_v1, %v9653_v5 }
 0x606   : > { %8879 = vmatpush3.bf16.msra.mxu1 %v9181_v20 }
 0x607   : > { %v2180_v30 = vcombine.low %v2161_v41, %v2177_v17  ;;  %v2179_v31 = vcombine.high %v2154_v19, %v2170_v29  ;;  %v2181_v32 = vcombine.high %v2161_v41, %v2177_v17  ;;  %v2178_v33 = vcombine.low %v2154_v19, %v2170_v29  ;;  %8904 = vmatprep.subr.bf16.mxu1 %v12404_v18 }
 0x609   : > { %2187 = vrot.lane.b32.xlu1 %v2180_v30, %s9351_s29  ;;  %2183 = vrot.lane.b32.xlu0 %v2179_v31, %s9352_s26 }
 0x60d   : > { %2191 = vrot.lane.b32.xlu0 %v2181_v32, %s9353_s27 }
 0x67b   : > { %v2184_v34 = vpop.permute.xlu0 %2183  ;;  %v2188_v35 = vpop.permute.xlu1 %2187 }
 0x67c   : > { %v2194_v36 = vsel %vm1622_vm2, %v2178_v33, %v2184_v34 }
 0x67d   : > { %v2196_v40 = vsel %vm2195_vm8, %v2194_v36, %v2188_v35 }
 0x67f   : > { %v2192_v39 = vpop.permute.xlu0 %2191 }
 0x680   : > { %v2198_v42 = vsel %vm2197_vm9, %v2196_v40, %v2192_v39 }
 0x681   : > { %v2199_v43 = vpack.c.bf16 %v2198_v42, %v2198_v42 }
 0x683   : > { %8873 = vmatmul.mubr.msk.bf16.vlgmr.msra.gmra.mrb[20].mxu0 %vm986_vm0, %v2199_v43 }
 0x684   : > { %8888 = vmatprep.mubr.msk.bf16.mxu0 %vm986_vm0, %v9172_v45  ;;  %8885 = vmatpush3.bf16.msra.mxu0 %v9170_v44 }
 0x685   : > { %8886 = vmatprep.subr.bf16.mxu0 %v9171_v26 }
 0x688   : > { %8887 = vmatpush3.bf16.msra.mxu0 %v9171_v26 }
 0x689   : > { %8924 = vmatprep.subr.bf16.mxu0 %v12404_v18 }
 0x68b   : > { %8889 = vmatmul.mubr.msk.bf16.vlgmr.msra.gmra.mrb[24].mxu0 %vm986_vm0, %v9173_v27 }
 0x68c   : > { %8892 = vmatprep.mubr.msk.bf16.mxu0 %vm986_vm0, %v9174_v46 }
 0x693   : > { %8893 = vmatmul.mubr.msk.bf16.gmra.mrb[28].mxu0 %vm986_vm0, %v9175_v47 }
 0x694   : > { %8896 = vmatprep.mubr.msk.bf16.mxu0 %vm986_vm0, %v9176_v48 }
 0x69b   : > { %8897 = vmatmul.mubr.msk.bf16.gmra.mrb[32].mxu0 %vm986_vm0, %v9177_v52 }
 0x69c   : > { %8900 = vmatprep.mubr.msk.bf16.mxu0 %vm986_vm0, %v9178_v60 }
 0x6a3   : > { %8901 = vmatmul.mubr.msk.bf16.gmra.mrb[36].mxu0 %vm986_vm0, %v9179_v62 }
 0x6a4   : > { %8940 = vmatprep.mubr.msk.bf16.mxu0 %vm9343_vm1, %v12404_v18 }
 0x756   : > { %v2255_v50 = vpop.f32.mrb[20].mxu0 }
 0x757   : > { %v2256_v51 = vadd.f32 %v8559_v49, %v2255_v50  ;;  %v8874_v53 = vpop.f32.mrb[21].mxu0 }
 0x758   : > { %v2258_v54 = vpop.f32.mrb[22].mxu0 }
 0x759   : > { %v9850_v55 = vadd.f32 %v2256_v51, %v9573_v3  ;;  %v8875_v56 = vpop.f32.mrb[23].mxu0 }
 0x75b   : > { %12544 = vst [vmem:[#allocation16_spill] sm:$0xff] %v9850_v55  ;;  %v2264_v58 = vsel %vm986_vm0, %v9850_v55, 0.0 }
 0x75c   : > { %2265 = vadd.xlane.f32.xlu1 %v2264_v58 }
 0x75e   : > { %v8890_v7 = vpop.f32.mrb[24].mxu0 }
 0x75f   : > { %v2480_v8 = vpop.f32.mrb[25].mxu0  ;;  %v9888_v14 = vadd.f32 %v8890_v7, %v9869_v10 }
 0x760   : > { %v8891_v9 = vpop.f32.mrb[26].mxu0  ;;  %v9875_v13 = vadd.f32 %v9869_v10, %v2480_v8 }
 0x761   : > { %v2483_v11 = vpop.f32.mrb[27].mxu0  ;;  %v9894_v16 = vadd.f32 %v8891_v9, %v9869_v10 }
 0x762   : > { %v9872_v12 = vadd.f32 %v9869_v10, %v2483_v11 }
 0x763   : > { %12545 = vst [vmem:[#allocation17_spill] sm:$0xff] %v9894_v16 }
 0x766   : > { %v8894_v0 = vpop.f32.mrb[28].mxu0 }
 0x767   : > { %v2496_v59 = vpop.f32.mrb[29].mxu0  ;;  %v9930_v17 = vadd.f32 %v8894_v0, %v9869_v10 }
 0x768   : > { %v8895_v21 = vpop.f32.mrb[30].mxu0  ;;  %v9912_v22 = vadd.f32 %v9869_v10, %v2496_v59 }
 0x769   : > { %v2499_v23 = vpop.f32.mrb[31].mxu0  ;;  %12548 = vst [vmem:[#allocation20_spill] sm:$0xff] %v9930_v17  ;;  %v9935_v19 = vadd.f32 %v8895_v21, %v9869_v10 }
 0x76a   : > { %12546 = vst [vmem:[#allocation18_spill] sm:$0xff] %v9912_v22  ;;  %v9919_v28 = vadd.f32 %v9869_v10, %v2499_v23 }
 0x76b   : > { %12549 = vst [vmem:[#allocation21_spill] sm:$0xff] %v9935_v19 }
 0x76c   : > { %12547 = vst [vmem:[#allocation19_spill] sm:$0xff] %v9919_v28 }
 0x76d   : > { %2716 = vrot.lane.b32.xlu1 %v9872_v12, %s9344_s10 }
 0x76e   : > { %v8898_v24 = vpop.f32.mrb[32].mxu0 }
 0x76f   : > { %v2512_v25 = vpop.f32.mrb[33].mxu0  ;;  %v9966_v31 = vadd.f32 %v8898_v24, %v9869_v10 }
 0x770   : > { %v8899_v1 = vpop.f32.mrb[34].mxu0  ;;  %v9948_v29 = vadd.f32 %v9869_v10, %v2512_v25 }
 0x771   : > { %2762 = vrot.lane.b32.xlu1 %v9875_v13, %s9345_s0  ;;  %v2515_v41 = vpop.f32.mrb[35].mxu0  ;;  %12552 = vst [vmem:[#allocation24_spill] sm:$0xff] %v9966_v31  ;;  %v9971_v32 = vadd.f32 %v8899_v1, %v9869_v10 }
 0x772   : > { %12550 = vst [vmem:[#allocation22_spill] sm:$0xff] %v9948_v29  ;;  %v9955_v30 = vadd.f32 %v9869_v10, %v2515_v41 }
 0x773   : > { %12553 = vst [vmem:[#allocation25_spill] sm:$0xff] %v9971_v32 }
 0x774   : > { %12551 = vst [vmem:[#allocation23_spill] sm:$0xff] %v9955_v30 }
 0x775   : > { %2810 = vrot.lane.b32.xlu1 %v9875_v13, %s9346_s7 }
 0x776   : > { %v8902_v33 = vpop.f32.mrb[36].mxu0 }
 0x777   : > { %v2528_v34 = vpop.f32.mrb[37].mxu0  ;;  %v10002_v42 = vadd.f32 %v8902_v33, %v9869_v10 }
 0x778   : > { %v8903_v35 = vpop.f32.mrb[38].mxu0  ;;  %v9984_v36 = vadd.f32 %v9869_v10, %v2528_v34 }
 0x779   : > { %2718 = vrot.lane.b32.xlu1 %v9888_v14, %s9344_s10  ;;  %v2531_v39 = vpop.f32.mrb[39].mxu0  ;;  %12556 = vst [vmem:[#allocation28_spill] sm:$0xff] %v10002_v42  ;;  %v10007_v43 = vadd.f32 %v8903_v35, %v9869_v10 }
 0x77a   : > { %12554 = vst [vmem:[#allocation26_spill] sm:$0xff] %v9984_v36  ;;  %v9991_v40 = vadd.f32 %v9869_v10, %v2531_v39 }
 0x77b   : > { %12557 = vst [vmem:[#allocation29_spill] sm:$0xff] %v10007_v43 }
 0x77c   : > { %12555 = vst [vmem:[#allocation27_spill] sm:$0xff] %v9991_v40 }
 0x77d   : > { %2766 = vrot.lane.b32.xlu1 %v9888_v14, %s9345_s0 }
 0x781   : > { %2814 = vrot.lane.b32.xlu1 %v9888_v14, %s9346_s7 }
 0x785   : > { %2722 = vrot.lane.b32.xlu1 %v9912_v22, %s9344_s10 }
 0x789   : > { %2770 = vrot.lane.b32.xlu1 %v9912_v22, %s9345_s0 }
 0x78d   : > { %2818 = vrot.lane.b32.xlu1 %v9912_v22, %s9346_s7 }
 0x791   : > { %2726 = vrot.lane.b32.xlu1 %v9930_v17, %s9344_s10 }
 0x795   : > { %2774 = vrot.lane.b32.xlu1 %v9930_v17, %s9345_s0 }
 0x799   : > { %2822 = vrot.lane.b32.xlu1 %v9930_v17, %s9346_s7 }
 0x79d   : > { %2730 = vrot.lane.b32.xlu1 %v9948_v29, %s9344_s10 }
 0x7a1   : > { %2778 = vrot.lane.b32.xlu1 %v9948_v29, %s9345_s0 }
 0x7a5   : > { %2826 = vrot.lane.b32.xlu1 %v9948_v29, %s9346_s7 }
 0x7a9   : > { %2734 = vrot.lane.b32.xlu1 %v9966_v31, %s9344_s10 }
 0x7ad   : > { %2782 = vrot.lane.b32.xlu1 %v9966_v31, %s9345_s0 }
 0x7b1   : > { %2830 = vrot.lane.b32.xlu1 %v9966_v31, %s9346_s7 }
 0x7b5   : > { %2738 = vrot.lane.b32.xlu1 %v9984_v36, %s9344_s10 }
 0x7b9   : > { %2786 = vrot.lane.b32.xlu1 %v9984_v36, %s9345_s0 }
 0x7bd   : > { %2834 = vrot.lane.b32.xlu1 %v9984_v36, %s9346_s7 }
 0x7c1   : > { %2742 = vrot.lane.b32.xlu1 %v10002_v42, %s9344_s10 }
 0x7c5   : > { %2790 = vrot.lane.b32.xlu1 %v10002_v42, %s9345_s0 }
 0x7c9   : > { %2838 = vrot.lane.b32.xlu1 %v10002_v42, %s9346_s7 }
 0x7e9   : > { %v2266_v63 = vpop.xlane.xlu1 %2265 }
 0x7ea   : > { %v2267_v2 = vmul.f32 0.03125, %v2266_v63 }
 0x7ec   : > { %v9861_v4 = vsub.f32 %v9850_v55, %v2267_v2 }
 0x7ed   : > { %v10023_v44 = vpop.permute.xlu1 %2716 }
 0x7ee   : > { %v2269_v3 = vmul.f32 %v9861_v4, %v9861_v4 }
 0x7f0   : > { %v2270_v6 = vsel %vm986_vm0, %v2269_v3, 0.0 }
 0x7f1   : > { %2271 = vadd.xlane.f32.xlu0 %v2270_v6  ;;  %v10025_v26 = vpop.permute.xlu1 %2762 }
 0x7f2   : > { %v2858_v47 = vcombine.low %v9875_v13, %v10025_v26  ;;  %v2859_v48 = vcombine.high %v9875_v13, %v10025_v26 }
 0x7f4   : > { %v2866_v51 = vrot.slane %v2858_v47, %v9638_v61  ;;  %v2873_v56 = vrot.slane %v2859_v48, %v9638_v61 }
 0x7f5   : > { %v10027_v45 = vpop.permute.xlu1 %2810 }
 0x7f9   : > { %v10035_v50 = vpop.permute.xlu1 %2718 }
 0x7fd   : > { %v10047_v63 = vpop.permute.xlu1 %2766 }
 0x7fe   : > { %v2994_v10 = vcombine.low %v9888_v14, %v10047_v63  ;;  %v2995_v11 = vcombine.high %v9888_v14, %v10047_v63 }
 0x800   : > { %v3002_v25 = vrot.slane %v2994_v10, %v9638_v61  ;;  %v3009_v1 = vrot.slane %v2995_v11, %v9638_v61 }
 0x801   : > { %v10071_v41 = vpop.permute.xlu1 %2814 }
 0x802   : > { %12559 = vst [vmem:[#allocation31_spill] sm:$0xff] %v10071_v41  ;;  %v3010_v47 = vcombine.low %v10035_v50, %v10071_v41  ;;  %v3011_v48 = vcombine.high %v10035_v50, %v10071_v41 }
 0x807   : > { %2714 = vrot.lane.b32.xlu0 %v9875_v13, %s9344_s10 }
 0x80b   : > { %2764 = vrot.lane.b32.xlu0 %v9872_v12, %s9345_s0 }
 0x80f   : > { %2812 = vrot.lane.b32.xlu0 %v9872_v12, %s9346_s7 }
 0x813   : > { %2720 = vrot.lane.b32.xlu0 %v9894_v16, %s9344_s10 }
 0x817   : > { %2768 = vrot.lane.b32.xlu0 %v9894_v16, %s9345_s0 }
 0x81b   : > { %2816 = vrot.lane.b32.xlu0 %v9894_v16, %s9346_s7 }
 0x81f   : > { %2724 = vrot.lane.b32.xlu0 %v9919_v28, %s9344_s10 }
 0x823   : > { %2772 = vrot.lane.b32.xlu0 %v9919_v28, %s9345_s0 }
 0x827   : > { %2820 = vrot.lane.b32.xlu0 %v9919_v28, %s9346_s7 }
 0x82b   : > { %2728 = vrot.lane.b32.xlu0 %v9935_v19, %s9344_s10 }
 0x82f   : > { %2776 = vrot.lane.b32.xlu0 %v9935_v19, %s9345_s0 }
 0x833   : > { %2824 = vrot.lane.b32.xlu0 %v9935_v19, %s9346_s7 }
 0x837   : > { %2732 = vrot.lane.b32.xlu0 %v9955_v30, %s9344_s10 }
 0x83b   : > { %2780 = vrot.lane.b32.xlu0 %v9955_v30, %s9345_s0 }
 0x83f   : > { %2828 = vrot.lane.b32.xlu0 %v9955_v30, %s9346_s7 }
 0x843   : > { %2736 = vrot.lane.b32.xlu0 %v9971_v32, %s9344_s10 }
 0x847   : > { %2784 = vrot.lane.b32.xlu0 %v9971_v32, %s9345_s0 }
 0x84b   : > { %2832 = vrot.lane.b32.xlu0 %v9971_v32, %s9346_s7 }
 0x84f   : > { %2740 = vrot.lane.b32.xlu0 %v9991_v40, %s9344_s10 }
 0x853   : > { %2788 = vrot.lane.b32.xlu0 %v9991_v40, %s9345_s0 }
 0x857   : > { %2836 = vrot.lane.b32.xlu0 %v9991_v40, %s9346_s7 }
 0x85b   : > { %2744 = vrot.lane.b32.xlu0 %v10007_v43, %s9344_s10 }
 0x85f   : > { %2792 = vrot.lane.b32.xlu0 %v10007_v43, %s9345_s0 }
 0x863   : > { %2840 = vrot.lane.b32.xlu0 %v10007_v43, %s9346_s7 }
 0x87e   : > { %v2272_v27 = vpop.xlane.xlu0 %2271 }
 0x87f   : > { %v2273_v46 = vmul.f32 0.03125, %v2272_v27 }
 0x881   : > { %v2274_v52 = vadd.f32 1e-06, %v2273_v46 }
 0x882   : > { %v10033_v49 = vpop.permute.xlu0 %2714 }
 0x883   : > { %9210 = vrsqrt.f32 %v2274_v52  ;;  %v2874_v53 = vcombine.low %v10033_v49, %v10027_v45  ;;  %v2875_v54 = vcombine.high %v10033_v49, %v10027_v45 }
 0x885   : > { %v2882_v58 = vrot.slane %v2874_v53, %v9638_v61  ;;  %v2889_v60 = vrot.slane %v2875_v54, %v9638_v61 }
 0x886   : > { %v10045_v62 = vpop.permute.xlu0 %2764 }
 0x887   : > { %v2926_v2 = vcombine.low %v9872_v12, %v10045_v62  ;;  %v2927_v3 = vcombine.high %v9872_v12, %v10045_v62  ;;  %v2890_v6 = vcombine.low %v2866_v51, %v2882_v58  ;;  %v2891_v7 = vcombine.high %v2866_v51, %v2882_v58  ;;  %v8563_v51 = vld [vmem:[%s12560_s3] ss:$0 sm:$0xff] }
 0x888   : > { %v2906_v8 = vcombine.low %v2873_v56, %v2889_v60  ;;  %v2907_v9 = vcombine.high %v2873_v56, %v2889_v60 }
 0x889   : > { %v2934_v15 = vrot.slane %v2926_v2, %v9638_v61  ;;  %v2941_v20 = vrot.slane %v2927_v3, %v9638_v61  ;;  %v2898_v0 = vrot.slane %v2890_v6, %v9653_v5  ;;  %v2905_v59 = vrot.slane %v2891_v7, %v9653_v5  ;;  %v10101_v7 = vpop.permute.xlu1 %2722 }
 0x88a   : > { %v10062_v21 = vrot.slane %v2906_v8, %v9653_v5  ;;  %v10065_v23 = vrot.slane %v2907_v9, %v9653_v5  ;;  %v10067_v24 = vpop.permute.xlu0 %2812  ;;  %v3018_v3 = vrot.slane %v3010_v47, %v9638_v61  ;;  %v3025_v6 = vrot.slane %v3011_v48, %v9638_v61  ;;  %12564 = vst [vmem:[#allocation35_spill] sm:$0xff] %v10101_v7  ;;  %v8564_v9 = vld [vmem:[%s12566_s28] ss:$0 sm:$0xff] }
 0x88b   : > { %12558 = vst [vmem:[#allocation30_spill] sm:$0xff] %v10067_v24  ;;  %v3946_v33 = vcombine.low %v2898_v0, %v2905_v59  ;;  %v8590_v34 = vcombine.high %v2898_v0, %v2905_v59  ;;  %v2942_v35 = vcombine.low %v10023_v44, %v10067_v24  ;;  %v2943_v39 = vcombine.high %v10023_v44, %v10067_v24 }
 0x88c   : > { %v3962_v27 = vcombine.low %v10062_v21, %v10065_v23  ;;  %v8591_v46 = vcombine.high %v10062_v21, %v10065_v23  ;;  %v3026_v21 = vcombine.low %v3002_v25, %v3018_v3  ;;  %v3027_v23 = vcombine.high %v3002_v25, %v3018_v3 }
 0x88d   : > { %v9211_v52 = vpop.eup %9210  ;;  %v2950_v53 = vrot.slane %v2942_v35, %v9638_v61  ;;  %v2957_v54 = vrot.slane %v2943_v39, %v9638_v61  ;;  %v10091_v56 = vrot.slane %v3946_v33, %v9638_v61  ;;  %v10094_v58 = vrot.slane %v8590_v34, %v9638_v61 }
 0x88e   : > { %v2276_v60 = vmul.f32 %v9211_v52, %v9861_v4  ;;  %v10097_v2 = vpop.permute.xlu0 %2720  ;;  %v10104_v8 = vrot.slane %v3962_v27, %v9638_v61  ;;  %v3042_v33 = vcombine.low %v3009_v1, %v3025_v6  ;;  %v3043_v25 = vcombine.high %v3009_v1, %v3025_v6  ;;  %v10125_v52 = vpop.permute.xlu1 %2770 }
 0x88f   : > { %12561 = vst [vmem:[#allocation32_spill] sm:$0xff] %v10091_v56  ;;  %12562 = vst [vmem:[#allocation33_spill] sm:$0xff] %v10094_v58  ;;  %v2958_v10 = vcombine.low %v2934_v15, %v2950_v53  ;;  %v2959_v11 = vcombine.high %v2934_v15, %v2950_v53  ;;  %v2974_v0 = vcombine.low %v2941_v20, %v2957_v54 }
 0x890   : > { %12563 = vst [vmem:[#allocation34_spill] sm:$0xff] %v10097_v2  ;;  %12565 = vst [vmem:[#allocation36_spill] sm:$0xff] %v10104_v8  ;;  %v2975_v59 = vcombine.high %v2941_v20, %v2957_v54  ;;  %v2283_v4 = vmul.f32 %v8563_v51, %v2276_v60  ;;  %v10120_v15 = vrot.slane %v3026_v21, %v9653_v5 }
 0x891   : > { %v2966_v34 = vrot.slane %v2958_v10, %v9653_v5  ;;  %v2973_v35 = vrot.slane %v2959_v11, %v9653_v5  ;;  %v10112_v39 = vrot.slane %v2974_v0, %v9653_v5  ;;  %v10123_v20 = vrot.slane %v3027_v23, %v9653_v5  ;;  %12568 = vst [vmem:[#allocation38_spill] sm:$0xff] %v10125_v52 }
 0x892   : > { %v10115_v27 = vrot.slane %v2975_v59, %v9653_v5  ;;  %v2290_v47 = vadd.f32 %v8564_v9, %v2283_v4  ;;  %v10117_v48 = vpop.permute.xlu0 %2768  ;;  %v10136_v11 = vrot.slane %v3042_v33, %v9653_v5  ;;  %v10139_v1 = vrot.slane %v3043_v25, %v9653_v5 }
 0x893   : > { %12567 = vst [vmem:[#allocation37_spill] sm:$0xff] %v10117_v48  ;;  %v4014_v51 = vcombine.low %v2966_v34, %v2973_v35  ;;  %v8592_v53 = vcombine.high %v2966_v34, %v2973_v35  ;;  %v3062_v9 = vcombine.low %v9894_v16, %v10117_v48  ;;  %v3063_v10 = vcombine.high %v9894_v16, %v10117_v48  ;;  %v10154_v34 = vpop.permute.xlu1 %2818 }
 0x894   : > { %v2291_v3 = vpack.c.bf16 %v2290_v47, %v2290_v47  ;;  %v3130_v59 = vcombine.low %v9912_v22, %v10125_v52  ;;  %v3131_v33 = vcombine.high %v9912_v22, %v10125_v52  ;;  %12570 = vst [vmem:[#allocation40_spill] sm:$0xff] %v10154_v34  ;;  %v10157_v35 = vrot.slane %v8591_v46, %v9638_v61 }
 0x895   : > { %v3070_v4 = vrot.slane %v3062_v9, %v9638_v61  ;;  %v3077_v21 = vrot.slane %v3063_v10, %v9638_v61  ;;  %v3146_v37 = vcombine.low %v10101_v7, %v10154_v34  ;;  %v3147_v38 = vcombine.high %v10101_v7, %v10154_v34 }
 0x896   : > { %8881 = vmatmul.mubr.msk.bf16.vlgmr.msra.gmra.mrb[20].mxu1 %vm986_vm0, %v2291_v3  ;;  %v10150_v23 = vpop.permute.xlu0 %2816  ;;  %12571 = vst [vmem:[#allocation41_spill] sm:$0xff] %v10157_v35  ;;  %v3138_v10 = vrot.slane %v3130_v59, %v9638_v61  ;;  %v3145_v46 = vrot.slane %v3131_v33, %v9638_v61  ;;  %v3978_v0 = vcombine.low %v10091_v56, %v10094_v58 }
 0x897   : > { %12569 = vst [vmem:[#allocation39_spill] sm:$0xff] %v10150_v23  ;;  %v3078_v3 = vcombine.low %v10097_v2, %v10150_v23  ;;  %v3079_v9 = vcombine.high %v10097_v2, %v10150_v23  ;;  %8920 = vmatprep.mubr.msk.bf16.mxu1 %vm9343_vm1, %v12404_v18  ;;  %v3994_v18 = vcombine.low %v10104_v8, %v10157_v35 }
 0x898   : > { %v3154_v59 = vrot.slane %v3146_v37, %v9638_v61  ;;  %v3161_v33 = vrot.slane %v3147_v38, %v9638_v61  ;;  %v10186_v60 = vrot.slane %v4014_v51, %v9638_v61  ;;  %v10189_v54 = vrot.slane %v8592_v53, %v9638_v61 }
 0x899   : > { %v3086_v25 = vrot.slane %v3078_v3, %v9638_v61  ;;  %v3093_v47 = vrot.slane %v3079_v9, %v9638_v61  ;;  %v10191_v3 = vpop.permute.xlu1 %2726 }
 0x89a   : > { %v10181_v6 = vpop.permute.xlu0 %2724  ;;  %12573 = vst [vmem:[#allocation43_spill] sm:$0xff] %v10186_v60  ;;  %12574 = vst [vmem:[#allocation44_spill] sm:$0xff] %v10189_v54  ;;  %v3162_v58 = vcombine.low %v3138_v10, %v3154_v59  ;;  %v3163_v8 = vcombine.high %v3138_v10, %v3154_v59  ;;  %v3178_v35 = vcombine.low %v3145_v46, %v3161_v33 }
 0x89b   : > { %12572 = vst [vmem:[#allocation42_spill] sm:$0xff] %v10181_v6  ;;  %12575 = vst [vmem:[#allocation45_spill] sm:$0xff] %v10191_v3  ;;  %v3094_v9 = vcombine.low %v3070_v4, %v3086_v25  ;;  %v3095_v55 = vcombine.high %v3070_v4, %v3086_v25  ;;  %v3110_v57 = vcombine.low %v3077_v21, %v3093_v47 }
 0x89c   : > { %v3111_v56 = vcombine.high %v3077_v21, %v3093_v47  ;;  %v3179_v34 = vcombine.high %v3145_v46, %v3161_v33  ;;  %v10208_v4 = vrot.slane %v3162_v58, %v9653_v5  ;;  %v10211_v21 = vrot.slane %v3163_v8, %v9653_v5 }
 0x89d   : > { %v10194_v37 = vrot.slane %v3094_v9, %v9653_v5  ;;  %v10197_v38 = vrot.slane %v3095_v55, %v9653_v5  ;;  %v10200_v51 = vrot.slane %v3110_v57, %v9653_v5  ;;  %v10214_v47 = vrot.slane %v3178_v35, %v9653_v5  ;;  %v10219_v25 = vpop.permute.xlu1 %2774 }
 0x89e   : > { %v10203_v53 = vrot.slane %v3111_v56, %v9653_v5  ;;  %v10205_v23 = vpop.permute.xlu0 %2772  ;;  %v10217_v55 = vrot.slane %v3179_v34, %v9653_v5  ;;  %12577 = vst [vmem:[#allocation47_spill] sm:$0xff] %v10219_v25  ;;  %v3986_v9 = vrot.slane %v3978_v0, %v9653_v5  ;;  %v4002_v8 = vrot.slane %v3994_v18, %v9653_v5 }
 0x89f   : > { %12576 = vst [vmem:[#allocation46_spill] sm:$0xff] %v10205_v23  ;;  %v3198_v35 = vcombine.low %v9919_v28, %v10205_v23  ;;  %v3199_v34 = vcombine.high %v9919_v28, %v10205_v23  ;;  %v12579_v46 = vcombine.low %v10112_v39, %v10115_v27  ;;  %v12581_v33 = vcombine.high %v10112_v39, %v10115_v27 }
 0x8a0   : > { %v4011_v23 = vcombine.high %v3986_v9, %v4002_v8  ;;  %v3266_v28 = vcombine.low %v9930_v17, %v10219_v25  ;;  %v3267_v39 = vcombine.high %v9930_v17, %v10219_v25 }
 0x8a1   : > { %v3206_v58 = vrot.slane %v3198_v35, %v9638_v61  ;;  %v3213_v56 = vrot.slane %v3199_v34, %v9638_v61  ;;  %v10251_v10 = vrot.slane %v12579_v46, %v9638_v61  ;;  %v10257_v59 = vrot.slane %v12581_v33, %v9638_v61  ;;  %v10271_v27 = vpop.permute.xlu1 %2822 }
 0x8a2   : > { %v10245_v57 = vpop.permute.xlu0 %2820  ;;  %v4010_v35 = vcombine.low %v3986_v9, %v4002_v8  ;;  %v4046_v34 = vcombine.low %v10186_v60, %v10189_v54  ;;  %12583 = vst [vmem:[#allocation51_spill] sm:$0xff] %v10271_v27  ;;  %v12584_v60 = vcombine.low %v10120_v15, %v10123_v20  ;;  %v10289_v54 = vrot.slane %v3267_v39, %v9638_v61 }
 0x8a3   : > { %12578 = vst [vmem:[#allocation48_spill] sm:$0xff] %v10245_v57  ;;  %12580 = vst [vmem:[#allocation49_spill] sm:$0xff] %v10251_v10  ;;  %v3214_v18 = vcombine.low %v10181_v6, %v10245_v57  ;;  %v3215_v0 = vcombine.high %v10181_v6, %v10245_v57  ;;  %v4062_v46 = vcombine.low %v10251_v10, %v10257_v59 }
 0x8a4   : > { %12582 = vst [vmem:[#allocation50_spill] sm:$0xff] %v10257_v59  ;;  %v4054_v6 = vrot.slane %v4046_v34, %v9653_v5  ;;  %v10280_v10 = vrot.slane %v12584_v60, %v9638_v61  ;;  %v10286_v59 = vrot.slane %v3266_v28, %v9638_v61  ;;  %v12589_v28 = vcombine.low %v10136_v11, %v10139_v1 }
 0x8a5   : > { %v3222_v33 = vrot.slane %v3214_v18, %v9638_v61  ;;  %v3229_v57 = vrot.slane %v3215_v0, %v9638_v61  ;;  %v4070_v8 = vrot.slane %v4062_v46, %v9653_v5  ;;  %v12587_v18 = vcombine.high %v10120_v15, %v10123_v20 }
 0x8a6   : > { %12585 = vst [vmem:[#allocation52_spill] sm:$0xff] %v10280_v10  ;;  %v10283_v9 = vpop.permute.xlu0 %2728  ;;  %v10301_v48 = vrot.slane %v12589_v28, %v9638_v61  ;;  %v12591_v39 = vcombine.high %v10136_v11, %v10139_v1 }
 0x8a7   : > { %12586 = vst [vmem:[#allocation53_spill] sm:$0xff] %v10283_v9  ;;  %v10295_v0 = vrot.slane %v12587_v18, %v9638_v61  ;;  %v3230_v34 = vcombine.low %v3206_v58, %v3222_v33  ;;  %v3231_v25 = vcombine.high %v3206_v58, %v3222_v33  ;;  %v3246_v60 = vcombine.low %v3213_v56, %v3229_v57 }
 0x8a8   : > { %v3247_v17 = vcombine.high %v3213_v56, %v3229_v57  ;;  %v4078_v52 = vcombine.low %v4054_v6, %v4070_v8  ;;  %v4079_v46 = vcombine.high %v4054_v6, %v4070_v8  ;;  %12590 = vst [vmem:[#allocation55_spill] sm:$0xff] %v10301_v48  ;;  %v10307_v7 = vrot.slane %v12591_v39, %v9638_v61  ;;  %v10327_v8 = vpop.permute.xlu1 %2730 }
 0x8a9   : > { %12588 = vst [vmem:[#allocation54_spill] sm:$0xff] %v10295_v0  ;;  %v10310_v15 = vrot.slane %v3230_v34, %v9653_v5  ;;  %v10313_v20 = vrot.slane %v3231_v25, %v9653_v5  ;;  %v10316_v6 = vrot.slane %v3246_v60, %v9653_v5  ;;  %v4114_v11 = vcombine.low %v10280_v10, %v10295_v0 }
 0x8aa   : > { %12592 = vst [vmem:[#allocation56_spill] sm:$0xff] %v10307_v7  ;;  %v10319_v57 = vrot.slane %v3247_v17, %v9653_v5  ;;  %v5034_v56 = vpack.c.bf16 %v4078_v52, %v4010_v35  ;;  %v5042_v58 = vpack.c.bf16 %v4079_v46, %v4011_v23  ;;  %v10321_v33 = vpop.permute.xlu0 %2776  ;;  %v4130_v1 = vcombine.low %v10301_v48, %v10307_v7 }
 0x8ab   : > { %12593 = vst [vmem:[#allocation57_spill] sm:$0xff] %v10321_v33  ;;  %12594 = vst [vmem:[#allocation58_spill] sm:$0xff] %v10327_v8  ;;  %v3334_v34 = vcombine.low %v9935_v19, %v10321_v33  ;;  %v3335_v60 = vcombine.high %v9935_v19, %v10321_v33  ;;  %v4122_v46 = vrot.slane %v4114_v11, %v9653_v5  ;;  %v12597_v17 = vmov 0.0  }
 0x8ac   : > { %v7470_v23 = vsel %vm1622_vm2, %v5034_v56, 0  ;;  %v7537_v35 = vsel %vm1622_vm2, %v5042_v58, 0  ;;  %v4138_v28 = vrot.slane %v4130_v1, %v9653_v5  ;;  %v12595_v39 = vcombine.low %v10194_v37, %v10197_v38  ;;  %v10383_v48 = vpop.permute.xlu1 %2778 }
 0x8ad   : > { %8905 = vmatpush3.bf16.xpose.msra.mxu1 %v7470_v23  ;;  %8925 = vmatpush3.bf16.xpose.msra.mxu0 %v7537_v35  ;;  %v3342_v56 = vrot.slane %v3334_v34, %v9638_v61  ;;  %v3349_v58 = vrot.slane %v3335_v60, %v9638_v61  ;;  %v12598_v11 = vcombine.high %v10194_v37, %v10197_v38 }
 0x8ae   : > { %v10349_v52 = vrot.slane %v12595_v39, %v9638_v61  ;;  %8906 = vmatprep.subr.bf16.mxu1 %v12597_v17  ;;  %8926 = vmatprep.subr.bf16.mxu0 %v12597_v17  ;;  %v10361_v1 = vpop.permute.xlu0 %2824  ;;  %v4146_v35 = vcombine.low %v4122_v46, %v4138_v28  ;;  %v12601_v39 = vcombine.low %v10200_v51, %v10203_v53 }
 0x8af   : > { %v10359_v23 = vrot.slane %v12598_v11, %v9638_v61  ;;  %12600 = vst [vmem:[#allocation61_spill] sm:$0xff] %v10361_v1  ;;  %v12603_v60 = vcombine.high %v10200_v51, %v10203_v53  ;;  %v4147_v25 = vcombine.high %v4122_v46, %v4138_v28  ;;  %v3282_v38 = vcombine.low %v10191_v3, %v10271_v27 }
 0x8b0   : > { %12596 = vst [vmem:[#allocation59_spill] sm:$0xff] %v10349_v52  ;;  %v10367_v34 = vrot.slane %v12601_v39, %v9638_v61  ;;  %v3283_v11 = vcombine.high %v10191_v3, %v10271_v27  ;;  %v3350_v39 = vcombine.low %v10283_v9, %v10361_v1  ;;  %12605 = vst [vmem:[#allocation64_spill] sm:$0xff] %v10383_v48 }
 0x8b1   : > { %12599 = vst [vmem:[#allocation60_spill] sm:$0xff] %v10359_v23  ;;  %v10373_v18 = vrot.slane %v12603_v60, %v9638_v61  ;;  %v4182_v37 = vcombine.low %v10349_v52, %v10359_v23  ;;  %v3351_v53 = vcombine.high %v10283_v9, %v10361_v1  ;;  %v3402_v46 = vcombine.low %v9948_v29, %v10383_v48 }
 0x8b2   : > { %12602 = vst [vmem:[#allocation62_spill] sm:$0xff] %v10367_v34  ;;  %v3403_v28 = vcombine.high %v9948_v29, %v10383_v48  ;;  %v3290_v52 = vrot.slane %v3282_v38, %v9638_v61  ;;  %v3297_v23 = vrot.slane %v3283_v11, %v9638_v61  ;;  %v3358_v7 = vrot.slane %v3350_v39, %v9638_v61  ;;  %v10397_v10 = vpop.permute.xlu0 %2732 }
 0x8b3   : > { %12604 = vst [vmem:[#allocation63_spill] sm:$0xff] %v10373_v18  ;;  %v4198_v51 = vcombine.low %v10367_v34, %v10373_v18  ;;  %v4190_v60 = vrot.slane %v4182_v37, %v9653_v5  ;;  %12606 = vst [vmem:[#allocation65_spill] sm:$0xff] %v10397_v10  ;;  %v3365_v18 = vrot.slane %v3351_v53, %v9638_v61 }
 0x8b4   : > { %v10402_v0 = vrot.slane %v3402_v46, %v9638_v61  ;;  %v10405_v1 = vrot.slane %v3403_v28, %v9638_v61  ;;  %v3298_v37 = vcombine.low %v10286_v59, %v3290_v52  ;;  %v3299_v38 = vcombine.high %v10286_v59, %v3290_v52  ;;  %v10425_v52 = vpop.permute.xlu1 %2826 }
 0x8b5   : > { %v4206_v34 = vrot.slane %v4198_v51, %v9653_v5  ;;  %v3314_v11 = vcombine.low %v10289_v54, %v3297_v23  ;;  %v3315_v39 = vcombine.high %v10289_v54, %v3297_v23  ;;  %v3366_v9 = vcombine.low %v3342_v56, %v3358_v7  ;;  %12608 = vst [vmem:[#allocation67_spill] sm:$0xff] %v10425_v52 }
 0x8b6   : > { %v3367_v51 = vcombine.high %v3342_v56, %v3358_v7  ;;  %v10412_v53 = vrot.slane %v3298_v37, %v9653_v5  ;;  %v10415_v46 = vrot.slane %v3299_v38, %v9653_v5  ;;  %v10423_v59 = vpop.permute.xlu0 %2780 }
 0x8b7   : > { %v4214_v48 = vcombine.low %v4190_v60, %v4206_v34  ;;  %v4215_v33 = vcombine.high %v4190_v60, %v4206_v34  ;;  %v10418_v28 = vrot.slane %v3314_v11, %v9653_v5  ;;  %v10421_v29 = vrot.slane %v3315_v39, %v9653_v5  ;;  %12607 = vst [vmem:[#allocation66_spill] sm:$0xff] %v10423_v59 }
 0x8b8   : > { %v10428_v7 = vrot.slane %v3366_v9, %v9653_v5  ;;  %v10431_v56 = vrot.slane %v3367_v51, %v9653_v5  ;;  %v3470_v39 = vcombine.low %v9955_v30, %v10423_v59 }
 0x8b9   : > { %v5035_v54 = vpack.c.bf16 %v4214_v48, %v4146_v35  ;;  %v5043_v23 = vpack.c.bf16 %v4215_v33, %v4147_v25  ;;  %v3382_v33 = vcombine.low %v3349_v58, %v3365_v18  ;;  %v3383_v25 = vcombine.high %v3349_v58, %v3365_v18 }
 0x8ba   : > { %v10449_v51 = vpop.permute.xlu0 %2828  ;;  %v3471_v18 = vcombine.high %v9955_v30, %v10423_v59  ;;  %v3418_v58 = vcombine.low %v10327_v8, %v10425_v52  ;;  %v12611_v59 = vcombine.low %v10208_v4, %v10211_v21 }
 0x8bb   : > { %v7473_v48 = vsel %vm1622_vm2, %v5035_v54, 0  ;;  %v7540_v9 = vsel %vm1622_vm2, %v5043_v23, 0  ;;  %12609 = vst [vmem:[#allocation68_spill] sm:$0xff] %v10449_v51  ;;  %v10452_v38 = vrot.slane %v3382_v33, %v9653_v5  ;;  %v10455_v54 = vrot.slane %v3383_v25, %v9653_v5  ;;  %v10470_v25 = vpop.permute.xlu1 %2734 }
 0x8bc   : > { %8907 = vmatpush3.bf16.xpose.msra.mxu1 %v7473_v48  ;;  %8927 = vmatpush3.bf16.xpose.msra.mxu0 %v7540_v9  ;;  %v3478_v23 = vrot.slane %v3470_v39, %v9638_v61  ;;  %v3419_v48 = vcombine.high %v10327_v8, %v10425_v52  ;;  %v3486_v9 = vcombine.low %v10397_v10, %v10449_v51 }
 0x8bd   : > { %8908 = vmatprep.subr.bf16.mxu1 %v12597_v17  ;;  %v3487_v33 = vcombine.high %v10397_v10, %v10449_v51  ;;  %8928 = vmatprep.subr.bf16.mxu0 %v12597_v17  ;;  %12610 = vst [vmem:[#allocation69_spill] sm:$0xff] %v10470_v25  ;;  %v3485_v39 = vrot.slane %v3471_v18, %v9638_v61 }
 0x8be   : > { %v3426_v37 = vrot.slane %v3418_v58, %v9638_v61  ;;  %v3433_v60 = vrot.slane %v3419_v48, %v9638_v61  ;;  %v3494_v34 = vrot.slane %v3486_v9, %v9638_v61  ;;  %v10485_v10 = vrot.slane %v12611_v59, %v9638_v61  ;;  %v10487_v11 = vpop.permute.xlu0 %2736 }
 0x8bf   : > { %v3501_v51 = vrot.slane %v3487_v33, %v9638_v61  ;;  %12613 = vst [vmem:[#allocation71_spill] sm:$0xff] %v10487_v11  ;;  %v12614_v58 = vcombine.high %v10208_v4, %v10211_v21  ;;  %v12616_v9 = vcombine.low %v10214_v47, %v10217_v55 }
 0x8c0   : > { %12612 = vst [vmem:[#allocation70_spill] sm:$0xff] %v10485_v10  ;;  %v3434_v35 = vcombine.low %v10402_v0, %v3426_v37  ;;  %v3435_v18 = vcombine.high %v10402_v0, %v3426_v37  ;;  %v3450_v59 = vcombine.low %v10405_v1, %v3433_v60  ;;  %v3451_v30 = vcombine.high %v10405_v1, %v3433_v60 }
 0x8c1   : > { %v10495_v48 = vrot.slane %v12614_v58, %v9638_v61  ;;  %v10501_v33 = vrot.slane %v12616_v9, %v9638_v61  ;;  %v3502_v52 = vcombine.low %v3478_v23, %v3494_v34  ;;  %v3503_v8 = vcombine.high %v3478_v23, %v3494_v34  ;;  %v10523_v34 = vpop.permute.xlu1 %2782 }
 0x8c2   : > { %v10506_v0 = vrot.slane %v3434_v35, %v9653_v5  ;;  %v10509_v37 = vrot.slane %v3435_v18, %v9653_v5  ;;  %v3518_v4 = vcombine.low %v3485_v39, %v3501_v51  ;;  %v3519_v21 = vcombine.high %v3485_v39, %v3501_v51  ;;  %12618 = vst [vmem:[#allocation74_spill] sm:$0xff] %v10523_v34  ;;  %v10543_v18 = vpop.permute.xlu0 %2784 }
 0x8c3   : > { %12615 = vst [vmem:[#allocation72_spill] sm:$0xff] %v10495_v48  ;;  %12617 = vst [vmem:[#allocation73_spill] sm:$0xff] %v10501_v33  ;;  %v10512_v58 = vrot.slane %v3450_v59, %v9653_v5  ;;  %v10515_v9 = vrot.slane %v3451_v30, %v9653_v5  ;;  %v10518_v19 = vrot.slane %v3502_v52, %v9653_v5 }
 0x8c4   : > { %v10521_v1 = vrot.slane %v3503_v8, %v9653_v5  ;;  %v10530_v51 = vrot.slane %v3518_v4, %v9653_v5  ;;  %v10533_v30 = vrot.slane %v3519_v21, %v9653_v5  ;;  %12619 = vst [vmem:[#allocation75_spill] sm:$0xff] %v10543_v18  ;;  %v12620_v21 = vcombine.high %v10214_v47, %v10217_v55 }
 0x8c5   : > { %v4250_v23 = vcombine.low %v10485_v10, %v10495_v48  ;;  %v12622_v39 = vcombine.low %v10310_v15, %v10313_v20  ;;  %v12624_v59 = vcombine.high %v10310_v15, %v10313_v20  ;;  %v12626_v47 = vcombine.low %v10316_v6, %v10319_v57 }
 0x8c6   : > { %v10553_v52 = vrot.slane %v12620_v21, %v9638_v61  ;;  %v12628_v21 = vcombine.high %v10316_v6, %v10319_v57  ;;  %v3538_v15 = vcombine.low %v9966_v31, %v10523_v34  ;;  %v3539_v20 = vcombine.high %v9966_v31, %v10523_v34 }
 0x8c7   : > { %v10561_v8 = vrot.slane %v12622_v39, %v9638_v61  ;;  %v10567_v4 = vrot.slane %v12624_v59, %v9638_v61  ;;  %v10573_v55 = vrot.slane %v12626_v47, %v9638_v61  ;;  %v4258_v39 = vrot.slane %v4250_v23, %v9653_v5  ;;  %v10596_v23 = vpop.permute.xlu1 %2830 }
 0x8c8   : > { %12621 = vst [vmem:[#allocation76_spill] sm:$0xff] %v10553_v52  ;;  %v10579_v35 = vrot.slane %v12628_v21, %v9638_v61  ;;  %v4266_v60 = vcombine.low %v10501_v33, %v10553_v52  ;;  %v3606_v6 = vcombine.low %v9971_v32, %v10543_v18  ;;  %v3607_v57 = vcombine.high %v9971_v32, %v10543_v18 }
 0x8c9   : > { %12623 = vst [vmem:[#allocation77_spill] sm:$0xff] %v10561_v8  ;;  %12625 = vst [vmem:[#allocation78_spill] sm:$0xff] %v10567_v4  ;;  %v4318_v59 = vcombine.low %v10561_v8, %v10567_v4  ;;  %v3546_v33 = vrot.slane %v3538_v15, %v9638_v61  ;;  %v3553_v52 = vrot.slane %v3539_v20, %v9638_v61 }
 0x8ca   : > { %12627 = vst [vmem:[#allocation79_spill] sm:$0xff] %v10573_v55  ;;  %12629 = vst [vmem:[#allocation80_spill] sm:$0xff] %v10579_v35  ;;  %v4334_v47 = vcombine.low %v10573_v55, %v10579_v35  ;;  %v4274_v21 = vrot.slane %v4266_v60, %v9653_v5  ;;  %v12631_v8 = vcombine.low %v10412_v53, %v10415_v46  ;;  %v10615_v60 = vpop.permute.xlu0 %2832 }
 0x8cb   : > { %12630 = vst [vmem:[#allocation81_spill] sm:$0xff] %v10596_v23  ;;  %v4326_v55 = vrot.slane %v4318_v59, %v9653_v5  ;;  %v10610_v10 = vrot.slane %v3606_v6, %v9638_v61  ;;  %v10613_v48 = vrot.slane %v3607_v57, %v9638_v61  ;;  %12633 = vst [vmem:[#allocation83_spill] sm:$0xff] %v10615_v60 }
 0x8cc   : > { %v10605_v4 = vrot.slane %v12631_v8, %v9638_v61  ;;  %v4342_v35 = vrot.slane %v4334_v47, %v9653_v5  ;;  %v4282_v15 = vcombine.low %v4258_v39, %v4274_v21  ;;  %v4283_v20 = vcombine.high %v4258_v39, %v4274_v21 }
 0x8cd   : > { %v12634_v18 = vcombine.high %v10412_v53, %v10415_v46  ;;  %v12636_v59 = vcombine.low %v10418_v28, %v10421_v29  ;;  %v12638_v57 = vcombine.high %v10418_v28, %v10421_v29  ;;  %v12640_v53 = vcombine.low %v10428_v7, %v10431_v56 }
 0x8ce   : > { %12632 = vst [vmem:[#allocation82_spill] sm:$0xff] %v10605_v4  ;;  %v4350_v6 = vcombine.low %v4326_v55, %v4342_v35  ;;  %v4351_v32 = vcombine.high %v4326_v55, %v4342_v35  ;;  %v12642_v39 = vcombine.high %v10428_v7, %v10431_v56  ;;  %v12644_v29 = vcombine.low %v10452_v38, %v10455_v54  ;;  %v10665_v56 = vpop.permute.xlu1 %2738 }
 0x8cf   : > { %v10621_v8 = vrot.slane %v12634_v18, %v9638_v61  ;;  %v10627_v47 = vrot.slane %v12636_v59, %v9638_v61  ;;  %v10633_v34 = vrot.slane %v12638_v57, %v9638_v61  ;;  %v10639_v46 = vrot.slane %v12640_v53, %v9638_v61  ;;  %12648 = vst [vmem:[#allocation91_spill] sm:$0xff] %v10665_v56 }
 0x8d0   : > { %v10647_v35 = vrot.slane %v12642_v39, %v9638_v61  ;;  %v10653_v28 = vrot.slane %v12644_v29, %v9638_v61  ;;  %v12646_v55 = vcombine.high %v10452_v38, %v10455_v54  ;;  %v5036_v59 = vpack.c.bf16 %v4350_v6, %v4282_v15 }
 0x8d1   : > { %12635 = vst [vmem:[#allocation84_spill] sm:$0xff] %v10621_v8  ;;  %12637 = vst [vmem:[#allocation85_spill] sm:$0xff] %v10627_v47  ;;  %v4386_v18 = vcombine.low %v10605_v4, %v10621_v8  ;;  %v5044_v57 = vpack.c.bf16 %v4351_v32, %v4283_v20  ;;  %v4402_v53 = vcombine.low %v10627_v47, %v10633_v34 }
 0x8d2   : > { %12639 = vst [vmem:[#allocation86_spill] sm:$0xff] %v10633_v34  ;;  %12641 = vst [vmem:[#allocation87_spill] sm:$0xff] %v10639_v46  ;;  %v10659_v21 = vrot.slane %v12646_v55, %v9638_v61  ;;  %v3554_v7 = vcombine.low %v10470_v25, %v10596_v23  ;;  %v4454_v29 = vcombine.low %v10639_v46, %v10647_v35  ;;  %v7476_v32 = vsel %vm1622_vm2, %v5036_v59, 0  ;;  %v10678_v55 = vpop.permute.xlu0 %2740 }
 0x8d3   : > { %12643 = vst [vmem:[#allocation88_spill] sm:$0xff] %v10647_v35  ;;  %12645 = vst [vmem:[#allocation89_spill] sm:$0xff] %v10653_v28  ;;  %v4394_v39 = vrot.slane %v4386_v18, %v9653_v5  ;;  %v3555_v54 = vcombine.high %v10470_v25, %v10596_v23  ;;  %v7543_v15 = vsel %vm1622_vm2, %v5044_v57, 0  ;;  %v4410_v20 = vrot.slane %v4402_v53, %v9653_v5 }
 0x8d4   : > { %12647 = vst [vmem:[#allocation90_spill] sm:$0xff] %v10659_v21  ;;  %v4470_v38 = vcombine.low %v10653_v28, %v10659_v21  ;;  %v3562_v6 = vrot.slane %v3554_v7, %v9638_v61  ;;  %12649 = vst [vmem:[#allocation92_spill] sm:$0xff] %v10678_v55  ;;  %8909 = vmatpush3.bf16.xpose.msra.mxu1 %v7476_v32  ;;  %8929 = vmatpush3.bf16.xpose.msra.mxu0 %v7543_v15 }
 0x8d5   : > { %v4462_v18 = vrot.slane %v4454_v29, %v9653_v5  ;;  %v3569_v28 = vrot.slane %v3555_v54, %v9638_v61  ;;  %8910 = vmatprep.subr.bf16.mxu1 %v12597_v17  ;;  %8930 = vmatprep.subr.bf16.mxu0 %v12597_v17  ;;  %v4418_v59 = vcombine.low %v4394_v39, %v4410_v20  ;;  %v10692_v54 = vpop.permute.xlu1 %2786 }
 0x8d6   : > { %v4478_v46 = vrot.slane %v4470_v38, %v9653_v5  ;;  %v4419_v57 = vcombine.high %v4394_v39, %v4410_v20  ;;  %v3570_v21 = vcombine.low %v3546_v33, %v3562_v6  ;;  %v3571_v7 = vcombine.high %v3546_v33, %v3562_v6  ;;  %12650 = vst [vmem:[#allocation93_spill] sm:$0xff] %v10692_v54  ;;  %v10707_v20 = vpop.permute.xlu0 %2788 }
 0x8d7   : > { %v3586_v47 = vcombine.low %v3553_v52, %v3569_v28  ;;  %v3587_v15 = vcombine.high %v3553_v52, %v3569_v28  ;;  %v3622_v29 = vcombine.low %v10487_v11, %v10615_v60  ;;  %v3623_v38 = vcombine.high %v10487_v11, %v10615_v60  ;;  %12651 = vst [vmem:[#allocation94_spill] sm:$0xff] %v10707_v20 }
 0x8d8   : > { %v4486_v53 = vcombine.low %v4462_v18, %v4478_v46  ;;  %v4487_v35 = vcombine.high %v4462_v18, %v4478_v46  ;;  %v10686_v32 = vrot.slane %v3570_v21, %v9653_v5  ;;  %v10695_v39 = vrot.slane %v3571_v7, %v9653_v5 }
 0x8d9   : > { %v10698_v33 = vrot.slane %v3586_v47, %v9653_v5  ;;  %v10701_v46 = vrot.slane %v3587_v15, %v9653_v5  ;;  %v3630_v52 = vrot.slane %v3622_v29, %v9638_v61  ;;  %v3637_v28 = vrot.slane %v3623_v38, %v9638_v61 }
 0x8da   : > { %v5037_v34 = vpack.c.bf16 %v4486_v53, %v4418_v59  ;;  %v5045_v4 = vpack.c.bf16 %v4487_v35, %v4419_v57  ;;  %v3674_v21 = vcombine.low %v9984_v36, %v10692_v54  ;;  %v3675_v15 = vcombine.high %v9984_v36, %v10692_v54 }
 0x8db   : > { %v3638_v53 = vcombine.low %v10610_v10, %v3630_v52  ;;  %v3639_v7 = vcombine.high %v10610_v10, %v3630_v52  ;;  %v3742_v10 = vcombine.low %v9991_v40, %v10707_v20  ;;  %v10734_v52 = vpop.permute.xlu1 %2834 }
 0x8dc   : > { %v7479_v35 = vsel %vm1622_vm2, %v5037_v34, 0  ;;  %v7546_v6 = vsel %vm1622_vm2, %v5045_v4, 0  ;;  %v3654_v34 = vcombine.low %v10613_v48, %v3637_v28  ;;  %v3655_v4 = vcombine.high %v10613_v48, %v3637_v28  ;;  %12652 = vst [vmem:[#allocation95_spill] sm:$0xff] %v10734_v52 }
 0x8dd   : > { %8911 = vmatpush3.bf16.xpose.msra.mxu1 %v7479_v35  ;;  %8931 = vmatpush3.bf16.xpose.msra.mxu0 %v7546_v6  ;;  %v10726_v29 = vrot.slane %v3638_v53, %v9653_v5  ;;  %v10729_v38 = vrot.slane %v3639_v7, %v9653_v5  ;;  %v3682_v57 = vrot.slane %v3674_v21, %v9638_v61 }
 0x8de   : > { %8912 = vmatprep.subr.bf16.mxu1 %v12597_v17  ;;  %v10738_v48 = vrot.slane %v3654_v34, %v9653_v5  ;;  %v10741_v28 = vrot.slane %v3655_v4, %v9653_v5  ;;  %v3689_v35 = vrot.slane %v3675_v15, %v9638_v61  ;;  %v3743_v6 = vcombine.high %v9991_v40, %v10707_v20  ;;  %v10754_v4 = vpop.permute.xlu0 %2836 }
 0x8df   : > { %8932 = vmatprep.subr.bf16.mxu0 %v12597_v17  ;;  %v3750_v7 = vrot.slane %v3742_v10, %v9638_v61  ;;  %v3690_v34 = vcombine.low %v10665_v56, %v10734_v52  ;;  %12653 = vst [vmem:[#allocation96_spill] sm:$0xff] %v10754_v4  ;;  %v3691_v21 = vcombine.high %v10665_v56, %v10734_v52 }
 0x8e0   : > { %v3757_v18 = vrot.slane %v3743_v6, %v9638_v61  ;;  %v3758_v10 = vcombine.low %v10678_v55, %v10754_v4  ;;  %v3759_v47 = vcombine.high %v10678_v55, %v10754_v4  ;;  %v12654_v15 = vcombine.low %v10506_v0, %v10509_v37 }
 0x8e1   : > { %v3698_v53 = vrot.slane %v3690_v34, %v9638_v61  ;;  %v3705_v59 = vrot.slane %v3691_v21, %v9638_v61  ;;  %v12655_v6 = vcombine.high %v10506_v0, %v10509_v37  ;;  %v12656_v34 = vcombine.low %v10512_v58, %v10515_v9  ;;  %v10795_v37 = vpop.permute.xlu1 %2742 }
 0x8e2   : > { %v10772_v20 = vrot.slane %v12654_v15, %v9638_v61  ;;  %v12657_v4 = vcombine.high %v10512_v58, %v10515_v9  ;;  %v3766_v52 = vrot.slane %v3758_v10, %v9638_v61  ;;  %v3773_v0 = vrot.slane %v3759_v47, %v9638_v61  ;;  %12658 = vst [vmem:[#allocation97_spill] sm:$0xff] %v10795_v37 }
 0x8e3   : > { %v10779_v8 = vrot.slane %v12655_v6, %v9638_v61  ;;  %v10785_v40 = vrot.slane %v12656_v34, %v9638_v61  ;;  %v3706_v55 = vcombine.low %v3682_v57, %v3698_v53  ;;  %v3707_v21 = vcombine.high %v3682_v57, %v3698_v53 }
 0x8e4   : > { %v10791_v15 = vrot.slane %v12657_v4, %v9638_v61  ;;  %v3722_v6 = vcombine.low %v3689_v35, %v3705_v59  ;;  %v3723_v60 = vcombine.high %v3689_v35, %v3705_v59  ;;  %v3774_v57 = vcombine.low %v3750_v7, %v3766_v52  ;;  %v10807_v4 = vpop.permute.xlu0 %2744 }
 0x8e5   : > { %v4522_v34 = vcombine.low %v10772_v20, %v10779_v8  ;;  %v10802_v58 = vrot.slane %v3706_v55, %v9653_v5  ;;  %v10805_v9 = vrot.slane %v3707_v21, %v9653_v5  ;;  %v3775_v53 = vcombine.high %v3750_v7, %v3766_v52  ;;  %12659 = vst [vmem:[#allocation98_spill] sm:$0xff] %v10807_v4  ;;  %v10841_v7 = vpop.permute.xlu1 %2790 }
 0x8e6   : > { %v4538_v54 = vcombine.low %v10785_v40, %v10791_v15  ;;  %v10810_v47 = vrot.slane %v3722_v6, %v9653_v5  ;;  %v10813_v59 = vrot.slane %v3723_v60, %v9653_v5  ;;  %v3790_v35 = vcombine.low %v3757_v18, %v3773_v0  ;;  %12660 = vst [vmem:[#allocation99_spill] sm:$0xff] %v10841_v7 }
 0x8e7   : > { %v3791_v10 = vcombine.high %v3757_v18, %v3773_v0  ;;  %v10820_v21 = vrot.slane %v3774_v57, %v9653_v5  ;;  %v10823_v52 = vrot.slane %v3775_v53, %v9653_v5  ;;  %v4530_v53 = vrot.slane %v4522_v34, %v9653_v5 }
 0x8e8   : > { %v10830_v18 = vrot.slane %v3790_v35, %v9653_v5  ;;  %v4546_v55 = vrot.slane %v4538_v54, %v9653_v5  ;;  %v12662_v34 = vcombine.high %v10518_v19, %v10521_v1  ;;  %v12663_v60 = vcombine.low %v10530_v51, %v10533_v30  ;;  %v10871_v36 = vpop.permute.xlu0 %2792 }
 0x8e9   : > { %v10833_v0 = vrot.slane %v3791_v10, %v9653_v5  ;;  %v12661_v10 = vcombine.low %v10518_v19, %v10521_v1  ;;  %v12664_v35 = vcombine.high %v10530_v51, %v10533_v30  ;;  %12665 = vst [vmem:[#allocation100_spill] sm:$0xff] %v10871_v36  ;;  %v3810_v1 = vcombine.low %v10002_v42, %v10841_v7 }
 0x8ea   : > { %v10857_v57 = vrot.slane %v12662_v34, %v9638_v61  ;;  %v4554_v54 = vcombine.low %v4530_v53, %v4546_v55  ;;  %v10863_v56 = vrot.slane %v12663_v60, %v9638_v61  ;;  %v3811_v34 = vcombine.high %v10002_v42, %v10841_v7 }
 0x8eb   : > { %v10851_v6 = vrot.slane %v12661_v10, %v9638_v61  ;;  %v10869_v11 = vrot.slane %v12664_v35, %v9638_v61  ;;  %v4555_v10 = vcombine.high %v4530_v53, %v4546_v55  ;;  %v3878_v60 = vcombine.low %v10007_v43, %v10871_v36 }
 0x8ec   : > { %v3879_v30 = vcombine.high %v10007_v43, %v10871_v36  ;;  %v12666_v55 = vcombine.low %v10686_v32, %v10695_v39  ;;  %v12667_v35 = vcombine.high %v10686_v32, %v10695_v39  ;;  %v3818_v23 = vrot.slane %v3810_v1, %v9638_v61 }
 0x8ed   : > { %v4590_v19 = vcombine.low %v10851_v6, %v10857_v57  ;;  %v4606_v51 = vcombine.low %v10863_v56, %v10869_v11  ;;  %v3825_v25 = vrot.slane %v3811_v34, %v9638_v61  ;;  %v10901_v36 = vrot.slane %v3878_v60, %v9638_v61  ;;  %v10919_v34 = vpop.permute.xlu1 %2838 }
 0x8ee   : > { %v10889_v53 = vrot.slane %v12666_v55, %v9638_v61  ;;  %v10895_v7 = vrot.slane %v12667_v35, %v9638_v61  ;;  %v10905_v55 = vrot.slane %v3879_v30, %v9638_v61  ;;  %v12668_v32 = vcombine.low %v10698_v33, %v10701_v46  ;;  %12670 = vst [vmem:[#allocation101_spill] sm:$0xff] %v10919_v34 }
 0x8ef   : > { %v4598_v42 = vrot.slane %v4590_v19, %v9653_v5  ;;  %v4614_v43 = vrot.slane %v4606_v51, %v9653_v5  ;;  %v12669_v19 = vcombine.high %v10698_v33, %v10701_v46  ;;  %v12671_v51 = vcombine.low %v10726_v29, %v10729_v38 }
 0x8f0   : > { %v10911_v39 = vrot.slane %v12668_v32, %v9638_v61  ;;  %v4658_v60 = vcombine.low %v10889_v53, %v10895_v7  ;;  %v12672_v35 = vcombine.high %v10726_v29, %v10729_v38  ;;  %v12673_v33 = vcombine.low %v10738_v48, %v10741_v28  ;;  %v10949_v29 = vpop.permute.xlu0 %2840 }
 0x8f1   : > { %v10917_v1 = vrot.slane %v12669_v19, %v9638_v61  ;;  %v10927_v30 = vrot.slane %v12671_v51, %v9638_v61  ;;  %v4622_v19 = vcombine.low %v4598_v42, %v4614_v43  ;;  %v4623_v31 = vcombine.high %v4598_v42, %v4614_v43  ;;  %12675 = vst [vmem:[#allocation102_spill] sm:$0xff] %v10949_v29 }
 0x8f2   : > { %v10933_v32 = vrot.slane %v12672_v35, %v9638_v61  ;;  %v10939_v46 = vrot.slane %v12673_v33, %v9638_v61  ;;  %v12674_v51 = vcombine.high %v10738_v48, %v10741_v28  ;;  %v4666_v38 = vrot.slane %v4658_v60, %v9653_v5 }
 0x8f3   : > { %v4674_v27 = vcombine.low %v10911_v39, %v10917_v1  ;;  %v3826_v33 = vcombine.low %v10795_v37, %v10919_v34  ;;  %v3827_v42 = vcombine.high %v10795_v37, %v10919_v34  ;;  %v5038_v43 = vpack.c.bf16 %v4622_v19, %v4554_v54 }
 0x8f4   : > { %v10947_v3 = vrot.slane %v12674_v51, %v9638_v61  ;;  %v4726_v35 = vcombine.low %v10927_v30, %v10933_v32  ;;  %v5046_v2 = vpack.c.bf16 %v4623_v31, %v4555_v10  ;;  %v3894_v16 = vcombine.low %v10807_v4, %v10949_v29 }
 0x8f5   : > { %v4682_v22 = vrot.slane %v4674_v27, %v9653_v5  ;;  %v3834_v60 = vrot.slane %v3826_v33, %v9638_v61  ;;  %v3841_v51 = vrot.slane %v3827_v42, %v9638_v61  ;;  %v7482_v41 = vsel %vm1622_vm2, %v5038_v43, 0 }
 0x8f6   : > { %v4742_v48 = vcombine.low %v10939_v46, %v10947_v3  ;;  %v4734_v28 = vrot.slane %v4726_v35, %v9653_v5  ;;  %v7549_v34 = vsel %vm1622_vm2, %v5046_v2, 0  ;;  %8913 = vmatpush3.bf16.xpose.msra.mxu1 %v7482_v41 }
 0x8f7   : > { %v4690_v54 = vcombine.low %v4666_v38, %v4682_v22  ;;  %8933 = vmatpush3.bf16.xpose.msra.mxu0 %v7549_v34  ;;  %v4691_v27 = vcombine.high %v4666_v38, %v4682_v22  ;;  %v3842_v10 = vcombine.low %v3818_v23, %v3834_v60  ;;  %v3843_v19 = vcombine.high %v3818_v23, %v3834_v60 }
 0x8f8   : > { %v4750_v31 = vrot.slane %v4742_v48, %v9653_v5  ;;  %8914 = vmatprep.subr.bf16.mxu1 %v12597_v17  ;;  %8934 = vmatprep.subr.bf16.mxu0 %v12597_v17  ;;  %v3858_v42 = vcombine.low %v3825_v25, %v3841_v51  ;;  %v3859_v2 = vcombine.high %v3825_v25, %v3841_v51 }
 0x8f9   : > { %v3850_v37 = vrot.slane %v3842_v10, %v9653_v5  ;;  %v3857_v43 = vrot.slane %v3843_v19, %v9653_v5  ;;  %v3895_v48 = vcombine.high %v10807_v4, %v10949_v29  ;;  %v3902_v23 = vrot.slane %v3894_v16, %v9638_v61 }
 0x8fa   : > { %v4758_v35 = vcombine.low %v4734_v28, %v4750_v31  ;;  %v4759_v33 = vcombine.high %v4734_v28, %v4750_v31  ;;  %v3866_v22 = vrot.slane %v3858_v42, %v9653_v5  ;;  %v3873_v38 = vrot.slane %v3859_v2, %v9653_v5 }
 0x8fb   : > { %v4898_v60 = vcombine.low %v3850_v37, %v3857_v43  ;;  %v8618_v24 = vcombine.high %v3850_v37, %v3857_v43  ;;  %v3909_v28 = vrot.slane %v3895_v48, %v9638_v61  ;;  %v3910_v25 = vcombine.low %v10901_v36, %v3902_v23 }
 0x8fc   : > { %v5039_v41 = vpack.c.bf16 %v4758_v35, %v4690_v54  ;;  %v5047_v34 = vpack.c.bf16 %v4759_v33, %v4691_v27  ;;  %v3911_v51 = vcombine.high %v10901_v36, %v3902_v23  ;;  %v4914_v54 = vcombine.low %v3866_v22, %v3873_v38 }
 0x8fd   : > { %v8619_v27 = vcombine.high %v3866_v22, %v3873_v38  ;;  %v3926_v19 = vcombine.low %v10905_v55, %v3909_v28  ;;  %v3927_v16 = vcombine.high %v10905_v55, %v3909_v28  ;;  %v3918_v35 = vrot.slane %v3910_v25, %v9653_v5 }
 0x8fe   : > { %v7485_v31 = vsel %vm1622_vm2, %v5039_v41, 0  ;;  %v7552_v10 = vsel %vm1622_vm2, %v5047_v34, 0  ;;  %v3925_v37 = vrot.slane %v3911_v51, %v9653_v5  ;;  %v12676_v33 = vcombine.low %v10802_v58, %v10805_v9 }
 0x8ff   : > { %v12677_v36 = vcombine.high %v10802_v58, %v10805_v9  ;;  %8915 = vmatpush3.bf16.xpose.msra.mxu1 %v7485_v31  ;;  %8935 = vmatpush3.bf16.xpose.msra.mxu0 %v7552_v10  ;;  %v3934_v55 = vrot.slane %v3926_v19, %v9653_v5  ;;  %v3941_v2 = vrot.slane %v3927_v16, %v9653_v5 }
 0x900   : > { %v10991_v42 = vrot.slane %v12676_v33, %v9638_v61  ;;  %v12678_v48 = vcombine.low %v10810_v47, %v10813_v59  ;;  %v4966_v34 = vcombine.low %v3918_v35, %v3925_v37  ;;  %v8620_v22 = vcombine.high %v3918_v35, %v3925_v37  ;;  %8916 = vmatprep.subr.bf16.mxu1 %v12597_v17 }
 0x901   : > { %v10997_v43 = vrot.slane %v12677_v36, %v9638_v61  ;;  %8936 = vmatprep.subr.bf16.mxu0 %v12597_v17  ;;  %v12679_v58 = vcombine.high %v10810_v47, %v10813_v59  ;;  %v4982_v23 = vcombine.low %v3934_v55, %v3941_v2  ;;  %v8621_v38 = vcombine.high %v3934_v55, %v3941_v2 }
 0x902   : > { %v11005_v41 = vrot.slane %v12678_v48, %v9638_v61  ;;  %v12680_v31 = vcombine.low %v10820_v21, %v10823_v52  ;;  %v12681_v47 = vcombine.high %v10820_v21, %v10823_v52  ;;  %v12682_v51 = vcombine.low %v10830_v18, %v10833_v0 }
 0x903   : > { %v11013_v9 = vrot.slane %v12679_v58, %v9638_v61  ;;  %v4794_v28 = vcombine.low %v10991_v42, %v10997_v43  ;;  %v12683_v16 = vcombine.high %v10830_v18, %v10833_v0  ;;  %v11045_v33 = vrot.slane %v4898_v60, %v9638_v61 }
 0x904   : > { %v11021_v10 = vrot.slane %v12680_v31, %v9638_v61  ;;  %v11029_v59 = vrot.slane %v12681_v47, %v9638_v61  ;;  %v11035_v19 = vrot.slane %v12682_v51, %v9638_v61  ;;  %v11048_v21 = vrot.slane %v8618_v24, %v9638_v61 }
 0x905   : > { %v4810_v25 = vcombine.low %v11005_v41, %v11013_v9  ;;  %v11041_v35 = vrot.slane %v12683_v16, %v9638_v61  ;;  %v4802_v37 = vrot.slane %v4794_v28, %v9653_v5  ;;  %v11051_v52 = vrot.slane %v4914_v54, %v9638_v61 }
 0x906   : > { %v4862_v55 = vcombine.low %v11021_v10, %v11029_v59  ;;  %v11059_v0 = vrot.slane %v8619_v27, %v9638_v61  ;;  %v4930_v60 = vcombine.low %v11045_v33, %v11048_v21  ;;  %v11064_v24 = vrot.slane %v4966_v34, %v9638_v61 }
 0x907   : > { %v4818_v36 = vrot.slane %v4810_v25, %v9653_v5  ;;  %v4878_v18 = vcombine.low %v11035_v19, %v11041_v35  ;;  %v11067_v54 = vrot.slane %v8620_v22, %v9638_v61  ;;  %v11070_v2 = vrot.slane %v4982_v23, %v9638_v61 }
 0x908   : > { %v4870_v58 = vrot.slane %v4862_v55, %v9653_v5  ;;  %v4938_v27 = vrot.slane %v4930_v60, %v9653_v5  ;;  %v4946_v25 = vcombine.low %v11051_v52, %v11059_v0  ;;  %v11078_v34 = vrot.slane %v8621_v38, %v9638_v61 }
 0x909   : > { %v4826_v48 = vcombine.low %v4802_v37, %v4818_v36  ;;  %v4886_v28 = vrot.slane %v4878_v18, %v9653_v5  ;;  %v4827_v31 = vcombine.high %v4802_v37, %v4818_v36  ;;  %v4998_v22 = vcombine.low %v11064_v24, %v11067_v54 }
 0x90a   : > { %v4954_v51 = vrot.slane %v4946_v25, %v9653_v5  ;;  %v5014_v37 = vcombine.low %v11070_v2, %v11078_v34 }
 0x90b   : > { %v4894_v47 = vcombine.low %v4870_v58, %v4886_v28  ;;  %v4895_v23 = vcombine.high %v4870_v58, %v4886_v28  ;;  %v5006_v16 = vrot.slane %v4998_v22, %v9653_v5 }
 0x90c   : > { %v4962_v18 = vcombine.low %v4938_v27, %v4954_v51  ;;  %v5022_v60 = vrot.slane %v5014_v37, %v9653_v5  ;;  %v4963_v29 = vcombine.high %v4938_v27, %v4954_v51  ;;  %v4539_v27 = vcombine.high %v10785_v40, %v10791_v15 }
 0x90d   : > { %v5040_v36 = vpack.c.bf16 %v4894_v47, %v4826_v48  ;;  %v5048_v55 = vpack.c.bf16 %v4895_v23, %v4827_v31  ;;  %v4591_v23 = vcombine.high %v10851_v6, %v10857_v57  ;;  %v4607_v51 = vcombine.high %v10863_v56, %v10869_v11 }
 0x90e   : > { %v5030_v58 = vcombine.low %v5006_v16, %v5022_v60  ;;  %v5031_v28 = vcombine.high %v5006_v16, %v5022_v60  ;;  %v4727_v6 = vcombine.high %v10927_v30, %v10933_v32  ;;  %v4743_v11 = vcombine.high %v10939_v46, %v10947_v3 }
 0x90f   : > { %v7488_v38 = vsel %vm1622_vm2, %v5040_v36, 0  ;;  %v7555_v4 = vsel %vm1622_vm2, %v5048_v55, 0  ;;  %v4659_v36 = vcombine.high %v10889_v53, %v10895_v7  ;;  %v4605_v40 = vrot.slane %v4591_v23, %v9653_v5 }
 0x910   : > { %8917 = vmatpush3.bf16.xpose.msra.mxu1 %v7488_v38  ;;  %8937 = vmatpush3.bf16.xpose.msra.mxu0 %v7555_v4  ;;  %v5041_v25 = vpack.c.bf16 %v5030_v58, %v4962_v18  ;;  %v5049_v22 = vpack.c.bf16 %v5031_v28, %v4963_v29  ;;  %v4523_v4 = vcombine.high %v10772_v20, %v10779_v8 }
 0x911   : > { %8918 = vmatprep.subr.bf16.mxu1 %v12597_v17  ;;  %8938 = vmatprep.subr.bf16.mxu0 %v12597_v17  ;;  %v4553_v29 = vrot.slane %v4539_v27, %v9653_v5  ;;  %v4675_v8 = vcombine.high %v10911_v39, %v10917_v1  ;;  %v4621_v20 = vrot.slane %v4607_v51, %v9653_v5 }
 0x912   : > { %v7491_v48 = vsel %vm1622_vm2, %v5041_v25, 0  ;;  %v7558_v31 = vsel %vm1622_vm2, %v5049_v22, 0  ;;  %v4537_v47 = vrot.slane %v4523_v4, %v9653_v5  ;;  %v4673_v15 = vrot.slane %v4659_v36, %v9653_v5 }
 0x913   : > { %v4689_v55 = vrot.slane %v4675_v8, %v9653_v5  ;;  %v4624_v56 = vcombine.low %v4605_v40, %v4621_v20  ;;  %v4625_v57 = vcombine.high %v4605_v40, %v4621_v20  ;;  %v4741_v53 = vrot.slane %v4727_v6, %v9653_v5  ;;  %v12696_v6 = vld [vmem:[#allocation42_spill] sm:$0xff] }
 0x914   : > { %v4556_v16 = vcombine.low %v4537_v47, %v4553_v29  ;;  %v4557_v37 = vcombine.high %v4537_v47, %v4553_v29  ;;  %v4757_v39 = vrot.slane %v4743_v11, %v9653_v5  ;;  %v4795_v38 = vcombine.high %v10991_v42, %v10997_v43  ;;  %v12697_v11 = vld [vmem:[#allocation45_spill] sm:$0xff] }
 0x915   : > { %v4692_v7 = vcombine.low %v4673_v15, %v4689_v55  ;;  %v4693_v1 = vcombine.high %v4673_v15, %v4689_v55  ;;  %v4811_v30 = vcombine.high %v11005_v41, %v11013_v9  ;;  %v4863_v46 = vcombine.high %v11021_v10, %v11029_v59  ;;  %v12694_v15 = vld [vmem:[#allocation19_spill] sm:$0xff]  ;;  %v12695_v55 = vld [vmem:[#allocation20_spill] sm:$0xff] }
 0x916   : > { %v11119_v18 = vpack.c.bf16 %v4624_v56, %v4556_v16  ;;  %v11121_v60 = vpack.c.bf16 %v4625_v57, %v4557_v37  ;;  %v4760_v32 = vcombine.low %v4741_v53, %v4757_v39  ;;  %v4761_v3 = vcombine.high %v4741_v53, %v4757_v39  ;;  %v12698_v56 = vld [vmem:[#allocation46_spill] sm:$0xff]  ;;  %v12699_v57 = vld [vmem:[#allocation47_spill] sm:$0xff]  ;;  %v12702_v39 = vld [vmem:[#allocation21_spill] sm:$0xff] }
 0x917   : > { %v4879_v58 = vcombine.high %v11035_v19, %v11041_v35  ;;  %v4809_v28 = vrot.slane %v4795_v38, %v9653_v5  ;;  %v4825_v25 = vrot.slane %v4811_v30, %v9653_v5  ;;  %v4877_v42 = vrot.slane %v4863_v46, %v9653_v5  ;;  %v12701_v53 = vld [vmem:[#allocation51_spill] sm:$0xff]  ;;  %v12704_v38 = vld [vmem:[#allocation53_spill] sm:$0xff]  ;;  %v12705_v30 = vld [vmem:[#allocation58_spill] sm:$0xff] }
 0x918   : > { %8919 = vmatpush3.bf16.xpose.msra.mxu1 %v7491_v48  ;;  %8939 = vmatpush3.bf16.xpose.msra.mxu0 %v7558_v31  ;;  %v11133_v22 = vpack.c.bf16 %v4760_v32, %v4692_v7  ;;  %v11135_v48 = vpack.c.bf16 %v4761_v3, %v4693_v1  ;;  %v4931_v10 = vcombine.high %v11045_v33, %v11048_v21  ;;  %v12700_v7 = vld [vmem:[#allocation48_spill] sm:$0xff]  ;;  %v12703_v1 = vld [vmem:[#allocation22_spill] sm:$0xff]  ;;  %v12706_v32 = vld [vmem:[#allocation57_spill] sm:$0xff] }
 0x919   : > { %8944 = vmatprep.subr.bf16.mxu1 %v12597_v17  ;;  %8964 = vmatprep.subr.bf16.mxu0 %v12597_v17  ;;  %v4893_v43 = vrot.slane %v4879_v58, %v9653_v5  ;;  %v4828_v41 = vcombine.low %v4809_v28, %v4825_v25  ;;  %v4829_v9 = vcombine.high %v4809_v28, %v4825_v25  ;;  %v12707_v3 = vld [vmem:[#allocation64_spill] sm:$0xff]  ;;  %v12708_v46 = vld [vmem:[#allocation61_spill] sm:$0xff]  ;;  %v12709_v58 = vld [vmem:[#allocation67_spill] sm:$0xff] }
 0x91a   : > { %v4947_v59 = vcombine.high %v11051_v52, %v11059_v0  ;;  %v4945_v31 = vrot.slane %v4931_v10, %v9653_v5  ;;  %v4999_v27 = vcombine.high %v11064_v24, %v11067_v54  ;;  %v5015_v47 = vcombine.high %v11070_v2, %v11078_v34  ;;  %v8565_v24 = vld [vmem:[%s12381_s18] ss:$0 sm:$0xff]  ;;  %v12710_v28 = vld [vmem:[#allocation23_spill] sm:$0xff] }
 0x91b   : > { %v4896_v19 = vcombine.low %v4877_v42, %v4893_v43  ;;  %v4897_v35 = vcombine.high %v4877_v42, %v4893_v43  ;;  %v12711_v25 = vld [vmem:[#allocation24_spill] sm:$0xff]  ;;  %v12712_v42 = vld [vmem:[#allocation65_spill] sm:$0xff] }
 0x91c   : > { %v4961_v4 = vrot.slane %v4947_v59, %v9653_v5  ;;  %v5013_v21 = vrot.slane %v4999_v27, %v9653_v5  ;;  %v5029_v52 = vrot.slane %v5015_v47, %v9653_v5  ;;  %v12713_v43 = vld [vmem:[#allocation69_spill] sm:$0xff]  ;;  %v12716_v10 = vld [vmem:[#allocation68_spill] sm:$0xff]  ;;  %v12722_v27 = vld [vmem:[#allocation75_spill] sm:$0xff] }
 0x91d   : > { %v11149_v29 = vpack.c.bf16 %v4896_v19, %v4828_v41  ;;  %v11151_v23 = vpack.c.bf16 %v4897_v35, %v4829_v9  ;;  %v12714_v41 = vld [vmem:[#allocation66_spill] sm:$0xff]  ;;  %v12717_v59 = vld [vmem:[#allocation81_spill] sm:$0xff] }
 0x91e   : > { %v4964_v33 = vcombine.low %v4945_v31, %v4961_v4  ;;  %v4965_v0 = vcombine.high %v4945_v31, %v4961_v4  ;;  %v5032_v51 = vcombine.low %v5013_v21, %v5029_v52  ;;  %v5033_v16 = vcombine.high %v5013_v21, %v5029_v52  ;;  %v12715_v9 = vld [vmem:[#allocation74_spill] sm:$0xff]  ;;  %v12718_v19 = vld [vmem:[#allocation25_spill] sm:$0xff]  ;;  %v12720_v31 = vld [vmem:[#allocation71_spill] sm:$0xff] }
 0x91f   : > { %v12719_v35 = vld [vmem:[#allocation26_spill] sm:$0xff]  ;;  %v12721_v4 = vld [vmem:[#allocation91_spill] sm:$0xff]  ;;  %v12723_v47 = vld [vmem:[#allocation33_spill] sm:$0xff] }
 0x920   : > { %v11155_v37 = vpack.c.bf16 %v5032_v51, %v4964_v33  ;;  %v11157_v36 = vpack.c.bf16 %v5033_v16, %v4965_v0  ;;  %v12724_v33 = vld [vmem:[#allocation32_spill] sm:$0xff]  ;;  %v12725_v52 = vld [vmem:[#allocation93_spill] sm:$0xff]  ;;  %v12726_v0 = vld [vmem:[#allocation83_spill] sm:$0xff] }
 0x921   : > { %v3979_v21 = vcombine.high %v12724_v33, %v12723_v47  ;;  %v12727_v51 = vld [vmem:[#allocation41_spill] sm:$0xff]  ;;  %v12728_v16 = vld [vmem:[#allocation36_spill] sm:$0xff]  ;;  %v12756_v47 = vld [vmem:[#allocation87_spill] sm:$0xff] }
 0x969   : > { %v2352_v54 = vpop.f32.mrb[20].mxu1 }
 0x96a   : > { %v2353_v2 = vadd.f32 %v8565_v24, %v2352_v54  ;;  %v8882_v34 = vpop.f32.mrb[21].mxu1  ;;  %v3995_v24 = vcombine.high %v12728_v16, %v12727_v51  ;;  %v12729_v54 = vld [vmem:[#allocation44_spill] sm:$0xff] }
 0x96b   : > { %v2355_v8 = vpop.f32.mrb[22].mxu1 }
 0x96c   : > { %v11162_v40 = vmul.f32 0.35355338, %v2353_v2  ;;  %v8883_v20 = vpop.f32.mrb[23].mxu1  ;;  %v12730_v2 = vld [vmem:[#allocation43_spill] sm:$0xff]  ;;  %v12731_v8 = vld [vmem:[#allocation50_spill] sm:$0xff] }
 0x96d   : > { %v4047_v34 = vcombine.high %v12730_v2, %v12729_v54  ;;  %v12732_v20 = vld [vmem:[#allocation49_spill] sm:$0xff]  ;;  %v12759_v2 = vld [vmem:[#allocation28_spill] sm:$0xff] }
 0x96e   : > { %2549 = vrot.lane.b32.xlu1 %v11162_v40, %s9344_s10  ;;  %2552 = vrot.lane.b32.xlu0 %v11162_v40, %s9345_s0 }
 0x972   : > { %2555 = vrot.lane.b32.xlu1 %v11162_v40, %s9346_s7  ;;  %5066 = vrot.lane.b32.xlu0 %v9875_v13, %s9350_s8  ;;  %v12685_v13 = vld [vmem:[#allocation31_spill] sm:$0xff]  ;;  %s12781_s7 = sld [smem:[#allocation107_spill]] }
 0x976   : > { %5068 = vrot.lane.b32.xlu1 %v9872_v12, %s9350_s8  ;;  %5130 = vrot.lane.b32.xlu0 %v10025_v26, %s9350_s8  ;;  %v12684_v12 = vld [vmem:[#allocation30_spill] sm:$0xff] }
 0x977   : > { %v12688_v26 = vld [vmem:[#allocation34_spill] sm:$0xff] }
 0x978   : > { %s943_s3 = scalar_lea.vmem %s12781_s7, %s9558_s4  ;;  %s12071_s4 = sand.u32 1, %s9324_s5  }
 0x979   : > { %s8348_s0 = scalar_lea.sflag [#allocation5], %s12071_s4 }
 0x97a   : > { %5162 = vrot.lane.b32.xlu0 %v10027_v45, %s9350_s8  ;;  %5098 = vrot.lane.b32.xlu1 %v10033_v49, %s9350_s8  ;;  %v12689_v45 = vld [vmem:[#allocation35_spill] sm:$0xff]  ;;  %v12690_v49 = vld [vmem:[#allocation37_spill] sm:$0xff] }
 0x97e   : > { %5070 = vrot.lane.b32.xlu0 %v9888_v14, %s9350_s8  ;;  %5100 = vrot.lane.b32.xlu1 %v10023_v44, %s9350_s8  ;;  %v12686_v14 = vld [vmem:[#allocation17_spill] sm:$0xff]  ;;  %v12687_v44 = vld [vmem:[#allocation18_spill] sm:$0xff] }
 0x982   : > { %5102 = vrot.lane.b32.xlu0 %v10035_v50, %s9350_s8  ;;  %5132 = vrot.lane.b32.xlu1 %v10045_v62, %s9350_s8  ;;  %v12691_v50 = vld [vmem:[#allocation38_spill] sm:$0xff]  ;;  %v12692_v62 = vld [vmem:[#allocation39_spill] sm:$0xff] }
 0x986   : > { %5134 = vrot.lane.b32.xlu0 %v10047_v63, %s9350_s8  ;;  %5164 = vrot.lane.b32.xlu1 %v12684_v12, %s9350_s8  ;;  %v12693_v63 = vld [vmem:[#allocation40_spill] sm:$0xff]  ;;  %v4063_v12 = vcombine.high %v12732_v20, %v12731_v8 }
 0x98a   : > { %5166 = vrot.lane.b32.xlu0 %v12685_v13, %s9350_s8  ;;  %5072 = vrot.lane.b32.xlu1 %v12686_v14, %s9350_s8  ;;  %v12733_v13 = vld [vmem:[#allocation54_spill] sm:$0xff]  ;;  %v12734_v14 = vld [vmem:[#allocation52_spill] sm:$0xff] }
 0x98e   : > { %5074 = vrot.lane.b32.xlu0 %v12687_v44, %s9350_s8  ;;  %5104 = vrot.lane.b32.xlu1 %v12688_v26, %s9350_s8  ;;  %v4115_v44 = vcombine.high %v12734_v14, %v12733_v13  ;;  %v3993_v26 = vrot.slane %v3979_v21, %v9653_v5  ;;  %v12757_v21 = vld [vmem:[#allocation90_spill] sm:$0xff] }
 0x992   : > { %5106 = vrot.lane.b32.xlu0 %v12689_v45, %s9350_s8  ;;  %5136 = vrot.lane.b32.xlu1 %v12690_v49, %s9350_s8  ;;  %v12735_v45 = vld [vmem:[#allocation56_spill] sm:$0xff]  ;;  %v12736_v49 = vld [vmem:[#allocation55_spill] sm:$0xff] }
 0x996   : > { %5138 = vrot.lane.b32.xlu0 %v12691_v50, %s9350_s8  ;;  %5168 = vrot.lane.b32.xlu1 %v12692_v62, %s9350_s8  ;;  %v4131_v50 = vcombine.high %v12736_v49, %v12735_v45  ;;  %v12737_v62 = vld [vmem:[#allocation60_spill] sm:$0xff] }
 0x998   : > { %v4145_v51 = vrot.slane %v4131_v50, %v9653_v5 }
 0x99a   : > { %5170 = vrot.lane.b32.xlu0 %v12693_v63, %s9350_s8  ;;  %5076 = vrot.lane.b32.xlu1 %v12694_v15, %s9350_s8  ;;  %v12738_v63 = vld [vmem:[#allocation59_spill] sm:$0xff] }
 0x99b   : > { %v4183_v15 = vcombine.high %v12738_v63, %v12737_v62 }
 0x99d   : > { %v4197_v16 = vrot.slane %v4183_v15, %v9653_v5 }
 0x99e   : > { %5078 = vrot.lane.b32.xlu0 %v12695_v55, %s9350_s8  ;;  %5108 = vrot.lane.b32.xlu1 %v12696_v6, %s9350_s8  ;;  %v12739_v55 = vld [vmem:[#allocation63_spill] sm:$0xff]  ;;  %v12740_v6 = vld [vmem:[#allocation62_spill] sm:$0xff] }
 0x9a2   : > { %5110 = vrot.lane.b32.xlu0 %v12697_v11, %s9350_s8  ;;  %5140 = vrot.lane.b32.xlu1 %v12698_v56, %s9350_s8  ;;  %v4199_v11 = vcombine.high %v12740_v6, %v12739_v55  ;;  %v12741_v56 = vld [vmem:[#allocation72_spill] sm:$0xff] }
 0x9a6   : > { %5142 = vrot.lane.b32.xlu0 %v12699_v57, %s9350_s8  ;;  %5172 = vrot.lane.b32.xlu1 %v12700_v7, %s9350_s8  ;;  %v12742_v57 = vld [vmem:[#allocation70_spill] sm:$0xff] }
 0x9a7   : > { %v4251_v7 = vcombine.high %v12742_v57, %v12741_v56  ;;  %v12761_v57 = vld [vmem:[#allocation97_spill] sm:$0xff] }
 0x9a9   : > { %v4265_v54 = vrot.slane %v4251_v7, %v9653_v5  ;;  %v12762_v7 = vld [vmem:[#allocation94_spill] sm:$0xff] }
 0x9aa   : > { %5174 = vrot.lane.b32.xlu0 %v12701_v53, %s9350_s8  ;;  %5080 = vrot.lane.b32.xlu1 %v12702_v39, %s9350_s8  ;;  %v12743_v53 = vld [vmem:[#allocation95_spill] sm:$0xff] }
 0x9ab   : > { %v12744_v39 = vld [vmem:[#allocation27_spill] sm:$0xff] }
 0x9ae   : > { %5082 = vrot.lane.b32.xlu0 %v12703_v1, %s9350_s8  ;;  %5112 = vrot.lane.b32.xlu1 %v12704_v38, %s9350_s8  ;;  %v12745_v1 = vld [vmem:[#allocation76_spill] sm:$0xff]  ;;  %v12746_v38 = vld [vmem:[#allocation73_spill] sm:$0xff] }
 0x9b2   : > { %5114 = vrot.lane.b32.xlu0 %v12705_v30, %s9350_s8  ;;  %5144 = vrot.lane.b32.xlu1 %v12706_v32, %s9350_s8  ;;  %v4267_v30 = vcombine.high %v12746_v38, %v12745_v1  ;;  %v12747_v32 = vld [vmem:[#allocation78_spill] sm:$0xff] }
 0x9b4   : > { %v4281_v8 = vrot.slane %v4267_v30, %v9653_v5 }
 0x9b6   : > { %5146 = vrot.lane.b32.xlu0 %v12707_v3, %s9350_s8  ;;  %5176 = vrot.lane.b32.xlu1 %v12708_v46, %s9350_s8  ;;  %v12748_v3 = vld [vmem:[#allocation77_spill] sm:$0xff] }
 0x9b7   : > { %v4319_v46 = vcombine.high %v12748_v3, %v12747_v32 }
 0x9b9   : > { %v4333_v20 = vrot.slane %v4319_v46, %v9653_v5 }
 0x9ba   : > { %5178 = vrot.lane.b32.xlu0 %v12709_v58, %s9350_s8  ;;  %5084 = vrot.lane.b32.xlu1 %v12710_v28, %s9350_s8  ;;  %v12749_v58 = vld [vmem:[#allocation80_spill] sm:$0xff]  ;;  %v12750_v28 = vld [vmem:[#allocation79_spill] sm:$0xff] }
 0x9be   : > { %5086 = vrot.lane.b32.xlu0 %v12711_v25, %s9350_s8  ;;  %5116 = vrot.lane.b32.xlu1 %v12712_v42, %s9350_s8  ;;  %v4335_v25 = vcombine.high %v12750_v28, %v12749_v58  ;;  %v4009_v42 = vrot.slane %v3995_v24, %v9653_v5  ;;  %v4213_v24 = vrot.slane %v4199_v11, %v9653_v5 }
 0x9bf   : > { %v4285_v58 = vcombine.high %v4265_v54, %v4281_v8 }
 0x9c0   : > { %v4012_v13 = vcombine.low %v3993_v26, %v4009_v42  ;;  %v4216_v11 = vcombine.low %v4197_v16, %v4213_v24 }
 0x9c2   : > { %5118 = vrot.lane.b32.xlu0 %v12713_v43, %s9350_s8  ;;  %5148 = vrot.lane.b32.xlu1 %v12714_v41, %s9350_s8  ;;  %v4061_v43 = vrot.slane %v4047_v34, %v9653_v5  ;;  %v4077_v41 = vrot.slane %v4063_v12, %v9653_v5  ;;  %v12760_v34 = vld [vmem:[#allocation92_spill] sm:$0xff]  ;;  %v4349_v12 = vrot.slane %v4335_v25, %v9653_v5 }
 0x9c4   : > { %v4080_v14 = vcombine.low %v4061_v43, %v4077_v41  ;;  %v4081_v45 = vcombine.high %v4061_v43, %v4077_v41  ;;  %v4353_v28 = vcombine.high %v4333_v20, %v4349_v12 }
 0x9c6   : > { %5150 = vrot.lane.b32.xlu0 %v12715_v9, %s9350_s8  ;;  %5180 = vrot.lane.b32.xlu1 %v12716_v10, %s9350_s8  ;;  %v4129_v9 = vrot.slane %v4115_v44, %v9653_v5  ;;  %v12751_v10 = vld [vmem:[#allocation84_spill] sm:$0xff]  ;;  %v4013_v44 = vcombine.high %v3993_v26, %v4009_v42  ;;  %v4217_v26 = vcombine.high %v4197_v16, %v4213_v24 }
 0x9c7   : > { %v5050_v30 = vpack.c.bf16 %v4080_v14, %v4012_v13 }
 0x9c8   : > { %v4148_v6 = vcombine.low %v4129_v9, %v4145_v51  ;;  %v4149_v56 = vcombine.high %v4129_v9, %v4145_v51  ;;  %v5058_v32 = vpack.c.bf16 %v4081_v45, %v4013_v44  ;;  %v5060_v51 = vpack.c.bf16 %v4353_v28, %v4285_v58 }
 0x9ca   : > { %5182 = vrot.lane.b32.xlu0 %v12717_v59, %s9350_s8  ;;  %5088 = vrot.lane.b32.xlu1 %v12718_v19, %s9350_s8  ;;  %v12752_v59 = vld [vmem:[#allocation82_spill] sm:$0xff]  ;;  %v5051_v9 = vpack.c.bf16 %v4216_v11, %v4148_v6  ;;  %v11364_v6 = vsel %vm1622_vm2, %v5060_v51, 0 }
 0x9cb   : > { %v4387_v19 = vcombine.high %v12752_v59, %v12751_v10  ;;  %v12763_v10 = vld [vmem:[#allocation96_spill] sm:$0xff]  ;;  %v5059_v59 = vpack.c.bf16 %v4217_v26, %v4149_v56 }
 0x9cd   : > { %v4401_v62 = vrot.slane %v4387_v19, %v9653_v5 }
 0x9ce   : > { %5090 = vrot.lane.b32.xlu0 %v12719_v35, %s9350_s8  ;;  %5120 = vrot.lane.b32.xlu1 %v12720_v31, %s9350_s8  ;;  %v12753_v35 = vld [vmem:[#allocation86_spill] sm:$0xff]  ;;  %v12754_v31 = vld [vmem:[#allocation85_spill] sm:$0xff] }
 0x9d2   : > { %5122 = vrot.lane.b32.xlu0 %v12721_v4, %s9350_s8  ;;  %5152 = vrot.lane.b32.xlu1 %v12722_v27, %s9350_s8  ;;  %v4403_v4 = vcombine.high %v12754_v31, %v12753_v35  ;;  %v12755_v27 = vld [vmem:[#allocation88_spill] sm:$0xff] }
 0x9d3   : > { %v4455_v33 = vcombine.high %v12756_v47, %v12755_v27 }
 0x9d4   : > { %v4417_v63 = vrot.slane %v4403_v4, %v9653_v5 }
 0x9d5   : > { %v4469_v15 = vrot.slane %v4455_v33, %v9653_v5 }
 0x9d6   : > { %5154 = vrot.lane.b32.xlu0 %v12725_v52, %s9350_s8  ;;  %5184 = vrot.lane.b32.xlu1 %v12726_v0, %s9350_s8  ;;  %v12758_v52 = vld [vmem:[#allocation89_spill] sm:$0xff]  ;;  %v4420_v25 = vcombine.low %v4401_v62, %v4417_v63  ;;  %v4421_v35 = vcombine.high %v4401_v62, %v4417_v63 }
 0x9d7   : > { %v4471_v0 = vcombine.high %v12758_v52, %v12757_v21  ;;  %v11343_v52 = vsel %vm1622_vm2, %v5050_v30, 0 }
 0x9d9   : > { %v4485_v55 = vrot.slane %v4471_v0, %v9653_v5  ;;  %v11346_v0 = vsel %vm1622_vm2, %v5058_v32, 0 }
 0x9da   : > { %5186 = vrot.lane.b32.xlu0 %v12743_v53, %s9350_s8  ;;  %5092 = vrot.lane.b32.xlu1 %v12744_v39, %s9350_s8  ;;  %v4284_v53 = vcombine.low %v4265_v54, %v4281_v8  ;;  %v4352_v39 = vcombine.low %v4333_v20, %v4349_v12  ;;  %v12764_v8 = vld [vmem:[#allocation29_spill] sm:$0xff]  ;;  %v11351_v20 = vsel %vm1622_vm2, %v5051_v9, 0  ;;  %v11354_v12 = vsel %vm1622_vm2, %v5059_v59, 0 }
 0x9db   : > { %v4488_v42 = vcombine.low %v4469_v15, %v4485_v55  ;;  %v4489_v31 = vcombine.high %v4469_v15, %v4485_v55 }
 0x9dc   : > { %v5052_v19 = vpack.c.bf16 %v4352_v39, %v4284_v53 }
 0x9dd   : > { %v5053_v16 = vpack.c.bf16 %v4488_v42, %v4420_v25  ;;  %v5061_v14 = vpack.c.bf16 %v4489_v31, %v4421_v35 }
 0x9de   : > { %5094 = vrot.lane.b32.xlu0 %v12759_v2, %s9350_s8  ;;  %5124 = vrot.lane.b32.xlu1 %v12760_v34, %s9350_s8  ;;  %v11357_v13 = vsel %vm1622_vm2, %v5052_v19, 0 }
 0x9df   : > { %v11367_v11 = vsel %vm1622_vm2, %v5053_v16, 0 }
 0x9e0   : > { %v2550_v49 = vpop.permute.xlu1 %2549  ;;  %v2553_v50 = vpop.permute.xlu0 %2552 }
 0x9e1   : > { %v2558_v1 = vcombine.low %v11162_v40, %v2553_v50  ;;  %v2559_v38 = vcombine.high %v11162_v40, %v2553_v50 }
 0x9e2   : > { %5126 = vrot.lane.b32.xlu0 %v12761_v57, %s9350_s8  ;;  %5156 = vrot.lane.b32.xlu1 %v12762_v7, %s9350_s8 }
 0x9e3   : > { %v2566_v40 = vrot.slane %v2558_v1, %v9638_v61  ;;  %v2573_v4 = vrot.slane %v2559_v38, %v9638_v61  ;;  %v11370_v1 = vsel %vm1622_vm2, %v5061_v14, 0  ;;  %v11374_v38 = vsel %vm1622_vm2, %v11119_v18, 0 }
 0x9e4   : > { %v2556_v3 = vpop.permute.xlu1 %2555  ;;  %v5067_v46 = vpop.permute.xlu0 %5066 }
 0x9e5   : > { %v2574_v43 = vcombine.low %v2550_v49, %v2556_v3  ;;  %v2575_v41 = vcombine.high %v2550_v49, %v2556_v3 }
 0x9e6   : > { %5188 = vrot.lane.b32.xlu1 %v12763_v10, %s9350_s8 }
 0x9e7   : > { %v2582_v27 = vrot.slane %v2574_v43, %v9638_v61  ;;  %v2589_v47 = vrot.slane %v2575_v41, %v9638_v61 }
 0x9e8   : > { %v11340_v33 = vpop.permute.xlu1 %5068  ;;  %v5131_v21 = vpop.permute.xlu0 %5130 }
 0x9e9   : > { %v2590_v24 = vcombine.low %v2566_v40, %v2582_v27  ;;  %v2591_v54 = vcombine.high %v2566_v40, %v2582_v27  ;;  %v2606_v2 = vcombine.low %v2573_v4, %v2589_v47  ;;  %v2607_v34 = vcombine.high %v2573_v4, %v2589_v47 }
 0x9ea   : > { %5096 = vrot.lane.b32.xlu1 %v12764_v8, %s9350_s8  ;;  %v5258_v62 = vcombine.low %v5067_v46, %v5131_v21  ;;  %v5259_v63 = vcombine.high %v5067_v46, %v5131_v21  ;;  %v11388_v47 = vsel %vm1622_vm2, %v11121_v60, 0 }
 0x9eb   : > { %v2598_v44 = vrot.slane %v2590_v24, %v9653_v5  ;;  %v2605_v45 = vrot.slane %v2591_v54, %v9653_v5  ;;  %v2614_v49 = vrot.slane %v2606_v2, %v9653_v5  ;;  %v2621_v50 = vrot.slane %v2607_v34, %v9653_v5 }
 0x9ec   : > { %v5099_v15 = vpop.permute.xlu1 %5098  ;;  %v5163_v55 = vpop.permute.xlu0 %5162  ;;  %v5266_v58 = vrot.slane %v5258_v62, %v9638_v61  ;;  %v5273_v28 = vrot.slane %v5259_v63, %v9638_v61 }
 0x9ed   : > { %v2626_v56 = vcombine.low %v2598_v44, %v2605_v45  ;;  %v8588_v57 = vcombine.high %v2598_v44, %v2605_v45  ;;  %v2642_v7 = vcombine.low %v2614_v49, %v2621_v50  ;;  %v8589_v26 = vcombine.high %v2614_v49, %v2621_v50 }
 0x9ee   : > { %v5274_v53 = vcombine.low %v5099_v15, %v5163_v55  ;;  %v5275_v39 = vcombine.high %v5099_v15, %v5163_v55 }
 0x9ef   : > { %v2633_v30 = vrot.slane %v2626_v56, %v9638_v61  ;;  %v2641_v32 = vrot.slane %v8588_v57, %v9638_v61  ;;  %v2649_v3 = vrot.slane %v2642_v7, %v9638_v61  ;;  %v2657_v46 = vrot.slane %v8589_v26, %v9638_v61 }
 0x9f0   : > { %v5282_v25 = vrot.slane %v5274_v53, %v9638_v61  ;;  %v5289_v42 = vrot.slane %v5275_v39, %v9638_v61  ;;  %v5101_v43 = vpop.permute.xlu1 %5100  ;;  %v5071_v41 = vpop.permute.xlu0 %5070  ;;  %v11400_v56 = vsel %vm1622_vm2, %v11133_v22, 0 }
 0x9f1   : > { %v2658_v18 = vcombine.low %v2633_v30, %v2641_v32  ;;  %v2659_v9 = vcombine.high %v2633_v30, %v2641_v32  ;;  %v2674_v10 = vcombine.low %v2649_v3, %v2657_v46  ;;  %v2675_v59 = vcombine.high %v2649_v3, %v2657_v46 }
 0x9f2   : > { %v5290_v19 = vcombine.low %v5266_v58, %v5282_v25  ;;  %v5291_v35 = vcombine.high %v5266_v58, %v5282_v25  ;;  %v5306_v31 = vcombine.low %v5273_v28, %v5289_v42  ;;  %v5307_v40 = vcombine.high %v5273_v28, %v5289_v42 }
 0x9f3   : > { %v2666_v4 = vrot.slane %v2658_v18, %v9653_v5  ;;  %v2682_v27 = vrot.slane %v2674_v10, %v9653_v5  ;;  %v2673_v21 = vrot.slane %v2659_v9, %v9653_v5  ;;  %v2689_v45 = vrot.slane %v2675_v59, %v9653_v5 }
 0x9f4   : > { %v5298_v51 = vrot.slane %v5290_v19, %v9653_v5  ;;  %v5305_v16 = vrot.slane %v5291_v35, %v9653_v5  ;;  %v5314_v24 = vrot.slane %v5306_v31, %v9653_v5  ;;  %v5321_v54 = vrot.slane %v5307_v40, %v9653_v5  ;;  %v5133_v2 = vpop.permute.xlu1 %5132  ;;  %v5103_v34 = vpop.permute.xlu0 %5102 }
 0x9f5   : > { %v5326_v8 = vcombine.low %v11340_v33, %v5133_v2  ;;  %v2690_v14 = vcombine.low %v2666_v4, %v2682_v27  ;;  %v2691_v44 = vcombine.high %v2666_v4, %v2682_v27  ;;  %v5327_v63 = vcombine.high %v11340_v33, %v5133_v2 }
 0x9f6   : > { %v6346_v60 = vcombine.low %v5298_v51, %v5305_v16  ;;  %v8622_v49 = vcombine.high %v5298_v51, %v5305_v16  ;;  %v6362_v50 = vcombine.low %v5314_v24, %v5321_v54  ;;  %v8623_v62 = vcombine.high %v5314_v24, %v5321_v54 }
 0x9f7   : > { %v2694_v15 = vpack.c.bf16 %v2690_v14, %v2690_v14  ;;  %v2695_v55 = vpack.c.bf16 %v2691_v44, %v2691_v44  ;;  %v5334_v53 = vrot.slane %v5326_v8, %v9638_v61  ;;  %v11420_v58 = vsel %vm1622_vm2, %v11135_v48, 0 }
 0x9f8   : > { %v11403_v57 = vrot.slane %v6346_v60, %v9638_v61  ;;  %v11406_v7 = vrot.slane %v8622_v49, %v9638_v61  ;;  %v11409_v26 = vrot.slane %v6362_v50, %v9638_v61  ;;  %v5165_v39 = vpop.permute.xlu1 %5164  ;;  %v5135_v30 = vpop.permute.xlu0 %5134  ;;  %v11414_v22 = vrot.slane %v8623_v62, %v9638_v61 }
 0x9f9   : > { %v5342_v33 = vcombine.low %v5101_v43, %v5165_v39  ;;  %v5343_v32 = vcombine.high %v5101_v43, %v5165_v39  ;;  %v5394_v3 = vcombine.low %v5071_v41, %v5135_v30  ;;  %v5395_v46 = vcombine.high %v5071_v41, %v5135_v30  ;;  %8921 = vmatmul.mubr.msk.bf16.vlgmr.msra.gmra.mrb[24].mxu1 %vm1622_vm2, %v2694_v15 }
 0x9fa   : > { %8941 = vmatmul.mubr.msk.bf16.vlgmr.msra.gmra.mrb[40].mxu0 %vm1622_vm2, %v2695_v55  ;;  %8945 = vmatpush3.bf16.xpose.msra.mxu1 %v11343_v52  ;;  %v11422_v28 = vcombine.low %v2673_v21, %v2689_v45  ;;  %v11424_v25 = vcombine.high %v2673_v21, %v2689_v45  ;;  %v5341_v42 = vrot.slane %v5327_v63, %v9638_v61  ;;  %v11440_v59 = vsel %vm1622_vm2, %v11149_v29, 0 }
 0x9fb   : > { %v5350_v43 = vrot.slane %v5342_v33, %v9638_v61  ;;  %v5357_v41 = vrot.slane %v5343_v32, %v9638_v61  ;;  %8965 = vmatpush3.bf16.xpose.msra.mxu0 %v11346_v0  ;;  %v6378_v18 = vcombine.low %v11403_v57, %v11406_v7  ;;  %v5402_v52 = vrot.slane %v5394_v3, %v9638_v61 }
 0x9fc   : > { %v5409_v48 = vrot.slane %v5395_v46, %v9638_v61  ;;  %v11434_v9 = vpop.permute.xlu1 %5072  ;;  %v5167_v10 = vpop.permute.xlu0 %5166  ;;  %8946 = vmatprep.subr.bf16.mxu1 %v12597_v17  ;;  %8966 = vmatprep.subr.bf16.mxu0 %v12597_v17  ;;  %v6394_v21 = vcombine.low %v11409_v26, %v11414_v22  ;;  %v6379_v29 = vcombine.high %v11403_v57, %v11406_v7 }
 0x9fd   : > { %v5358_v19 = vcombine.low %v5334_v53, %v5350_v43  ;;  %v5359_v35 = vcombine.high %v5334_v53, %v5350_v43  ;;  %v5374_v31 = vcombine.low %v5341_v42, %v5357_v41  ;;  %v5375_v40 = vcombine.high %v5341_v42, %v5357_v41  ;;  %8960 = vmatprep.mubr.msk.bf16.mxu1 %vm9343_vm1, %v12597_v17 }
 0x9fe   : > { %v5410_v4 = vcombine.low %v5103_v34, %v5167_v10  ;;  %v5411_v27 = vcombine.high %v5103_v34, %v5167_v10  ;;  %8980 = vmatprep.mubr.msk.bf16.mxu0 %vm9343_vm1, %v12597_v17  ;;  %v11459_v44 = vrot.slane %v6378_v18, %v9653_v5  ;;  %v11462_v45 = vrot.slane %v6394_v21, %v9653_v5 }
 0x9ff   : > { %v5366_v51 = vrot.slane %v5358_v19, %v9653_v5  ;;  %v5373_v16 = vrot.slane %v5359_v35, %v9653_v5  ;;  %v5382_v24 = vrot.slane %v5374_v31, %v9653_v5  ;;  %v5389_v54 = vrot.slane %v5375_v40, %v9653_v5 }
 0xa00   : > { %v5418_v2 = vrot.slane %v5410_v4, %v9638_v61  ;;  %v5425_v34 = vrot.slane %v5411_v27, %v9638_v61  ;;  %v5105_v8 = vpop.permute.xlu1 %5104  ;;  %v5075_v14 = vpop.permute.xlu0 %5074  ;;  %v6410_v35 = vcombine.low %v11459_v44, %v11462_v45  ;;  %v11498_v40 = vrot.slane %v6379_v29, %v9653_v5 }
 0xa01   : > { %v6414_v60 = vcombine.low %v5366_v51, %v5373_v16  ;;  %v8624_v49 = vcombine.high %v5366_v51, %v5373_v16  ;;  %v6430_v50 = vcombine.low %v5382_v24, %v5389_v54  ;;  %v8625_v62 = vcombine.high %v5382_v24, %v5389_v54 }
 0xa02   : > { %v5426_v63 = vcombine.low %v5402_v52, %v5418_v2  ;;  %v5427_v15 = vcombine.high %v5402_v52, %v5418_v2  ;;  %v5442_v55 = vcombine.low %v5409_v48, %v5425_v34  ;;  %v5443_v57 = vcombine.high %v5409_v48, %v5425_v34  ;;  %8947 = vmatpush3.bf16.xpose.msra.mxu1 %v11351_v20 }
 0xa03   : > { %v11466_v7 = vrot.slane %v6414_v60, %v9638_v61  ;;  %v11469_v53 = vrot.slane %v8624_v49, %v9638_v61  ;;  %v11472_v39 = vrot.slane %v6430_v50, %v9638_v61  ;;  %v11475_v30 = vrot.slane %v8625_v62, %v9638_v61  ;;  %8967 = vmatpush3.bf16.xpose.msra.mxu0 %v11354_v12 }
 0xa04   : > { %v5434_v33 = vrot.slane %v5426_v63, %v9653_v5  ;;  %v5441_v32 = vrot.slane %v5427_v15, %v9653_v5  ;;  %v5450_v20 = vrot.slane %v5442_v55, %v9653_v5  ;;  %v5457_v3 = vrot.slane %v5443_v57, %v9653_v5  ;;  %v5137_v46 = vpop.permute.xlu1 %5136  ;;  %v5107_v42 = vpop.permute.xlu0 %5106  ;;  %8948 = vmatprep.subr.bf16.mxu1 %v12597_v17 }
 0xa05   : > { %v5462_v43 = vcombine.low %v11434_v9, %v5137_v46  ;;  %v5463_v41 = vcombine.high %v11434_v9, %v5137_v46  ;;  %8968 = vmatprep.subr.bf16.mxu0 %v12597_v17  ;;  %v6446_v18 = vcombine.low %v11466_v7, %v11469_v53  ;;  %v6462_v9 = vcombine.low %v11472_v39, %v11475_v30 }
 0xa06   : > { %v6482_v52 = vcombine.low %v5434_v33, %v5441_v32  ;;  %v8626_v48 = vcombine.high %v5434_v33, %v5441_v32  ;;  %v6498_v10 = vcombine.low %v5450_v20, %v5457_v3  ;;  %v8627_v19 = vcombine.high %v5450_v20, %v5457_v3 }
 0xa07   : > { %v11493_v31 = vrot.slane %v6446_v18, %v9653_v5  ;;  %v5470_v29 = vrot.slane %v5462_v43, %v9638_v61  ;;  %v5477_v49 = vrot.slane %v5463_v41, %v9638_v61  ;;  %v11516_v50 = vrot.slane %v6462_v9, %v9653_v5 }
 0xa08   : > { %v11501_v4 = vrot.slane %v6482_v52, %v9638_v61  ;;  %v11504_v27 = vrot.slane %v8626_v48, %v9638_v61  ;;  %v11507_v21 = vrot.slane %v6498_v10, %v9638_v61  ;;  %v11510_v51 = vrot.slane %v8627_v19, %v9638_v61  ;;  %v5169_v16 = vpop.permute.xlu1 %5168  ;;  %v5139_v24 = vpop.permute.xlu0 %5138 }
 0xa09   : > { %v5478_v54 = vcombine.low %v5105_v8, %v5169_v16  ;;  %v5479_v2 = vcombine.high %v5105_v8, %v5169_v16  ;;  %v5530_v34 = vcombine.low %v5075_v14, %v5139_v24  ;;  %v5531_v60 = vcombine.high %v5075_v14, %v5139_v24 }
 0xa0a   : > { %8949 = vmatpush3.bf16.xpose.msra.mxu1 %v11357_v13  ;;  %v6514_v62 = vcombine.low %v11501_v4, %v11504_v27  ;;  %v6411_v8 = vcombine.high %v11459_v44, %v11462_v45  ;;  %v6530_v14 = vcombine.low %v11507_v21, %v11510_v51  ;;  %v6478_v32 = vcombine.low %v11493_v31, %v11516_v50 }
 0xa0b   : > { %v5486_v63 = vrot.slane %v5478_v54, %v9638_v61  ;;  %v5493_v15 = vrot.slane %v5479_v2, %v9638_v61  ;;  %8969 = vmatpush3.bf16.xpose.msra.mxu0 %v11364_v6  ;;  %v5538_v13 = vrot.slane %v5530_v34, %v9638_v61  ;;  %v5545_v55 = vrot.slane %v5531_v60, %v9638_v61 }
 0xa0c   : > { %v11529_v57 = vpop.permute.xlu1 %5076  ;;  %v5171_v33 = vpop.permute.xlu0 %5170  ;;  %8950 = vmatprep.subr.bf16.mxu1 %v12597_v17  ;;  %8970 = vmatprep.subr.bf16.mxu0 %v12597_v17  ;;  %v11535_v6 = vsel %vm1622_vm2, %v11151_v23, 0  ;;  %v6479_v52 = vcombine.high %v11493_v31, %v11516_v50  ;;  %v11542_v48 = vrot.slane %v6514_v62, %v9653_v5  ;;  %v11551_v2 = vrot.slane %v6530_v14, %v9653_v5 }
 0xa0d   : > { %v5494_v20 = vcombine.low %v5470_v29, %v5486_v63  ;;  %v5495_v3 = vcombine.high %v5470_v29, %v5486_v63  ;;  %v5510_v46 = vcombine.low %v5477_v49, %v5493_v15  ;;  %v5511_v43 = vcombine.high %v5477_v49, %v5493_v15 }
 0xa0e   : > { %v5546_v41 = vcombine.low %v5107_v42, %v5171_v33  ;;  %v5547_v18 = vcombine.high %v5107_v42, %v5171_v33  ;;  %v6395_v31 = vcombine.high %v11409_v26, %v11414_v22 }
 0xa0f   : > { %v5502_v10 = vrot.slane %v5494_v20, %v9653_v5  ;;  %v5509_v23 = vrot.slane %v5495_v3, %v9653_v5  ;;  %v5518_v19 = vrot.slane %v5510_v46, %v9653_v5  ;;  %v5525_v9 = vrot.slane %v5511_v43, %v9653_v5 }
 0xa10   : > { %v5554_v16 = vrot.slane %v5546_v41, %v9638_v61  ;;  %v5561_v24 = vrot.slane %v5547_v18, %v9638_v61  ;;  %v5109_v54 = vpop.permute.xlu1 %5108  ;;  %v5079_v42 = vpop.permute.xlu0 %5078 }
 0xa11   : > { %v6550_v34 = vcombine.low %v5502_v10, %v5509_v23  ;;  %v8628_v60 = vcombine.high %v5502_v10, %v5509_v23  ;;  %v6566_v29 = vcombine.low %v5518_v19, %v5525_v9  ;;  %v8629_v49 = vcombine.high %v5518_v19, %v5525_v9 }
 0xa12   : > { %v5562_v50 = vcombine.low %v5538_v13, %v5554_v16  ;;  %v5563_v62 = vcombine.high %v5538_v13, %v5554_v16  ;;  %v5578_v63 = vcombine.low %v5545_v55, %v5561_v24  ;;  %v5579_v15 = vcombine.high %v5545_v55, %v5561_v24  ;;  %8951 = vmatpush3.bf16.xpose.msra.mxu1 %v11367_v11 }
 0xa13   : > { %v11557_v33 = vrot.slane %v6550_v34, %v9638_v61  ;;  %v11560_v20 = vrot.slane %v8628_v60, %v9638_v61  ;;  %v11563_v14 = vrot.slane %v6566_v29, %v9638_v61  ;;  %v11566_v3 = vrot.slane %v8629_v49, %v9638_v61  ;;  %8971 = vmatpush3.bf16.xpose.msra.mxu0 %v11370_v1 }
 0xa14   : > { %v5570_v13 = vrot.slane %v5562_v50, %v9653_v5  ;;  %v5577_v55 = vrot.slane %v5563_v62, %v9653_v5  ;;  %v5586_v11 = vrot.slane %v5578_v63, %v9653_v5  ;;  %v5593_v46 = vrot.slane %v5579_v15, %v9653_v5  ;;  %v5141_v43 = vpop.permute.xlu1 %5140  ;;  %v5111_v41 = vpop.permute.xlu0 %5110  ;;  %8952 = vmatprep.subr.bf16.mxu1 %v12597_v17 }
 0xa15   : > { %v5598_v18 = vcombine.low %v11529_v57, %v5141_v43  ;;  %v5599_v10 = vcombine.high %v11529_v57, %v5141_v43  ;;  %8972 = vmatprep.subr.bf16.mxu0 %v12597_v17  ;;  %v11580_v1 = vpack.c.bf16 %v6478_v32, %v6410_v35  ;;  %v6582_v23 = vcombine.low %v11557_v33, %v11560_v20 }
 0xa16   : > { %v6618_v19 = vcombine.low %v5570_v13, %v5577_v55  ;;  %v8630_v9 = vcombine.high %v5570_v13, %v5577_v55  ;;  %v6634_v16 = vcombine.low %v5586_v11, %v5593_v46  ;;  %v8631_v24 = vcombine.high %v5586_v11, %v5593_v46 }
 0xa17   : > { %v11584_v34 = vpack.c.bf16 %v6479_v52, %v6411_v8  ;;  %v6546_v60 = vcombine.low %v11542_v48, %v11551_v2  ;;  %v11589_v57 = vrot.slane %v6582_v23, %v9653_v5  ;;  %v6598_v44 = vcombine.low %v11563_v14, %v11566_v3 }
 0xa18   : > { %v11594_v45 = vrot.slane %v6618_v19, %v9638_v61  ;;  %v11597_v35 = vrot.slane %v8630_v9, %v9638_v61  ;;  %v11600_v32 = vrot.slane %v6634_v16, %v9638_v61  ;;  %v11603_v8 = vrot.slane %v8631_v24, %v9638_v61  ;;  %v5173_v52 = vpop.permute.xlu1 %5172  ;;  %v5143_v29 = vpop.permute.xlu0 %5142 }
 0xa19   : > { %v5614_v49 = vcombine.low %v5109_v54, %v5173_v52  ;;  %v5615_v50 = vcombine.high %v5109_v54, %v5173_v52  ;;  %v5666_v62 = vcombine.low %v5079_v42, %v5143_v29  ;;  %v5667_v63 = vcombine.high %v5079_v42, %v5143_v29 }
 0xa1a   : > { %12765 = vst [vmem:[#allocation30_spill] sm:$0xff] %v11594_v45  ;;  %12766 = vst [vmem:[#allocation31_spill] sm:$0xff] %v11597_v35  ;;  %v5606_v15 = vrot.slane %v5598_v18, %v9638_v61  ;;  %v5613_v13 = vrot.slane %v5599_v10, %v9638_v61  ;;  %8953 = vmatpush3.bf16.xpose.msra.mxu1 %v11374_v38  ;;  %v6606_v55 = vrot.slane %v6598_v44, %v9653_v5 }
 0xa1b   : > { %12767 = vst [vmem:[#allocation17_spill] sm:$0xff] %v11600_v32  ;;  %12768 = vst [vmem:[#allocation18_spill] sm:$0xff] %v11603_v8  ;;  %v6650_v11 = vcombine.low %v11594_v45, %v11597_v35  ;;  %v5622_v46 = vrot.slane %v5614_v49, %v9638_v61  ;;  %v5629_v43 = vrot.slane %v5615_v50, %v9638_v61  ;;  %8973 = vmatpush3.bf16.xpose.msra.mxu0 %v11388_v47 }
 0xa1c   : > { %v6547_v54 = vcombine.high %v11542_v48, %v11551_v2  ;;  %v6666_v42 = vcombine.low %v11600_v32, %v11603_v8  ;;  %v5674_v18 = vrot.slane %v5666_v62, %v9638_v61  ;;  %v5681_v38 = vrot.slane %v5667_v63, %v9638_v61  ;;  %v11620_v10 = vpop.permute.xlu1 %5080  ;;  %v5175_v23 = vpop.permute.xlu0 %5174  ;;  %8954 = vmatprep.subr.bf16.mxu1 %v12597_v17 }
 0xa1d   : > { %8974 = vmatprep.subr.bf16.mxu0 %v12597_v17  ;;  %v11626_v47 = vsel %vm1622_vm2, %v11155_v37, 0  ;;  %v6614_v48 = vcombine.low %v11589_v57, %v6606_v55  ;;  %v5630_v2 = vcombine.low %v5606_v15, %v5622_v46  ;;  %v5631_v19 = vcombine.high %v5606_v15, %v5622_v46 }
 0xa1e   : > { %v5646_v9 = vcombine.low %v5613_v13, %v5629_v43  ;;  %v5647_v16 = vcombine.high %v5613_v13, %v5629_v43  ;;  %v5682_v24 = vcombine.low %v5111_v41, %v5175_v23  ;;  %v5683_v44 = vcombine.high %v5111_v41, %v5175_v23 }
 0xa1f   : > { %v6615_v52 = vcombine.high %v11589_v57, %v6606_v55  ;;  %v11631_v29 = vrot.slane %v6650_v11, %v9653_v5  ;;  %v5638_v49 = vrot.slane %v5630_v2, %v9653_v5  ;;  %v5645_v50 = vrot.slane %v5631_v19, %v9653_v5 }
 0xa20   : > { %v5654_v37 = vrot.slane %v5646_v9, %v9653_v5  ;;  %v5661_v62 = vrot.slane %v5647_v16, %v9653_v5  ;;  %v5690_v63 = vrot.slane %v5682_v24, %v9638_v61  ;;  %v5697_v15 = vrot.slane %v5683_v44, %v9638_v61  ;;  %v5113_v13 = vpop.permute.xlu1 %5112  ;;  %v5083_v46 = vpop.permute.xlu0 %5082 }
 0xa21   : > { %v11639_v41 = vpack.c.bf16 %v6614_v48, %v6546_v60  ;;  %v11642_v57 = vrot.slane %v6666_v42, %v9653_v5  ;;  %v6686_v55 = vcombine.low %v5638_v49, %v5645_v50  ;;  %v8632_v11 = vcombine.high %v5638_v49, %v5645_v50 }
 0xa22   : > { %v6702_v43 = vcombine.low %v5654_v37, %v5661_v62  ;;  %v8633_v23 = vcombine.high %v5654_v37, %v5661_v62  ;;  %v5698_v2 = vcombine.low %v5674_v18, %v5690_v63  ;;  %v5699_v19 = vcombine.high %v5674_v18, %v5690_v63  ;;  %8955 = vmatpush3.bf16.xpose.msra.mxu1 %v11400_v56 }
 0xa23   : > { %v5714_v9 = vcombine.low %v5681_v38, %v5697_v15  ;;  %v5715_v12 = vcombine.high %v5681_v38, %v5697_v15  ;;  %v11646_v16 = vrot.slane %v6686_v55, %v9638_v61  ;;  %v11649_v24 = vrot.slane %v8632_v11, %v9638_v61  ;;  %8975 = vmatpush3.bf16.xpose.msra.mxu0 %v11420_v58 }
 0xa24   : > { %v11652_v60 = vrot.slane %v6702_v43, %v9638_v61  ;;  %v11655_v42 = vrot.slane %v8633_v23, %v9638_v61  ;;  %v5706_v18 = vrot.slane %v5698_v2, %v9653_v5  ;;  %v5713_v38 = vrot.slane %v5699_v19, %v9653_v5  ;;  %v5145_v44 = vpop.permute.xlu1 %5144  ;;  %v5115_v49 = vpop.permute.xlu0 %5114  ;;  %8956 = vmatprep.subr.bf16.mxu1 %v12597_v17 }
 0xa25   : > { %12769 = vst [vmem:[#allocation34_spill] sm:$0xff] %v11646_v16  ;;  %12770 = vst [vmem:[#allocation35_spill] sm:$0xff] %v11649_v24  ;;  %v5722_v56 = vrot.slane %v5714_v9, %v9653_v5  ;;  %v5729_v48 = vrot.slane %v5715_v12, %v9653_v5  ;;  %v5734_v50 = vcombine.low %v11620_v10, %v5145_v44  ;;  %8976 = vmatprep.subr.bf16.mxu0 %v12597_v17 }
 0xa26   : > { %12771 = vst [vmem:[#allocation37_spill] sm:$0xff] %v11652_v60  ;;  %12772 = vst [vmem:[#allocation38_spill] sm:$0xff] %v11655_v42  ;;  %v5735_v37 = vcombine.high %v11620_v10, %v5145_v44  ;;  %v11666_v62 = vpack.c.bf16 %v6615_v52, %v6547_v54  ;;  %v6718_v58 = vcombine.low %v11646_v16, %v11649_v24 }
 0xa27   : > { %v6754_v63 = vcombine.low %v5706_v18, %v5713_v38  ;;  %v8634_v15 = vcombine.high %v5706_v18, %v5713_v38  ;;  %v6770_v55 = vcombine.low %v5722_v56, %v5729_v48  ;;  %v8635_v11 = vcombine.high %v5722_v56, %v5729_v48 }
 0xa28   : > { %v11673_v43 = vrot.slane %v6718_v58, %v9653_v5  ;;  %v6734_v10 = vcombine.low %v11652_v60, %v11655_v42  ;;  %v11681_v54 = vrot.slane %v6395_v31, %v9653_v5  ;;  %v5177_v9 = vpop.permute.xlu1 %5176  ;;  %v5147_v18 = vpop.permute.xlu0 %5146  ;;  %v5742_v22 = vrot.slane %v5734_v50, %v9638_v61 }
 0xa29   : > { %v11684_v52 = vrot.slane %v6754_v63, %v9638_v61  ;;  %v11687_v23 = vrot.slane %v8634_v15, %v9638_v61  ;;  %v11690_v2 = vrot.slane %v6770_v55, %v9638_v61  ;;  %v11693_v19 = vrot.slane %v8635_v11, %v9638_v61 }
 0xa2a   : > { %v5750_v38 = vcombine.low %v5113_v13, %v5177_v9  ;;  %v5751_v56 = vcombine.high %v5113_v13, %v5177_v9  ;;  %v5802_v48 = vcombine.low %v5083_v46, %v5147_v18  ;;  %v5803_v26 = vcombine.high %v5083_v46, %v5147_v18  ;;  %8957 = vmatpush3.bf16.xpose.msra.mxu1 %v11440_v59 }
 0xa2b   : > { %12773 = vst [vmem:[#allocation39_spill] sm:$0xff] %v11684_v52  ;;  %12774 = vst [vmem:[#allocation40_spill] sm:$0xff] %v11687_v23  ;;  %v5749_v31 = vrot.slane %v5735_v37, %v9638_v61  ;;  %v11699_v44 = vrot.slane %v6734_v10, %v9653_v5  ;;  %v6786_v58 = vcombine.low %v11684_v52, %v11687_v23  ;;  %8977 = vmatpush3.bf16.xpose.msra.mxu0 %v11535_v6 }
 0xa2c   : > { %12775 = vst [vmem:[#allocation19_spill] sm:$0xff] %v11690_v2  ;;  %12776 = vst [vmem:[#allocation20_spill] sm:$0xff] %v11693_v19  ;;  %v5758_v63 = vrot.slane %v5750_v38, %v9638_v61  ;;  %v5765_v15 = vrot.slane %v5751_v56, %v9638_v61  ;;  %v6683_v13 = vcombine.high %v11631_v29, %v11642_v57  ;;  %v5085_v37 = vpop.permute.xlu1 %5084  ;;  %v5179_v55 = vpop.permute.xlu0 %5178  ;;  %8958 = vmatprep.subr.bf16.mxu1 %v12597_v17 }
 0xa2d   : > { %v6802_v46 = vcombine.low %v11690_v2, %v11693_v19  ;;  %v5810_v59 = vrot.slane %v5802_v48, %v9638_v61  ;;  %v5817_v50 = vrot.slane %v5803_v26, %v9638_v61  ;;  %8978 = vmatprep.subr.bf16.mxu0 %v12597_v17  ;;  %v7692_v11 = vsel %vm1622_vm2, %v11157_v36, 0 }
 0xa2e   : > { %v6750_v6 = vcombine.low %v11673_v43, %v11699_v44  ;;  %v5766_v10 = vcombine.low %v5742_v22, %v5758_v63  ;;  %v5767_v9 = vcombine.high %v5742_v22, %v5758_v63  ;;  %v5782_v18 = vcombine.low %v5749_v31, %v5765_v15 }
 0xa2f   : > { %v5783_v38 = vcombine.high %v5749_v31, %v5765_v15  ;;  %v5818_v56 = vcombine.low %v5115_v49, %v5179_v55  ;;  %v5819_v48 = vcombine.high %v5115_v49, %v5179_v55  ;;  %v6751_v26 = vcombine.high %v11673_v43, %v11699_v44 }
 0xa30   : > { %v11721_v0 = vrot.slane %v6786_v58, %v9653_v5  ;;  %v5774_v12 = vrot.slane %v5766_v10, %v9653_v5  ;;  %v5781_v2 = vrot.slane %v5767_v9, %v9653_v5  ;;  %v5790_v36 = vrot.slane %v5782_v18, %v9653_v5  ;;  %v5117_v63 = vpop.permute.xlu1 %5116  ;;  %v5087_v49 = vpop.permute.xlu0 %5086 }
 0xa31   : > { %v5797_v19 = vrot.slane %v5783_v38, %v9653_v5  ;;  %v5826_v22 = vrot.slane %v5818_v56, %v9638_v61  ;;  %v5833_v31 = vrot.slane %v5819_v48, %v9638_v61  ;;  %v11730_v15 = vrot.slane %v6802_v46, %v9653_v5 }
 0xa32   : > { %v6822_v44 = vcombine.low %v5774_v12, %v5781_v2  ;;  %v8636_v58 = vcombine.high %v5774_v12, %v5781_v2  ;;  %8959 = vmatpush3.bf16.xpose.msra.mxu1 %v11626_v47 }
 0xa33   : > { %v6838_v55 = vcombine.low %v5790_v36, %v5797_v19  ;;  %v8637_v10 = vcombine.high %v5790_v36, %v5797_v19  ;;  %v5834_v9 = vcombine.low %v5810_v59, %v5826_v22  ;;  %v5835_v18 = vcombine.high %v5810_v59, %v5826_v22  ;;  %8979 = vmatpush3.bf16.xpose.msra.mxu0 %v7692_v11 }
 0xa34   : > { %v5850_v52 = vcombine.low %v5817_v50, %v5833_v31  ;;  %v5851_v38 = vcombine.high %v5817_v50, %v5833_v31  ;;  %v11736_v56 = vrot.slane %v6822_v44, %v9638_v61  ;;  %v11739_v48 = vrot.slane %v8636_v58, %v9638_v61  ;;  %v5149_v59 = vpop.permute.xlu1 %5148  ;;  %v5119_v50 = vpop.permute.xlu0 %5118  ;;  %8984 = vmatprep.subr.bf16.mxu1 %v12597_v17 }
 0xa35   : > { %v11742_v46 = vrot.slane %v6838_v55, %v9638_v61  ;;  %v11745_v43 = vrot.slane %v8637_v10, %v9638_v61  ;;  %v5842_v12 = vrot.slane %v5834_v9, %v9653_v5  ;;  %v5849_v2 = vrot.slane %v5835_v18, %v9653_v5  ;;  %9004 = vmatprep.subr.bf16.mxu0 %v12597_v17 }
 0xa36   : > { %v5858_v19 = vrot.slane %v5850_v52, %v9653_v5  ;;  %v5865_v47 = vrot.slane %v5851_v38, %v9653_v5  ;;  %v5870_v36 = vcombine.low %v5085_v37, %v5149_v59  ;;  %v5871_v22 = vcombine.high %v5085_v37, %v5149_v59 }
 0xa37   : > { %v12777_v31 = vcombine.low %v11631_v29, %v11642_v57  ;;  %v6854_v44 = vcombine.low %v11736_v56, %v11739_v48  ;;  %v6890_v58 = vcombine.low %v5842_v12, %v5849_v2  ;;  %v8638_v52 = vcombine.high %v5842_v12, %v5849_v2 }
 0xa38   : > { %v6906_v55 = vcombine.low %v5858_v19, %v5865_v47  ;;  %v11760_v10 = vpack.c.bf16 %v6751_v26, %v6683_v13  ;;  %v8639_v9 = vcombine.high %v5858_v19, %v5865_v47  ;;  %v5878_v18 = vrot.slane %v5870_v36, %v9638_v61  ;;  %v5181_v12 = vpop.permute.xlu1 %5180  ;;  %v5151_v13 = vpop.permute.xlu0 %5150 }
 0xa39   : > { %v11756_v11 = vpack.c.bf16 %v6750_v6, %v12777_v31  ;;  %v6870_v38 = vcombine.low %v11742_v46, %v11745_v43  ;;  %v11768_v29 = vrot.slane %v6890_v58, %v9638_v61  ;;  %v11771_v57 = vrot.slane %v8638_v52, %v9638_v61 }
 0xa3a   : > { %v5885_v6 = vrot.slane %v5871_v22, %v9638_v61  ;;  %v6862_v26 = vrot.slane %v6854_v44, %v9653_v5  ;;  %v5886_v2 = vcombine.low %v5117_v63, %v5181_v12  ;;  %v5887_v19 = vcombine.high %v5117_v63, %v5181_v12 }
 0xa3b   : > { %v12778_v47 = vpack.c.bf16 %v11422_v28, %v11422_v28  ;;  %v5938_v59 = vcombine.low %v5087_v49, %v5151_v13  ;;  %v5939_v36 = vcombine.high %v5087_v49, %v5151_v13  ;;  %v11780_v31 = vrot.slane %v6906_v55, %v9638_v61 }
 0xa3c   : > { %v12779_v58 = vpack.c.bf16 %v11424_v25, %v11424_v25  ;;  %v6878_v22 = vrot.slane %v6870_v38, %v9653_v5  ;;  %v6922_v63 = vcombine.low %v11768_v29, %v11771_v57  ;;  %v11791_v28 = vrot.slane %v8639_v9, %v9638_v61  ;;  %v11800_v55 = vpop.permute.xlu1 %5088  ;;  %v5183_v9 = vpop.permute.xlu0 %5182 }
 0xa3d   : > { %8961 = vmatmul.mubr.msk.bf16.vlgmr.msra.gmra.mrb[28].mxu1 %vm1622_vm2, %v12778_v47  ;;  %v5894_v49 = vrot.slane %v5886_v2, %v9638_v61  ;;  %v5901_v44 = vrot.slane %v5887_v19, %v9638_v61  ;;  %v6819_v25 = vcombine.high %v11721_v0, %v11730_v15  ;;  %v5946_v52 = vrot.slane %v5938_v59, %v9638_v61 }
 0xa3e   : > { %8981 = vmatmul.mubr.msk.bf16.vlgmr.msra.gmra.mrb[44].mxu0 %vm1622_vm2, %v12779_v58  ;;  %8985 = vmatpush3.bf16.msra.mxu1 %v11580_v1  ;;  %v5953_v1 = vrot.slane %v5939_v36, %v9638_v61  ;;  %v6886_v38 = vcombine.low %v6862_v26, %v6878_v22  ;;  %v5955_v47 = vcombine.high %v5119_v50, %v5183_v9 }
 0xa3f   : > { %9005 = vmatpush3.bf16.msra.mxu0 %v11584_v34  ;;  %8986 = vmatprep.subr.bf16.mxu1 %v12597_v17  ;;  %v5902_v12 = vcombine.low %v5878_v18, %v5894_v49  ;;  %v5903_v13 = vcombine.high %v5878_v18, %v5894_v49  ;;  %v5918_v2 = vcombine.low %v5885_v6, %v5901_v44 }
 0xa40   : > { %9006 = vmatprep.subr.bf16.mxu0 %v12597_v17  ;;  %v5919_v19 = vcombine.high %v5885_v6, %v5901_v44  ;;  %9000 = vmatprep.mubr.msk.bf16.mxu1 %vm9343_vm1, %v12597_v17  ;;  %v5954_v34 = vcombine.low %v5119_v50, %v5183_v9  ;;  %v6887_v59 = vcombine.high %v6862_v26, %v6878_v22  ;;  %v5121_v49 = vpop.permute.xlu1 %5120 }
 0xa41   : > { %v11808_v36 = vrot.slane %v6922_v63, %v9653_v5  ;;  %v5910_v58 = vrot.slane %v5902_v12, %v9653_v5  ;;  %v5917_v37 = vrot.slane %v5903_v13, %v9653_v5  ;;  %v5926_v23 = vrot.slane %v5918_v2, %v9653_v5  ;;  %9020 = vmatprep.mubr.msk.bf16.mxu0 %vm9343_vm1, %v12597_v17 }
 0xa42   : > { %8987 = vmatpush3.bf16.msra.mxu1 %v11639_v41  ;;  %v5933_v18 = vrot.slane %v5919_v19, %v9653_v5  ;;  %v5962_v6 = vrot.slane %v5954_v34, %v9638_v61  ;;  %v5969_v50 = vrot.slane %v5955_v47, %v9638_v61  ;;  %v5091_v41 = vpop.permute.xlu0 %5090  ;;  %v6938_v26 = vcombine.low %v11780_v31, %v11791_v28 }
 0xa43   : > { %9007 = vmatpush3.bf16.msra.mxu0 %v11666_v62  ;;  %8988 = vmatprep.subr.bf16.mxu1 %v12597_v17  ;;  %v6958_v22 = vcombine.low %v5910_v58, %v5917_v37  ;;  %v8640_v63 = vcombine.high %v5910_v58, %v5917_v37  ;;  %v7445_v47 = vpack.c.bf16 %v6887_v59, %v6819_v25 }
 0xa44   : > { %9008 = vmatprep.subr.bf16.mxu0 %v12597_v17  ;;  %v6974_v44 = vcombine.low %v5926_v23, %v5933_v18  ;;  %v8641_v9 = vcombine.high %v5926_v23, %v5933_v18  ;;  %v5970_v62 = vcombine.low %v5946_v52, %v5962_v6  ;;  %v5971_v12 = vcombine.high %v5946_v52, %v5962_v6  ;;  %v5153_v18 = vpop.permute.xlu1 %5152 }
 0xa45   : > { %v5986_v13 = vcombine.low %v5953_v1, %v5969_v50  ;;  %v5987_v2 = vcombine.high %v5953_v1, %v5969_v50  ;;  %v11825_v19 = vrot.slane %v6958_v22, %v9638_v61  ;;  %v11828_v34 = vrot.slane %v8640_v63, %v9638_v61 }
 0xa46   : > { %8989 = vmatpush3.bf16.msra.mxu1 %v11756_v11  ;;  %v12780_v23 = vcombine.low %v11721_v0, %v11730_v15  ;;  %v5978_v58 = vrot.slane %v5970_v62, %v9653_v5  ;;  %v5985_v52 = vrot.slane %v5971_v12, %v9653_v5  ;;  %v5123_v6 = vpop.permute.xlu0 %5122  ;;  %v11840_v50 = vrot.slane %v6974_v44, %v9638_v61 }
 0xa47   : > { %9009 = vmatpush3.bf16.msra.mxu0 %v11760_v10  ;;  %v5994_v1 = vrot.slane %v5986_v13, %v9653_v5  ;;  %v6001_v11 = vrot.slane %v5987_v2, %v9653_v5  ;;  %8990 = vmatprep.subr.bf16.mxu1 %v12597_v17  ;;  %v6006_v10 = vcombine.low %v11800_v55, %v5153_v18 }
 0xa48   : > { %v7437_v37 = vpack.c.bf16 %v6886_v38, %v12780_v23  ;;  %v6007_v0 = vcombine.high %v11800_v55, %v5153_v18  ;;  %9010 = vmatprep.subr.bf16.mxu0 %v12597_v17  ;;  %v6946_v15 = vrot.slane %v6938_v26, %v9653_v5  ;;  %v11847_v25 = vrot.slane %v8641_v9, %v9638_v61  ;;  %v5185_v12 = vpop.permute.xlu1 %5184 }
 0xa49   : > { %v7026_v38 = vcombine.low %v5978_v58, %v5985_v52  ;;  %v8642_v59 = vcombine.high %v5978_v58, %v5985_v52  ;;  %v6990_v22 = vcombine.low %v11825_v19, %v11828_v34  ;;  %v7042_v63 = vcombine.low %v5994_v1, %v6001_v11 }
 0xa4a   : > { %8991 = vmatpush3.bf16.msra.mxu1 %v7437_v37  ;;  %v8643_v44 = vcombine.high %v5994_v1, %v6001_v11  ;;  %v6014_v55 = vrot.slane %v6006_v10, %v9638_v61  ;;  %v6021_v62 = vrot.slane %v6007_v0, %v9638_v61  ;;  %v5155_v26 = vpop.permute.xlu0 %5154  ;;  %v6954_v9 = vcombine.low %v11808_v36, %v6946_v15 }
 0xa4b   : > { %9011 = vmatpush3.bf16.msra.mxu0 %v7445_v47  ;;  %8992 = vmatprep.subr.bf16.mxu1 %v12597_v17  ;;  %v6022_v13 = vcombine.low %v5121_v49, %v5185_v12  ;;  %v6023_v2 = vcombine.high %v5121_v49, %v5185_v12  ;;  %v6074_v23 = vcombine.low %v5091_v41, %v5155_v26 }
 0xa4c   : > { %9012 = vmatprep.subr.bf16.mxu0 %v12597_v17  ;;  %v6075_v37 = vcombine.high %v5091_v41, %v5155_v26  ;;  %v11857_v58 = vrot.slane %v7026_v38, %v9638_v61  ;;  %v11860_v47 = vrot.slane %v8642_v59, %v9638_v61  ;;  %v6998_v52 = vrot.slane %v6990_v22, %v9653_v5  ;;  %v5093_v38 = vpop.permute.xlu1 %5092 }
 0xa4d   : > { %v7006_v1 = vcombine.low %v11840_v50, %v11847_v25  ;;  %v11866_v11 = vrot.slane %v7042_v63, %v9638_v61  ;;  %v11869_v18 = vrot.slane %v8643_v44, %v9638_v61  ;;  %v6030_v49 = vrot.slane %v6022_v13, %v9638_v61 }
 0xa4e   : > { %v6037_v41 = vrot.slane %v6023_v2, %v9638_v61  ;;  %v6082_v10 = vrot.slane %v6074_v23, %v9638_v61  ;;  %v6089_v0 = vrot.slane %v6075_v37, %v9638_v61  ;;  %v5187_v59 = vpop.permute.xlu0 %5186  ;;  %v6955_v12 = vcombine.high %v11808_v36, %v6946_v15 }
 0xa4f   : > { %v7014_v22 = vrot.slane %v7006_v1, %v9653_v5  ;;  %v6038_v26 = vcombine.low %v6014_v55, %v6030_v49  ;;  %v6039_v63 = vcombine.high %v6014_v55, %v6030_v49  ;;  %v6090_v44 = vcombine.low %v5123_v6, %v5187_v59 }
 0xa50   : > { %v6054_v32 = vcombine.low %v6021_v62, %v6037_v41  ;;  %v6055_v8 = vcombine.high %v6021_v62, %v6037_v41  ;;  %v6091_v45 = vcombine.high %v5123_v6, %v5187_v59  ;;  %v5125_v49 = vpop.permute.xlu1 %5124 }
 0xa51   : > { %v7022_v35 = vcombine.low %v6998_v52, %v7014_v22  ;;  %v7023_v13 = vcombine.high %v6998_v52, %v7014_v22  ;;  %v6046_v2 = vrot.slane %v6038_v26, %v9653_v5  ;;  %v6053_v23 = vrot.slane %v6039_v63, %v9653_v5 }
 0xa52   : > { %v6062_v37 = vrot.slane %v6054_v32, %v9653_v5  ;;  %v6069_v60 = vrot.slane %v6055_v8, %v9653_v5  ;;  %v6098_v1 = vrot.slane %v6090_v44, %v9638_v61  ;;  %v6105_v36 = vrot.slane %v6091_v45, %v9638_v61 }
 0xa53   : > { %v7438_v15 = vpack.c.bf16 %v7022_v35, %v6954_v9  ;;  %v7446_v55 = vpack.c.bf16 %v7023_v13, %v6955_v12  ;;  %v7094_v62 = vcombine.low %v6046_v2, %v6053_v23  ;;  %v8644_v41 = vcombine.high %v6046_v2, %v6053_v23 }
 0xa54   : > { %v7110_v6 = vcombine.low %v6062_v37, %v6069_v60  ;;  %v8645_v59 = vcombine.high %v6062_v37, %v6069_v60  ;;  %v6106_v52 = vcombine.low %v6082_v10, %v6098_v1  ;;  %v6107_v22 = vcombine.high %v6082_v10, %v6098_v1  ;;  %v5157_v12 = vpop.permute.xlu1 %5156 }
 0xa55   : > { %v6122_v26 = vcombine.low %v6089_v0, %v6105_v36  ;;  %v6123_v42 = vcombine.high %v6089_v0, %v6105_v36  ;;  %8993 = vmatpush3.bf16.msra.mxu1 %v7438_v15  ;;  %v11884_v32 = vrot.slane %v7094_v62, %v9638_v61  ;;  %v11887_v8 = vrot.slane %v8644_v41, %v9638_v61 }
 0xa56   : > { %9013 = vmatpush3.bf16.msra.mxu0 %v7446_v55  ;;  %v7058_v45 = vcombine.low %v11857_v58, %v11860_v47  ;;  %v7074_v35 = vcombine.low %v11866_v11, %v11869_v18  ;;  %v6114_v60 = vrot.slane %v6106_v52, %v9653_v5  ;;  %v6121_v9 = vrot.slane %v6107_v22, %v9653_v5 }
 0xa57   : > { %v6130_v10 = vrot.slane %v6122_v26, %v9653_v5  ;;  %v6137_v0 = vrot.slane %v6123_v42, %v9653_v5  ;;  %8994 = vmatprep.subr.bf16.mxu1 %v12597_v17  ;;  %v11899_v63 = vrot.slane %v7110_v6, %v9638_v61  ;;  %v11902_v44 = vrot.slane %v8645_v59, %v9638_v61 }
 0xa58   : > { %9014 = vmatprep.subr.bf16.mxu0 %v12597_v17  ;;  %v7162_v13 = vcombine.low %v6114_v60, %v6121_v9  ;;  %v8646_v2 = vcombine.high %v6114_v60, %v6121_v9  ;;  %v6142_v23 = vcombine.low %v5093_v38, %v5157_v12  ;;  %v7126_v37 = vcombine.low %v11884_v32, %v11887_v8  ;;  %v5189_v15 = vpop.permute.xlu1 %5188 }
 0xa59   : > { %v6143_v1 = vcombine.high %v5093_v38, %v5157_v12  ;;  %v7178_v36 = vcombine.low %v6130_v10, %v6137_v0  ;;  %v8647_v42 = vcombine.high %v6130_v10, %v6137_v0  ;;  %v7066_v55 = vrot.slane %v7058_v45, %v9653_v5 }
 0xa5a   : > { %v7082_v62 = vrot.slane %v7074_v35, %v9653_v5  ;;  %v6158_v41 = vcombine.low %v5125_v49, %v5189_v15  ;;  %v6159_v6 = vcombine.high %v5125_v49, %v5189_v15  ;;  %v7142_v59 = vcombine.low %v11899_v63, %v11902_v44 }
 0xa5b   : > { %v11912_v52 = vrot.slane %v7162_v13, %v9638_v61  ;;  %v11915_v22 = vrot.slane %v8646_v2, %v9638_v61  ;;  %v6150_v38 = vrot.slane %v6142_v23, %v9638_v61  ;;  %v7134_v26 = vrot.slane %v7126_v37, %v9653_v5 }
 0xa5c   : > { %v6157_v60 = vrot.slane %v6143_v1, %v9638_v61  ;;  %v6166_v45 = vrot.slane %v6158_v41, %v9638_v61  ;;  %v6173_v35 = vrot.slane %v6159_v6, %v9638_v61  ;;  %v7150_v49 = vrot.slane %v7142_v59, %v9653_v5 }
 0xa5d   : > { %v11924_v9 = vrot.slane %v7178_v36, %v9638_v61  ;;  %v11927_v10 = vrot.slane %v8647_v42, %v9638_v61  ;;  %v7090_v0 = vcombine.low %v7066_v55, %v7082_v62  ;;  %v7091_v15 = vcombine.high %v7066_v55, %v7082_v62 }
 0xa5e   : > { %v6174_v12 = vcombine.low %v6150_v38, %v6166_v45  ;;  %v6175_v13 = vcombine.high %v6150_v38, %v6166_v45  ;;  %v6190_v2 = vcombine.low %v6157_v60, %v6173_v35  ;;  %v6191_v23 = vcombine.high %v6157_v60, %v6173_v35 }
 0xa5f   : > { %v7158_v37 = vcombine.low %v7134_v26, %v7150_v49  ;;  %v7159_v1 = vcombine.high %v7134_v26, %v7150_v49  ;;  %v7194_v41 = vcombine.low %v11912_v52, %v11915_v22  ;;  %v7210_v38 = vcombine.low %v11924_v9, %v11927_v10 }
 0xa60   : > { %v6182_v6 = vrot.slane %v6174_v12, %v9653_v5  ;;  %v6189_v59 = vrot.slane %v6175_v13, %v9653_v5  ;;  %v6198_v36 = vrot.slane %v6190_v2, %v9653_v5  ;;  %v6205_v42 = vrot.slane %v6191_v23, %v9653_v5 }
 0xa61   : > { %v7439_v16 = vpack.c.bf16 %v7158_v37, %v7090_v0  ;;  %v7447_v24 = vpack.c.bf16 %v7159_v1, %v7091_v15  ;;  %v6413_v55 = vcombine.high %v11498_v40, %v11681_v54  ;;  %v7202_v13 = vrot.slane %v7194_v41, %v9653_v5 }
 0xa62   : > { %v7230_v62 = vcombine.low %v6182_v6, %v6189_v59  ;;  %v8648_v26 = vcombine.high %v6182_v6, %v6189_v59  ;;  %v7246_v60 = vcombine.low %v6198_v36, %v6205_v42  ;;  %v8649_v45 = vcombine.high %v6198_v36, %v6205_v42 }
 0xa63   : > { %8995 = vmatpush3.bf16.msra.mxu1 %v7439_v16  ;;  %9015 = vmatpush3.bf16.msra.mxu0 %v7447_v24  ;;  %v7218_v2 = vrot.slane %v7210_v38, %v9653_v5  ;;  %v6871_v41 = vcombine.high %v11742_v46, %v11745_v43  ;;  %v6923_v38 = vcombine.high %v11768_v29, %v11771_v57 }
 0xa64   : > { %v7237_v35 = vrot.slane %v7230_v62, %v9638_v61  ;;  %v7245_v49 = vrot.slane %v8648_v26, %v9638_v61  ;;  %v11942_v12 = vrot.slane %v7246_v60, %v9638_v61  ;;  %v11945_v0 = vrot.slane %v8649_v45, %v9638_v61  ;;  %8996 = vmatprep.subr.bf16.mxu1 %v12597_v17 }
 0xa65   : > { %9016 = vmatprep.subr.bf16.mxu0 %v12597_v17  ;;  %v7226_v15 = vcombine.low %v7202_v13, %v7218_v2  ;;  %v7227_v6 = vcombine.high %v7202_v13, %v7218_v2  ;;  %v6855_v62 = vcombine.high %v11736_v56, %v11739_v48  ;;  %v6939_v26 = vcombine.high %v11780_v31, %v11791_v28 }
 0xa66   : > { %v7262_v16 = vcombine.low %v7237_v35, %v7245_v49  ;;  %v7278_v24 = vcombine.low %v11942_v12, %v11945_v0  ;;  %v11969_v56 = vrot.slane %v6871_v41, %v9653_v5  ;;  %v6937_v48 = vrot.slane %v6923_v38, %v9653_v5 }
 0xa67   : > { %v11966_v60 = vrot.slane %v6855_v62, %v9653_v5  ;;  %v6953_v43 = vrot.slane %v6939_v26, %v9653_v5  ;;  %v6991_v46 = vcombine.high %v11825_v19, %v11828_v34  ;;  %v7007_v45 = vcombine.high %v11840_v50, %v11847_v25 }
 0xa68   : > { %v7270_v23 = vrot.slane %v7262_v16, %v9653_v5  ;;  %v7286_v37 = vrot.slane %v7278_v24, %v9653_v5  ;;  %v7059_v2 = vcombine.high %v11857_v58, %v11860_v47  ;;  %v7075_v16 = vcombine.high %v11866_v11, %v11869_v18 }
 0xa69   : > { %v6888_v29 = vcombine.low %v11966_v60, %v11969_v56  ;;  %v6889_v57 = vcombine.high %v11966_v60, %v11969_v56  ;;  %v6956_v31 = vcombine.low %v6937_v48, %v6953_v43  ;;  %v7005_v28 = vrot.slane %v6991_v46, %v9653_v5 }
 0xa6a   : > { %v7294_v1 = vcombine.low %v7270_v23, %v7286_v37  ;;  %v7295_v59 = vcombine.high %v7270_v23, %v7286_v37  ;;  %v6957_v13 = vcombine.high %v6937_v48, %v6953_v43  ;;  %v7021_v19 = vrot.slane %v7007_v45, %v9653_v5  ;;  %v982_v48 = vld [vmem:[%s943_s3] sm:$0x1]  ;;  %v12783_v43 = vld [vmem:[#allocation15_spill] sm:$0xff]  ;;  %s9354_s3 = smov [#allocation4]  }
 0xa6b   : > { %v7127_v34 = vcombine.high %v11884_v32, %v11887_v8  ;;  %v7143_v24 = vcombine.high %v11899_v63, %v11902_v44  ;;  %v7195_v23 = vcombine.high %v11912_v52, %v11915_v22  ;;  %v7073_v50 = vrot.slane %v7059_v2, %v9653_v5 }
 0xa6c   : > { %v7440_v36 = vpack.c.bf16 %v7294_v1, %v7226_v15  ;;  %v7448_v42 = vpack.c.bf16 %v7295_v59, %v7227_v6  ;;  %v7089_v25 = vrot.slane %v7075_v16, %v9653_v5  ;;  %v7211_v58 = vcombine.high %v11924_v9, %v11927_v10 }
 0xa6d   : > { %v7263_v47 = vcombine.high %v7237_v35, %v7245_v49  ;;  %v7024_v11 = vcombine.low %v7005_v28, %v7021_v19  ;;  %v7025_v18 = vcombine.high %v7005_v28, %v7021_v19  ;;  %v7141_v37 = vrot.slane %v7127_v34, %v9653_v5 }
 0xa6e   : > { %8997 = vmatpush3.bf16.msra.mxu1 %v7440_v36  ;;  %9017 = vmatpush3.bf16.msra.mxu0 %v7448_v42  ;;  %v7157_v32 = vrot.slane %v7143_v24, %v9653_v5  ;;  %v7092_v8 = vcombine.low %v7073_v50, %v7089_v25  ;;  %v7093_v15 = vcombine.high %v7073_v50, %v7089_v25  ;;  %vm983_vm10 = vcmp.gt.f32.partialorder %v982_v48, 0.0  ;;  %v12785_v25 = vld [vmem:[#allocation98_spill] sm:$0xff] }
 0xa6f   : > { %8998 = vmatprep.subr.bf16.mxu1 %v12597_v17  ;;  %9018 = vmatprep.subr.bf16.mxu0 %v12597_v17  ;;  %v7209_v63 = vrot.slane %v7195_v23, %v9653_v5  ;;  %v7225_v44 = vrot.slane %v7211_v58, %v9653_v5  ;;  %v12001_v52 = vpack.c.bf16 %v7024_v11, %v6956_v31  ;;  %v12784_v46 = vsub.s32 0, %v12783_v43  ;;  %v12786_v58 = vld [vmem:[#allocation100_spill] sm:$0xff] }
 0xa70   : > { %v12003_v22 = vpack.c.bf16 %v7025_v18, %v6957_v13  ;;  %v7160_v1 = vcombine.low %v7141_v37, %v7157_v32  ;;  %v7161_v9 = vcombine.high %v7141_v37, %v7157_v32  ;;  %v7277_v35 = vrot.slane %v7263_v47, %v9653_v5 }
 0xa71   : > { %v7228_v10 = vcombine.low %v7209_v63, %v7225_v44  ;;  %v7279_v49 = vcombine.high %v11942_v12, %v11945_v0  ;;  %v7229_v6 = vcombine.high %v7209_v63, %v7225_v44  ;;  %v12782_v12 = vmov 0  }
 0xa72   : > { %v12008_v59 = vpack.c.bf16 %v7160_v1, %v7092_v8  ;;  %v12010_v36 = vpack.c.bf16 %v7161_v9, %v7093_v15  ;;  %v7734_v0 = vsel %vm983_vm10, 1, %v12782_v12  ;;  %v12787_v9 = vld [vmem:[#allocation99_spill] sm:$0xff] }
 0xa73   : > { %v7293_v42 = vrot.slane %v7279_v49, %v9653_v5  ;;  %v7738_v31 = vrot.slane %v7734_v0, %v12784_v46  ;;  %v5097_v49 = vpop.permute.xlu1 %5096  ;;  %v12788_v46 = vld [vmem:[#allocation102_spill] sm:$0xff] }
 0xa75   : > { %v7296_v62 = vcombine.low %v7277_v35, %v7293_v42  ;;  %v7297_v41 = vcombine.high %v7277_v35, %v7293_v42  ;;  %vm7739_vm11 = vcmp.eq.s32.totalorder %v7738_v31, 1  ;;  %v12789_v31 = vld [vmem:[#allocation101_spill] sm:$0xff] }
 0xa77   : > { %v12013_v38 = vpack.c.bf16 %v7296_v62, %v7228_v10  ;;  %v12015_v26 = vpack.c.bf16 %v7297_v41, %v7229_v6  ;;  %v5095_v10 = vpop.permute.xlu0 %5094 }
 0xa7b   : > { %v5127_v35 = vpop.permute.xlu0 %5126 }
 0xacc   : > { %v7527_v28 = vpop.f32.mrb[24].mxu1 }
 0xacd   : > { %v7740_v45 = vsel %vm7739_vm11, -1e+18, %v7527_v28  ;;  %v7594_v13 = vpop.f32.mrb[40].mxu0  ;;  %v8922_v2 = vpop.f32.mrb[25].mxu1 }
 0xace   : > { %v7741_v16 = vsel %vm7739_vm11, -1e+18, %v7594_v13  ;;  %v8942_v19 = vpop.f32.mrb[41].mxu0  ;;  %7744 = vmax.xlane.f32.xlu0 %v7740_v45  ;;  %v7530_v34 = vpop.f32.mrb[26].mxu1 }
 0xacf   : > { %7746 = vmax.xlane.f32.xlu1 %v7741_v16  ;;  %v7597_v24 = vpop.f32.mrb[42].mxu0  ;;  %v8923_v23 = vpop.f32.mrb[27].mxu1 }
 0xad0   : > { %v8943_v50 = vpop.f32.mrb[43].mxu0 }
 0xae0   : > { %5128 = vrot.lane.b32.xlu1 %v12785_v25, %s9350_s8 }
 0xae4   : > { %5160 = vrot.lane.b32.xlu1 %v12786_v58, %s9350_s8 }
 0xb10   : > { %v7661_v47 = vpop.f32.mrb[28].mxu1 }
 0xb11   : > { %v7742_v11 = vsel %vm7739_vm11, -1e+18, %v7661_v47  ;;  %v7728_v18 = vpop.f32.mrb[44].mxu0  ;;  %v8962_v37 = vpop.f32.mrb[29].mxu1 }
 0xb12   : > { %v8982_v32 = vpop.f32.mrb[45].mxu0  ;;  %7748 = vmax.xlane.f32.xlu0 %v7742_v11  ;;  %v7664_v8 = vpop.f32.mrb[30].mxu1  ;;  %v7743_v1 = vsel %vm7739_vm11, -1e+18, %v7728_v18 }
 0xb13   : > { %v7731_v15 = vpop.f32.mrb[46].mxu0  ;;  %v8963_v63 = vpop.f32.mrb[31].mxu1 }
 0xb14   : > { %v8983_v44 = vpop.f32.mrb[47].mxu0 }
 0xb16   : > { %7750 = vmax.xlane.f32.xlu0 %v7743_v1 }
 0xb2c   : > { %5158 = vrot.lane.b32.xlu0 %v12787_v9, %s9350_s8 }
 0xb5b   : > { %v7745_v6 = vpop.xlane.xlu0 %7744 }
 0xb5c   : > { %v7747_v42 = vpop.xlane.xlu1 %7746  ;;  %v7752_v62 = vsub.f32 %v7740_v45, %v7745_v6 }
 0xb5d   : > { %v7753_v41 = vsub.f32 %v7741_v16, %v7747_v42 }
 0xb5e   : > { %v7756_v48 = vmul.f32 1.442695, %v7752_v62  ;;  %v6463_v62 = vcombine.high %v11472_v39, %v11475_v30 }
 0xb5f   : > { %v7758_v12 = vmul.f32 1.442695, %v7753_v41 }
 0xb60   : > { %9212 = vpow2.f32 %v7756_v48  ;;  %v5129_v23 = vpop.permute.xlu1 %5128 }
 0xb61   : > { %9214 = vpow2.f32 %v7758_v12 }
 0xb64   : > { %v5161_v25 = vpop.permute.xlu1 %5160 }
 0xb65   : > { %v6279_v32 = vcombine.high %v5097_v49, %v5161_v25 }
 0xb6a   : > { %v12034_v0 = vpop.eup %9212 }
 0xb6b   : > { %v12036_v43 = vpop.eup %9214  ;;  %7764 = vadd.xlane.f32.xlu0 %v12034_v0 }
 0xb6c   : > { %7766 = vadd.xlane.f32.xlu1 %v12036_v43 }
 0xb7d   : > { %5192 = vrot.lane.b32.xlu1 %v12788_v46, %s9350_s8 }
 0xb81   : > { %5190 = vrot.lane.b32.xlu0 %v12789_v31, %s9350_s8  ;;  %s8528_s8 = sshll.u32 %s12071_s4, 2 }
 0xb82   : > { %s12121_s6 = scalar_lea.vmem [#allocation4], %s8528_s8  ;;  %s9234_s8 = sshll.u32 %s9354_s3, 4  ;;  %s9235_s8 = int_to_ptr.vmem [resolvable:$false] %s9234_s8 }
 0xb83   : > { %s8376_s9 = sshll.u32 %s12121_s6, 4  ;;  %s9236_s12 = scalar_lea.vmem %s9235_s8, 128  ;;  %s8377_s9 = int_to_ptr.vmem [resolvable:$true] %s8376_s9 }
 0xb84   : > { %s9230_s7 = scalar_lea.vmem %s8377_s9, 64  ;;  %p9237_p1 = scmp.lt.s32.totalorder %s8377_s9, %s9235_s8 }
 0xb85   : > { %p9231_p12 = scmp.ne.s32.totalorder %s8377_s9, %s9230_s7  ;;  %p9238_p2 = scmp.lt.s32.totalorder %s9236_s12, %s9230_s7 }
 0xb87   : > { %p9232_p13 = pnand %p9231_p12, %p9541_p4  ;;  %p9239_p3 = por %p9238_p2, %p9237_p1 }
 0xb89   : > { %p9233_p0 = pneg %p9232_p13 }
 0xb8b   : > { %p9240_p5 = pnand %p9239_p3, %p9233_p0 }
 0xb9f   : > { %v7749_v28 = vpop.xlane.xlu0 %7748 }
 0xba0   : > { %v7754_v45 = vsub.f32 %v7742_v11, %v7749_v28  ;;  %v6278_v11 = vcombine.low %v5097_v49, %v5161_v25 }
 0xba2   : > { %v7760_v13 = vmul.f32 1.442695, %v7754_v45  ;;  %v6286_v9 = vrot.slane %v6278_v11, %v9638_v61 }
 0xba3   : > { %v7751_v2 = vpop.xlane.xlu0 %7750 }
 0xba4   : > { %9216 = vpow2.f32 %v7760_v13  ;;  %v7755_v16 = vsub.f32 %v7743_v1, %v7751_v2  ;;  %v6447_v1 = vcombine.high %v11466_v7, %v11469_v53 }
 0xba6   : > { %v7762_v19 = vmul.f32 1.442695, %v7755_v16 }
 0xba7   : > { %v5159_v50 = vpop.permute.xlu0 %5158 }
 0xba8   : > { %9218 = vpow2.f32 %v7762_v19  ;;  %v6210_v18 = vcombine.low %v5095_v10, %v5159_v50  ;;  %v6211_v37 = vcombine.high %v5095_v10, %v5159_v50 }
 0xbaa   : > { %v6218_v41 = vrot.slane %v6210_v18, %v9638_v61  ;;  %v6225_v10 = vrot.slane %v6211_v37, %v9638_v61 }
 0xbae   : > { %v12044_v34 = vpop.eup %9216 }
 0xbaf   : > { %7768 = vadd.xlane.f32.xlu0 %v12044_v34 }
 0xbb2   : > { %v12047_v24 = vpop.eup %9218 }
 0xbb3   : > { %7770 = vadd.xlane.f32.xlu1 %v12047_v24 }
 0xbf8   : > { %v7765_v58 = vpop.xlane.xlu0 %7764 }
 0xbf9   : > { %v7767_v47 = vpop.xlane.xlu1 %7766  ;;  %9220 = vrcp.f32 %v7765_v58 }
 0xbfa   : > { %9222 = vrcp.f32 %v7767_v47 }
 0xbfc   : > { %v5191_v8 = vpop.permute.xlu0 %5190 }
 0xbfd   : > { %v5193_v15 = vpop.permute.xlu1 %5192  ;;  %v6226_v63 = vcombine.low %v5127_v35, %v5191_v8  ;;  %v6227_v44 = vcombine.high %v5127_v35, %v5191_v8  ;;  %v6293_v35 = vrot.slane %v6279_v32, %v9638_v61 }
 0xbfe   : > { %v6294_v6 = vcombine.low %v5129_v23, %v5193_v15  ;;  %v6295_v42 = vcombine.high %v5129_v23, %v5193_v15 }
 0xbff   : > { %v6234_v49 = vrot.slane %v6226_v63, %v9638_v61  ;;  %v6241_v48 = vrot.slane %v6227_v44, %v9638_v61 }
 0xc00   : > { %v6302_v7 = vrot.slane %v6294_v6, %v9638_v61  ;;  %v6309_v53 = vrot.slane %v6295_v42, %v9638_v61 }
 0xc01   : > { %v6242_v12 = vcombine.low %v6218_v41, %v6234_v49  ;;  %v6243_v46 = vcombine.high %v6218_v41, %v6234_v49  ;;  %v6258_v31 = vcombine.low %v6225_v10, %v6241_v48  ;;  %v6259_v39 = vcombine.high %v6225_v10, %v6241_v48 }
 0xc02   : > { %v6310_v30 = vcombine.low %v6286_v9, %v6302_v7  ;;  %v6311_v28 = vcombine.high %v6286_v9, %v6302_v7  ;;  %v6326_v45 = vcombine.low %v6293_v35, %v6309_v53  ;;  %v6327_v13 = vcombine.high %v6293_v35, %v6309_v53 }
 0xc03   : > { %v6250_v2 = vrot.slane %v6242_v12, %v9653_v5  ;;  %v6257_v16 = vrot.slane %v6243_v46, %v9653_v5  ;;  %v6266_v19 = vrot.slane %v6258_v31, %v9653_v5  ;;  %v6273_v23 = vrot.slane %v6259_v39, %v9653_v5  ;;  %v9221_v8 = vpop.eup %9220 }
 0xc04   : > { %v6318_v50 = vrot.slane %v6310_v30, %v9653_v5  ;;  %v6325_v25 = vrot.slane %v6311_v28, %v9653_v5  ;;  %v6334_v58 = vrot.slane %v6326_v45, %v9653_v5  ;;  %v6341_v47 = vrot.slane %v6327_v13, %v9653_v5  ;;  %v9223_v39 = vpop.eup %9222 }
 0xc05   : > { %v7298_v11 = vcombine.low %v6250_v2, %v6257_v16  ;;  %v8650_v18 = vcombine.high %v6250_v2, %v6257_v16  ;;  %v7314_v37 = vcombine.low %v6266_v19, %v6273_v23  ;;  %v8651_v32 = vcombine.high %v6266_v19, %v6273_v23 }
 0xc06   : > { %v7366_v15 = vcombine.low %v6318_v50, %v6325_v25  ;;  %v8652_v63 = vcombine.high %v6318_v50, %v6325_v25  ;;  %v7382_v44 = vcombine.low %v6334_v58, %v6341_v47  ;;  %v8653_v9 = vcombine.high %v6334_v58, %v6341_v47 }
 0xc07   : > { %v12074_v6 = vrot.slane %v7298_v11, %v9638_v61  ;;  %v12077_v42 = vrot.slane %v8650_v18, %v9638_v61  ;;  %v12080_v41 = vrot.slane %v7314_v37, %v9638_v61  ;;  %v12083_v10 = vrot.slane %v8651_v32, %v9638_v61 }
 0xc08   : > { %v12087_v49 = vrot.slane %v7366_v15, %v9638_v61  ;;  %v12090_v48 = vrot.slane %v8652_v63, %v9638_v61  ;;  %v12093_v35 = vrot.slane %v7382_v44, %v9638_v61  ;;  %v12096_v7 = vrot.slane %v8653_v9, %v9638_v61  ;;  %v12794_v9 = vld [vmem:[#allocation31_spill] sm:$0xff] }
 0xc09   : > { %v7330_v53 = vcombine.low %v12074_v6, %v12077_v42  ;;  %v7346_v12 = vcombine.low %v12080_v41, %v12083_v10  ;;  %v7776_v46 = vmul.f32 %v9221_v8, %v12034_v0  ;;  %v6461_v31 = vrot.slane %v6447_v1, %v9653_v5 }
 0xc0a   : > { %v7398_v30 = vcombine.low %v12087_v49, %v12090_v48  ;;  %v7414_v28 = vcombine.low %v12093_v35, %v12096_v7  ;;  %v6477_v45 = vrot.slane %v6463_v62, %v9653_v5  ;;  %v6583_v13 = vcombine.high %v11557_v33, %v11560_v20 }
 0xc0b   : > { %v7338_v2 = vrot.slane %v7330_v53, %v9653_v5  ;;  %v7354_v16 = vrot.slane %v7346_v12, %v9653_v5  ;;  %v7780_v19 = vpack.c.bf16 %v7776_v46, %v7776_v46  ;;  %v6599_v0 = vcombine.high %v11563_v14, %v11566_v3  ;;  %v12795_v53 = vld [vmem:[#allocation30_spill] sm:$0xff]  ;;  %v12797_v46 = vld [vmem:[#allocation17_spill] sm:$0xff] }
 0xc0c   : > { %v7406_v1 = vrot.slane %v7398_v30, %v9653_v5  ;;  %v7422_v23 = vrot.slane %v7414_v28, %v9653_v5  ;;  %v6515_v62 = vcombine.high %v11501_v4, %v11504_v27  ;;  %v6531_v33 = vcombine.high %v11507_v21, %v11510_v51  ;;  %v12790_v4 = vld [vmem:[#allocation35_spill] sm:$0xff]  ;;  %v12791_v27 = vld [vmem:[#allocation34_spill] sm:$0xff]  ;;  %v12793_v51 = vld [vmem:[#allocation37_spill] sm:$0xff] }
 0xc0d   : > { %v7362_v50 = vcombine.low %v7338_v2, %v7354_v16  ;;  %v7363_v25 = vcombine.high %v7338_v2, %v7354_v16  ;;  %8341 = vst [vmem:[%s12121_s6] sm:$0xf] %v7780_v19  ;;  %v6480_v47 = vcombine.low %v6461_v31, %v6477_v45  ;;  %v7777_v14 = vmul.f32 %v9223_v39, %v12036_v43  ;;  %v12792_v21 = vld [vmem:[#allocation38_spill] sm:$0xff] }
 0xc0e   : > { %v7430_v20 = vcombine.low %v7406_v1, %v7422_v23  ;;  %v7431_v58 = vcombine.high %v7406_v1, %v7422_v23  ;;  %v6481_v3 = vcombine.high %v6461_v31, %v6477_v45  ;;  %v6597_v11 = vrot.slane %v6583_v13, %v9653_v5  ;;  %v12796_v12 = vld [vmem:[#allocation18_spill] sm:$0xff] }
 0xc0f   : > { %v6613_v18 = vrot.slane %v6599_v0, %v9653_v5  ;;  %v6719_v8 = vcombine.high %v12791_v27, %v12790_v4  ;;  %v6735_v15 = vcombine.high %v12793_v51, %v12792_v21  ;;  %v6529_v63 = vrot.slane %v6515_v62, %v9653_v5  ;;  %v12799_v62 = vld [vmem:[#allocation40_spill] sm:$0xff] }
 0xc10   : > { %v7441_v37 = vpack.c.bf16 %v7430_v20, %v7362_v50  ;;  %v7449_v32 = vpack.c.bf16 %v7431_v58, %v7363_v25  ;;  %v6545_v44 = vrot.slane %v6531_v33, %v9653_v5  ;;  %v6651_v43 = vcombine.high %v12795_v53, %v12794_v9  ;;  %v12800_v33 = vld [vmem:[#allocation39_spill] sm:$0xff] }
 0xc11   : > { %v6667_v31 = vcombine.high %v12797_v46, %v12796_v12  ;;  %v7781_v39 = vpack.c.bf16 %v7777_v14, %v7777_v14  ;;  %v12798_v30 = vcombine.low %v11498_v40, %v11681_v54  ;;  %v6616_v45 = vcombine.low %v6597_v11, %v6613_v18  ;;  %v12801_v40 = vld [vmem:[#allocation20_spill] sm:$0xff]  ;;  %v12802_v54 = vld [vmem:[#allocation19_spill] sm:$0xff] }
 0xc12   : > { %8999 = vmatpush3.bf16.msra.mxu1 %v7441_v37  ;;  %9019 = vmatpush3.bf16.msra.mxu0 %v7449_v32  ;;  %v7458_v13 = vpack.c.bf16 %v6481_v3, %v6413_v55  ;;  %v6617_v2 = vcombine.high %v6597_v11, %v6613_v18  ;;  %v6733_v16 = vrot.slane %v6719_v8, %v9653_v5 }
 0xc13   : > { %9024 = vmatprep.subr.bf16.mxu1 %v12597_v17  ;;  %9044 = vmatprep.subr.bf16.mxu0 %v12597_v17  ;;  %v7450_v28 = vpack.c.bf16 %v6480_v47, %v12798_v30  ;;  %v6749_v0 = vrot.slane %v6735_v15, %v9653_v5  ;;  %v6548_v1 = vcombine.low %v6529_v63, %v6545_v44 }
 0xc14   : > { %v6665_v23 = vrot.slane %v6651_v43, %v9653_v5  ;;  %v6681_v50 = vrot.slane %v6667_v31, %v9653_v5  ;;  %v6549_v25 = vcombine.high %v6529_v63, %v6545_v44  ;;  %v6787_v20 = vcombine.high %v12800_v33, %v12799_v62 }
 0xc15   : > { %9001 = vmatmul.mubr.bf16.vlgmr.msra.gmra.mrb[32].mxu1 %v7780_v19  ;;  %9021 = vmatmul.mubr.bf16.vlgmr.msra.gmra.mrb[48].mxu0 %v7781_v39  ;;  %v6803_v55 = vcombine.high %v12802_v54, %v12801_v40  ;;  %v7451_v19 = vpack.c.bf16 %v6616_v45, %v6548_v1  ;;  %v6752_v47 = vcombine.low %v6733_v16, %v6749_v0 }
 0xc16   : > { %9025 = vmatpush3.bf16.msra.mxu1 %v7450_v28  ;;  %9045 = vmatpush3.bf16.msra.mxu0 %v7458_v13  ;;  %v7459_v58 = vpack.c.bf16 %v6617_v2, %v6549_v25  ;;  %v6753_v14 = vcombine.high %v6733_v16, %v6749_v0  ;;  %v6684_v3 = vcombine.low %v6665_v23, %v6681_v50 }
 0xc17   : > { %9026 = vmatprep.subr.bf16.mxu1 %v12597_v17  ;;  %9046 = vmatprep.subr.bf16.mxu0 %v12597_v17  ;;  %v6685_v11 = vcombine.high %v6665_v23, %v6681_v50  ;;  %v6801_v18 = vrot.slane %v6787_v20, %v9653_v5  ;;  %v6817_v37 = vrot.slane %v6803_v55, %v9653_v5 }
 0xc18   : > { %9040 = vmatprep.mubr.msk.bf16.mxu1 %vm9343_vm1, %v12597_v17  ;;  %9060 = vmatprep.mubr.msk.bf16.mxu0 %vm9343_vm1, %v12597_v17  ;;  %v7452_v32 = vpack.c.bf16 %v6752_v47, %v6684_v3  ;;  %v7331_v15 = vcombine.high %v12074_v6, %v12077_v42  ;;  %v7347_v63 = vcombine.high %v12080_v41, %v12083_v10 }
 0xc19   : > { %v7460_v4 = vpack.c.bf16 %v6753_v14, %v6685_v11  ;;  %v6820_v27 = vcombine.low %v6801_v18, %v6817_v37  ;;  %v6821_v8 = vcombine.high %v6801_v18, %v6817_v37  ;;  %v7399_v44 = vcombine.high %v12087_v49, %v12090_v48  ;;  %v9182_v14 = vld [vmem:[%s12384_s21] sm:$0xff]  }
 0xc1a   : > { %9027 = vmatpush3.bf16.msra.mxu1 %v7451_v19  ;;  %9047 = vmatpush3.bf16.msra.mxu0 %v7459_v58  ;;  %v7345_v60 = vrot.slane %v7331_v15, %v9653_v5  ;;  %v7361_v56 = vrot.slane %v7347_v63, %v9653_v5 }
 0xc1b   : > { %9028 = vmatprep.subr.bf16.mxu1 %v12597_v17  ;;  %9048 = vmatprep.subr.bf16.mxu0 %v12597_v17  ;;  %v7453_v21 = vpack.c.bf16 %v6888_v29, %v6820_v27  ;;  %v7461_v51 = vpack.c.bf16 %v6889_v57, %v6821_v8  ;;  %v7415_v29 = vcombine.high %v12093_v35, %v12096_v7 }
 0xc1c   : > { %v7413_v57 = vrot.slane %v7399_v44, %v9653_v5  ;;  %v7365_v42 = vcombine.high %v7345_v60, %v7361_v56  ;;  %v9183_v44 = vld [vmem:[%s12384_s21 + $0x8] sm:$0xff]  }
 0xc1d   : > { %v7429_v6 = vrot.slane %v7415_v29, %v9653_v5 }
 0xc1e   : > { %9029 = vmatpush3.bf16.msra.mxu1 %v7452_v32  ;;  %9049 = vmatpush3.bf16.msra.mxu0 %v7460_v4 }
 0xc1f   : > { %9030 = vmatprep.subr.bf16.mxu1 %v12597_v17  ;;  %9050 = vmatprep.subr.bf16.mxu0 %v12597_v17  ;;  %v7433_v41 = vcombine.high %v7413_v57, %v7429_v6 }
 0xc22   : > { %9031 = vmatpush3.bf16.msra.mxu1 %v7453_v21  ;;  %9051 = vmatpush3.bf16.msra.mxu0 %v7461_v51 }
 0xc23   : > { %9032 = vmatprep.subr.bf16.mxu1 %v12597_v17  ;;  %9052 = vmatprep.subr.bf16.mxu0 %v12597_v17 }
 0xc26   : > { %9033 = vmatpush3.bf16.msra.mxu1 %v12001_v52  ;;  %9053 = vmatpush3.bf16.msra.mxu0 %v12003_v22  ;;  %v7364_v52 = vcombine.low %v7345_v60, %v7361_v56  ;;  %v7432_v22 = vcombine.low %v7413_v57, %v7429_v6 }
 0xc27   : > { %9034 = vmatprep.subr.bf16.mxu1 %v12597_v17  ;;  %9054 = vmatprep.subr.bf16.mxu0 %v12597_v17 }
 0xc28   : > { %v7457_v10 = vpack.c.bf16 %v7432_v22, %v7364_v52 }
 0xc2a   : > { %9035 = vmatpush3.bf16.msra.mxu1 %v12008_v59  ;;  %9055 = vmatpush3.bf16.msra.mxu0 %v12010_v36  ;;  %v7465_v59 = vpack.c.bf16 %v7433_v41, %v7365_v42 }
 0xc2b   : > { %9036 = vmatprep.subr.bf16.mxu1 %v12597_v17  ;;  %9056 = vmatprep.subr.bf16.mxu0 %v12597_v17 }
 0xc2e   : > { %9037 = vmatpush3.bf16.msra.mxu1 %v12013_v38  ;;  %9057 = vmatpush3.bf16.msra.mxu0 %v12015_v26 }
 0xc2f   : > { %9038 = vmatprep.subr.bf16.mxu1 %v12597_v17  ;;  %9058 = vmatprep.subr.bf16.mxu0 %v12597_v17 }
 0xc32   : > { %9039 = vmatpush3.bf16.msra.mxu1 %v7457_v10  ;;  %9059 = vmatpush3.bf16.msra.mxu0 %v7465_v59 }
 0xc33   : > { %9064 = vmatprep.subr.bf16.mxu1 %v12597_v17  ;;  %9072 = vmatprep.subr.bf16.mxu0 %v12597_v17 }
 0xc3c   : > { %v7769_v36 = vpop.xlane.xlu0 %7768 }
 0xc3d   : > { %9224 = vrcp.f32 %v7769_v36 }
 0xc40   : > { %v7771_v49 = vpop.xlane.xlu1 %7770 }
 0xc41   : > { %9226 = vrcp.f32 %v7771_v49 }
 0xc47   : > { %v9225_v48 = vpop.eup %9224 }
 0xc48   : > { %v7778_v38 = vmul.f32 %v9225_v48, %v12044_v34 }
 0xc4a   : > { %v7782_v26 = vpack.c.bf16 %v7778_v38, %v7778_v38 }
 0xc4b   : > { %v9227_v35 = vpop.eup %9226 }
 0xc4c   : > { %9041 = vmatmul.mubr.bf16.vlgmr.msra.gmra.mrb[36].mxu1 %v7782_v26  ;;  %v7779_v7 = vmul.f32 %v9227_v35, %v12047_v24 }
 0xc4d   : > { %9068 = vmatprep.mubr.msk.bf16.mxu1 %vm9343_vm1, %v12597_v17  ;;  %9065 = vmatpush3.bf16.msra.mxu1 %v9182_v14  ;;  %v8666_v14 = vld [vmem:[%s12387_s24] ss:$0 sm:$0xff] }
 0xc4e   : > { %v7783_v9 = vpack.c.bf16 %v7779_v7, %v7779_v7  ;;  %9066 = vmatprep.subr.bf16.mxu1 %v12597_v17  ;;  %v8660_v7 = vld [vmem:[%s12385_s22] ss:$0 sm:$0xff] }
 0xc50   : > { %9061 = vmatmul.mubr.bf16.vlgmr.msra.gmra.mrb[52].mxu0 %v7783_v9 }
 0xc51   : > { %9076 = vmatprep.mubr.msk.bf16.mxu0 %vm9343_vm1, %v12597_v17  ;;  %9067 = vmatpush3.bf16.msra.mxu1 %v9183_v44 }
 0xc52   : > { %9080 = vmatprep.subr.bf16.mxu1 %v12597_v17 }
 0xce8   : > { %v7818_v53 = vpop.f32.mrb[32].mxu1  ;;  %v7858_v43 = vpop.f32.mrb[48].mxu0 }
 0xce9   : > { %v9002_v12 = vpop.f32.mrb[33].mxu1  ;;  %v9022_v46 = vpop.f32.mrb[49].mxu0 }
 0xcea   : > { %v7821_v31 = vpop.f32.mrb[34].mxu1  ;;  %v7861_v39 = vpop.f32.mrb[50].mxu0  ;;  %v12803_v46 = vld [vmem:[#allocation16_spill] sm:$0xff] }
 0xceb   : > { %v9003_v34 = vpop.f32.mrb[35].mxu1  ;;  %v9023_v30 = vpop.f32.mrb[51].mxu0 }
 0xd1f   : > { %v7898_v28 = vpop.f32.mrb[36].mxu1 }
 0xd20   : > { %v7944_v45 = vcombine.low %v7818_v53, %v7898_v28  ;;  %v7945_v13 = vcombine.high %v7818_v53, %v7898_v28  ;;  %v9042_v24 = vpop.f32.mrb[37].mxu1 }
 0xd21   : > { %v7901_v2 = vpop.f32.mrb[38].mxu1 }
 0xd22   : > { %v9043_v16 = vpop.f32.mrb[39].mxu1  ;;  %v7952_v62 = vrot.slane %v7944_v45, %v9638_v61  ;;  %v7959_v33 = vrot.slane %v7945_v13, %v9638_v61  ;;  %v9184_v2 = vld [vmem:[%s12386_s23] sm:$0xff]  }
 0xd23   : > { %v7938_v0 = vpop.f32.mrb[52].mxu0  ;;  %9073 = vmatpush3.bf16.msra.mxu0 %v9184_v2  ;;  %v9185_v16 = vld [vmem:[%s12386_s23 + $0x8] sm:$0xff]  }
 0xd24   : > { %v7960_v1 = vcombine.low %v7858_v43, %v7938_v0  ;;  %v7961_v23 = vcombine.high %v7858_v43, %v7938_v0  ;;  %v9062_v50 = vpop.f32.mrb[53].mxu0  ;;  %9074 = vmatprep.subr.bf16.mxu0 %v12597_v17  ;;  %v9186_v0 = vld [vmem:[%s12388_s25] sm:$0xff]  }
 0xd25   : > { %v7941_v25 = vpop.f32.mrb[54].mxu0 }
 0xd26   : > { %v7968_v20 = vrot.slane %v7960_v1, %v9638_v61  ;;  %v7975_v40 = vrot.slane %v7961_v23, %v9638_v61  ;;  %v9063_v54 = vpop.f32.mrb[55].mxu0  ;;  %v9187_v1 = vld [vmem:[%s12388_s25 + $0x8] sm:$0xff]  }
 0xd27   : > { %9075 = vmatpush3.bf16.msra.mxu0 %v9185_v16 }
 0xd28   : > { %v7976_v55 = vcombine.low %v7952_v62, %v7968_v20  ;;  %v7977_v19 = vcombine.high %v7952_v62, %v7968_v20  ;;  %v7992_v58 = vcombine.low %v7959_v33, %v7975_v40  ;;  %v7993_v47 = vcombine.high %v7959_v33, %v7975_v40 }
 0xd2a   : > { %v7984_v3 = vrot.slane %v7976_v55, %v9653_v5  ;;  %v7991_v11 = vrot.slane %v7977_v19, %v9653_v5  ;;  %v8000_v18 = vrot.slane %v7992_v58, %v9653_v5  ;;  %v8007_v37 = vrot.slane %v7993_v47, %v9653_v5  ;;  %v9188_v58 = vld [vmem:[%s12388_s25 + $0x10] sm:$0xff]   ;;  %v9189_v47 = vld [vmem:[%s12388_s25 + $0x18] sm:$0xff]  }
 0xd2c   : > { %v8012_v32 = vcombine.low %v7984_v3, %v7991_v11  ;;  %v8658_v4 = vcombine.high %v7984_v3, %v7991_v11  ;;  %v8028_v27 = vcombine.low %v8000_v18, %v8007_v37  ;;  %v8659_v8 = vcombine.high %v8000_v18, %v8007_v37 }
 0xd2e   : > { %v8019_v21 = vrot.slane %v8012_v32, %v9638_v61  ;;  %v8027_v51 = vrot.slane %v8658_v4, %v9638_v61  ;;  %v8035_v15 = vrot.slane %v8028_v27, %v9638_v61  ;;  %v8043_v63 = vrot.slane %v8659_v8, %v9638_v61 }
 0xd30   : > { %v8045_v29 = vcombine.high %v8019_v21, %v8027_v51  ;;  %v8061_v60 = vcombine.high %v8035_v15, %v8043_v63  ;;  %v8044_v56 = vcombine.low %v8019_v21, %v8027_v51  ;;  %v8060_v57 = vcombine.low %v8035_v15, %v8043_v63 }
 0xd32   : > { %v8059_v6 = vrot.slane %v8045_v29, %v9653_v5  ;;  %v8075_v52 = vrot.slane %v8061_v60, %v9653_v5  ;;  %v8052_v22 = vrot.slane %v8044_v56, %v9653_v5  ;;  %v8068_v42 = vrot.slane %v8060_v57, %v9653_v5 }
 0xd34   : > { %v8078_v61 = vcombine.low %v8059_v6, %v8075_v52  ;;  %v8077_v41 = vcombine.high %v8052_v22, %v8068_v42  ;;  %v8079_v10 = vcombine.high %v8059_v6, %v8075_v52  ;;  %v8076_v59 = vcombine.low %v8052_v22, %v8068_v42 }
 0xd36   : > { %8085 = vrot.lane.b32.xlu1 %v8078_v61, %s9351_s29  ;;  %8081 = vrot.lane.b32.xlu0 %v8077_v41, %s9352_s26  ;;  %s12804_s29 = sld [smem:[#allocation112_spill]]  ;;  %s12806_s26 = sld [smem:[#allocation118_spill]] }
 0xd3a   : > { %8089 = vrot.lane.b32.xlu0 %v8079_v10, %s9353_s27  ;;  %s12805_s27 = sld [smem:[#allocation113_spill]] }
 0xd3c   : > { %v8664_v33 = vld [vmem:[%s12804_s29] ss:$0 sm:$0xff] }
 0xd40   : > { %v8665_v40 = vld [vmem:[%s12805_s27] ss:$0 sm:$0xff]  ;;  %s12285_s27 = scalar_lea.hbm %s12806_s26, %s8679_s1 }
 0xda8   : > { %v8082_v36 = vpop.permute.xlu0 %8081  ;;  %v8086_v49 = vpop.permute.xlu1 %8085 }
 0xda9   : > { %v8092_v48 = vsel %vm1622_vm2, %v8076_v59, %v8082_v36 }
 0xdaa   : > { %v8093_v26 = vsel %vm2195_vm8, %v8092_v48, %v8086_v49 }
 0xdac   : > { %v8090_v38 = vpop.permute.xlu0 %8089 }
 0xdad   : > { %v8094_v35 = vsel %vm2197_vm9, %v8093_v26, %v8090_v38 }
 0xdae   : > { %v8095_v5 = vpack.c.bf16 %v8094_v35, %v8094_v35 }
 0xdb0   : > { %9069 = vmatmul.mubr.msk.bf16.vlgmr.msra.gmra.mrb[40].mxu1 %vm986_vm0, %v8095_v5 }
 0xdb1   : > { %9088 = vmatprep.mubr.msk.bf16.mxu1 %vm9343_vm1, %v12597_v17  ;;  %9081 = vmatpush3.bf16.msra.mxu1 %v9186_v0 }
 0xdb2   : > { %9082 = vmatprep.subr.bf16.mxu1 %v12597_v17 }
 0xdb5   : > { %9083 = vmatpush3.bf16.msra.mxu1 %v9187_v1 }
 0xdb6   : > { %9084 = vmatprep.subr.bf16.mxu1 %v12597_v17 }
 0xdb9   : > { %9085 = vmatpush3.bf16.msra.mxu1 %v9188_v58 }
 0xdba   : > { %9086 = vmatprep.subr.bf16.mxu1 %v12597_v17 }
 0xdbd   : > { %9087 = vmatpush3.bf16.msra.mxu1 %v9189_v47 }
 0xe83   : > { %v8151_v9 = vpop.f32.mrb[40].mxu1 }
 0xe84   : > { %v8152_v53 = vadd.f32 %v8660_v7, %v8151_v9  ;;  %v9070_v43 = vpop.f32.mrb[41].mxu1 }
 0xe85   : > { %v8154_v12 = vpop.f32.mrb[42].mxu1 }
 0xe86   : > { %v12242_v31 = vadd.f32 %v8152_v53, %v12803_v46  ;;  %v9071_v39 = vpop.f32.mrb[43].mxu1 }
 0xe88   : > { %v8160_v34 = vsel %vm986_vm0, %v12242_v31, 0.0 }
 0xe89   : > { %8161 = vadd.xlane.f32.xlu1 %v8160_v34 }
 0xf16   : > { %v8162_v30 = vpop.xlane.xlu1 %8161 }
 0xf17   : > { %v8163_v28 = vmul.f32 0.03125, %v8162_v30 }
 0xf19   : > { %v8164_v45 = vsub.f32 %v12242_v31, %v8163_v28 }
 0xf1b   : > { %v8165_v13 = vmul.f32 %v8164_v45, %v8164_v45 }
 0xf1d   : > { %v8166_v24 = vsel %vm986_vm0, %v8165_v13, 0.0 }
 0xf1e   : > { %8167 = vadd.xlane.f32.xlu0 %v8166_v24 }
 0xfab   : > { %v8168_v23 = vpop.xlane.xlu0 %8167 }
 0xfac   : > { %v8169_v50 = vmul.f32 0.03125, %v8168_v23 }
 0xfae   : > { %v8170_v25 = vadd.f32 1e-06, %v8169_v50 }
 0xfb0   : > { %9228 = vrsqrt.f32 %v8170_v25 }
 0xfba   : > { %v9229_v62 = vpop.eup %9228 }
 0xfbb   : > { %v8172_v20 = vmul.f32 %v9229_v62, %v8164_v45 }
 0xfbd   : > { %v8179_v54 = vmul.f32 %v8664_v33, %v8172_v20 }
 0xfbf   : > { %v8186_v55 = vadd.f32 %v8665_v40, %v8179_v54 }
 0xfc1   : > { %v8187_v19 = vpack.c.bf16 %v8186_v55, %v8186_v55 }
 0xfc3   : > { %9077 = vmatmul.mubr.msk.bf16.vlgmr.msra.gmra.mrb[56].mxu0 %vm986_vm0, %v8187_v19 }
0x1096   : > { %v8248_v3 = vpop.f32.mrb[56].mxu0 }
0x1097   : > { %v8249_v11 = vadd.f32 %v8666_v14, %v8248_v3  ;;  %v9078_v18 = vpop.f32.mrb[57].mxu0 }
0x1098   : > { %v8251_v37 = vpop.f32.mrb[58].mxu0 }
0x1099   : > { %v8254_v32 = vmax.f32 %v8249_v11, 0.0  ;;  %v9079_v4 = vpop.f32.mrb[59].mxu0 }
0x109b   : > { %v8255_v27 = vpack.c.bf16 %v8254_v32, %v8254_v32 }
0x109d   : > { %9089 = vmatmul.mubr.msk.bf16.vlgmr.msra.gmra.mrb[44].mxu1 %vm8295_vm12, %v8255_v27 }
0x109e   : > { %9243 = shalt.err (!%p9240_p5)
}
0x109f   : > { %s9244_s6 = scalar_lea.hbm %s12285_s27, 64  ;;  %s9248_s29 = scalar_lea.hbm %s12806_s26, 128 }
0x10a0   : > { %p9245_p6 = scmp.ne.s32.totalorder %s12285_s27, %s9244_s6  ;;  %p9249_p10 = scmp.lt.u32.totalorder %s12285_s27, %s12806_s26 }
0x10a1   : > { %p9250_p11 = scmp.lt.u32.totalorder %s9248_s29, %s9244_s6  ;;  %p9252_p13 = scmp.lt.u32.totalorder %s9244_s6, %s12285_s27 }
0x10a2   : > { %p9246_p7 = pnand %p9245_p6, %p9541_p4 }
0x10a3   : > { %p9251_p12 = por %p9250_p11, %p9249_p10 }
0x10a4   : > { %p9247_p9 = pneg %p9246_p7 }
0x10a5   : > { %p9253_p0 = por %p9252_p13, %p9251_p12 }
0x10a7   : > { %p9254_p1 = pnand %p9253_p0, %p9247_p9 }
0x10a9   : > { %9257 = shalt.err (!%p9254_p1)
}
0x10aa   : > { %9093 = dma.vmem_to_hbm [thread:$0]  (%p9541_p4), %s8377_s9, 64, %s12285_s27, %s8348_s0  }
0x10ab   : > { %s8527_s7 = sshll.u32 %s12071_s4, 3  ;;  %s12807_s28 = sld [smem:[#allocation116_spill]] }
0x10ac   : > { %s8678_s1 = sshll.u32 %s9332_s30, 7  ;;  %s914_s29 = scalar_lea.vmem [#allocation2], %s8527_s7 }
0x10ad   : > { %s8362_s6 = sshll.u32 %s914_s29, 4  ;;  %s12808_s11 = sld [smem:[#allocation117_spill]]  ;;  %s12316_s6 = int_to_ptr.vmem [resolvable:$true] %s8362_s6 }
0x10ae   : > { %s8343_s30 = scalar_lea.sflag [#allocation3], %s12071_s4  ;;  %s9258_s27 = scalar_lea.vmem %s12316_s6, 128 }
0x10af   : > { %p9259_p2 = scmp.ne.s32.totalorder %s12316_s6, %s9258_s27  ;;  %s9355_s0 = smov [#allocation2]  }
0x10b0   : > { %s9262_s7 = sshll.u32 %s9355_s0, 4  ;;  %s9263_s7 = int_to_ptr.vmem [resolvable:$false] %s9262_s7 }
0x10b1   : > { %v8670_v17 = vld [vmem:[%s12807_s28] ss:$0 sm:$0xff]  ;;  %p9260_p3 = pnand %p9259_p2, %p9541_p4  ;;  %s9264_s8 = scalar_lea.vmem %s9263_s7, 256 }
0x10b2   : > { %p9265_p6 = scmp.lt.s32.totalorder %s12316_s6, %s9263_s7  ;;  %p9266_p7 = scmp.lt.s32.totalorder %s9264_s8, %s9258_s27 }
0x10b3   : > { %s12314_s9 = scalar_lea.hbm %s12808_s11, %s8678_s1  ;;  %p9261_p5 = pneg %p9260_p3 }
0x10b4   : > { %p9267_p9 = por %p9266_p7, %p9265_p6 }
0x10b6   : > { %p9268_p10 = pnand %p9267_p9, %p9261_p5 }
0x1170   : > { %v8333_v8 = vpop.f32.mrb[44].mxu1 }
0x1171   : > { %v8334_v21 = vadd.f32 %v8670_v17, %v8333_v8  ;;  %v9090_v51 = vpop.f32.mrb[45].mxu1 }
0x1172   : > { %v8336_v15 = vpop.f32.mrb[46].mxu1 }
0x1173   : > { %v8339_v63 = vadd.f32 %v8334_v21, %v12242_v31  ;;  %v9091_v44 = vpop.f32.mrb[47].mxu1 }
0x1175   : > { %8340 = vst.msk [vmem:[%s914_s29] sm:$0xff] %vm986_vm0, %v8339_v63 }
0x1176   : > { %9271 = shalt.err (!%p9268_p10)
}
0x1177   : > { %s9272_s4 = scalar_lea.hbm %s12314_s9, 128  ;;  %s9276_s1 = scalar_lea.hbm %s12808_s11, 256 }
0x1178   : > { %p9273_p11 = scmp.ne.s32.totalorder %s12314_s9, %s9272_s4  ;;  %p9277_p0 = scmp.lt.u32.totalorder %s12314_s9, %s12808_s11 }
0x1179   : > { %p9278_p1 = scmp.lt.u32.totalorder %s9276_s1, %s9272_s4  ;;  %p9280_p3 = scmp.lt.u32.totalorder %s9272_s4, %s12314_s9 }
0x117a   : > { %p9274_p12 = pnand %p9273_p11, %p9541_p4 }
0x117b   : > { %p9279_p2 = por %p9278_p1, %p9277_p0 }
0x117c   : > { %p9275_p13 = pneg %p9274_p12 }
0x117d   : > { %p9281_p5 = por %p9280_p3, %p9279_p2 }
0x117f   : > { %p9282_p6 = pnand %p9281_p5, %p9275_p13 }
0x1181   : > { %9285 = shalt.err (!%p9282_p6)
}
0x1182   : > { %9092 = dma.vmem_to_hbm [thread:$0]  (%p9541_p4), %s12316_s6, 128, %s12314_s9, %s8343_s30  }
0x1183 PF: > { %s12809_s3 = sld [smem:[#allocation11_spill]]  ;;  %s12810_s27 = sld [smem:[#allocation8_spill]] }
0x1189   : > { %p9103_p7 = scmp.ge.s32.totalorder %s12809_s3, 2  ;;  %s8388_s7 = sand.u32 1, %s12810_s27  }
0x118a   : > { %s8389_s8 = scalar_lea.sflag [#allocation3], %s8388_s7 }
0x118b   : > { %p9097_p9 = pnand %p9103_p7, %p9548_p8 }
0x118d   : > { %9311 = dma.done.wait (!%p9097_p9), %s8389_s8, 128  }
0x118e   : > { %9313 = vsyncadd (!%p9097_p9), %s8389_s8, 4294967168  ;;  %s8398_s4 = scalar_lea.sflag [#allocation5], %s8388_s7 }
0x118f   : > { %9315 = dma.done.wait (!%p9097_p9), %s8398_s4, 64  }
0x1190   : > { %9317 = vsyncadd (!%p9097_p9), %s8398_s4, 4294967232  ;;  %s45_s6 = sadd.s32 1, %s12809_s3   ;;  %s12812_s2 = sld [smem:[#allocation9_spill]] }
0x1191   : > { %p42_p10 = scmp.ge.s32.totalorder %s45_s6, 4   ;;  %s12813_s9 = sld [smem:[#allocation14_spill]] }
0x1192   : > { %s12814_s30 = sld [smem:[#allocation10_spill]]  ;;  %s12815_s3 = sld [smem:[#allocation12_spill]] }
0x1193   : > { %s12816_s8 = smov %s9324_s5  ;;  %44 = sbr.rel (!%p42_p10) target bundleno = 23 (0x17), region = 192 }
0x1196   : > { %s12817_s5 = smov %s12812_s2 }
0x119a   :  { %8403 = vsyncpa [#allocation3], 1 }
0x119b   :  { %8405 = vsyncpa [#allocation3 + $0x1], 1 }
0x119c   :  { %8406 = vsyncpa [#allocation5], 1 }
0x119d   :  { %8408 = vsyncpa [#allocation5 + $0x1], 1 }

</bundles_post_ra>
